<compile_context>
chip_gen: v7x
topology: tpu7x:2x2x1
jax: 0.10.0
libtpu: 0.0.40
codegen_flags: <defaults>
</compile_context>

<pallas_src>
import jax
import jax.numpy as jnp
from jax.experimental import pallas as pl
from jax.experimental.pallas import tpu as pltpu


# ----------------------------------------------------------------------------- kernel
def _make_kernel(*, k, mid, t, v, has_res):
    km = k * mid
    vv = v * v
    f32 = jnp.float32
    bf16 = jnp.bfloat16

    def mm(a, b):
        # single-pass bf16 MXU matmul with f32 accumulation.
        return jnp.dot(a.astype(bf16), b.astype(bf16), preferred_element_type=f32)

    def kernel(*refs):
        if has_res:
            (x_ref, avgR_ref, avgT_ref, colsum_ref, rt_ref, st_ref, abase_ref,
             wqw_ref, wqb_ref, wkw_ref, wkb_ref, prew_ref, preb_ref,
             postw_ref, postb_ref, resw_ref, resb_ref,
             inter_ref, intra_ref, y_ref, aex_ref) = refs
        else:
            (x_ref, avgR_ref, avgT_ref, colsum_ref, rt_ref, st_ref, abase_ref,
             wqw_ref, wqb_ref, wkw_ref, wkb_ref, prew_ref, preb_ref,
             postw_ref, postb_ref,
             inter_ref, intra_ref, y_ref, aex_ref) = refs

        x = x_ref[...]                                    # (c_in, tv) bf16, lanes (t, v)

        # ---- Q/K 1x1 convs at full (t, v) lane width, then fused time-average + expansion
        # to lane-dense (i, j) slabs (mean over t commutes with the 1x1 conv & bias).
        hq = mm(wqw_ref[...], x) + wqb_ref[...]           # (km, tv) f32
        hw = mm(wkw_ref[...], x) + wkb_ref[...]           # (km, tv) f32
        hq_e = mm(hq, avgR_ref[...])                      # (km, vv): value at lane (i,j) = mean_t hq[..,i]
        hw_e = mm(hw, avgT_ref[...])                      # (km, vv): value at lane (i,j) = mean_t hw[..,j]

        # inter-topology: tanh of pairwise differences, scaled per subset k (per-row scale).
        A_inter = jnp.tanh(hq_e - hw_e) * inter_ref[...]  # (km, vv)

        # intra-topology: s[k,(i,j)] = sum_m hq_m[i] * hw_m[j]; softmax over i per column j.
        s = (hq_e * hw_e).reshape(k, mid, vv).sum(axis=1)  # (k, vv)
        s = s - jnp.max(s, axis=-1, keepdims=True)         # per-k shift (valid for softmax over i)
        e = jnp.exp(s)                                      # (k, vv)
        den = mm(e, colsum_ref[...])                        # (k, vv): sum over i, re-expanded to (i,j)
        soft = e * pl.reciprocal(den, approx=True)
        A_intra = soft * intra_ref[...]                     # (k, vv)

        ai3 = A_inter.reshape(k, mid, vv)
        A_ex = (ai3 + A_intra[:, None, :]).reshape(km, vv)
        aex_ref[...] = A_ex                                 # lane-dense (256-wide) store
        A_full = (ai3 + (A_intra + abase_ref[...])[:, None, :]).reshape(km, vv)

        # ---- pre branch: 1x1 conv (+ folded BN) + ReLU, then lane-dense graph aggregation:
        # y[c,(t,j)] = sum_i px[c,(t,i)] * A_full[c,(i,j)].
        px = jnp.maximum(mm(prew_ref[...], x) + preb_ref[...], 0.0)   # (km, tv)
        px_e = mm(px, rt_ref[...])                          # (km, t*vv): px value at lane (t,i,j)
        a_cat = jnp.concatenate([A_full] * t, axis=-1)      # (km, t*vv): A tiled over t (lane concat)
        y_agg = mm(px_e * a_cat, st_ref[...])               # (km, tv): segment-sum over i -> lane (t,j)

        # ---- post 1x1 conv (+ folded BN), residual, ReLU.
        y = mm(postw_ref[...], y_agg) + postb_ref[...]      # (out, tv)
        if has_res:
            y = y + mm(resw_ref[...], x) + resb_ref[...]
        else:
            y = y + x.astype(f32)                           # identity residual (c_in == out)
        y_ref[...] = jnp.maximum(y, 0.0)

    return kernel


# ----------------------------------------------------------------------------- wrapper
def mte_gcn_forward(x, params, *, k, mid, t, v, out_channels):
    n, c_in = x.shape[0], x.shape[1]
    tv, vv, km = t * v, v * v, k * mid
    f32, bf16 = jnp.float32, jnp.bfloat16
    has_res = (c_in != out_channels)

    # x in native NCHW order -> (n*c_in, tv): free reshape, no HBM transpose; bf16 halves DMA.
    x2 = x.astype(bf16).reshape(n * c_in, tv)

    # batch-independent constant 0/1 (and 1/t) matrices; exact in bf16.
    eye_v = jnp.eye(v, dtype=f32)
    R = jnp.repeat(eye_v, v, axis=1)                      # (v, vv): value at lane (i,j) <- row i
    Tm = jnp.tile(eye_v, (1, v))                          # (v, vv): value at lane (i,j) <- row j
    Ssum = jnp.tile(eye_v, (v, 1))                        # (vv, v): sum over i
    avg_R = (jnp.tile(R, (t, 1)) / t).astype(bf16)        # (tv, vv): mean over t + expand over j
    avg_T = (jnp.tile(Tm, (t, 1)) / t).astype(bf16)       # (tv, vv): mean over t + expand over i
    colsum = jnp.kron(jnp.ones((v, v), f32), eye_v).astype(bf16)   # (vv, vv): sum_i, re-expanded
    RT_t = jnp.kron(jnp.eye(t, dtype=f32), R).astype(bf16)          # (tv, t*vv)
    S_t = jnp.kron(jnp.eye(t, dtype=f32), Ssum).astype(bf16)        # (t*vv, tv)

    abase = params['A'].reshape(k, vv).astype(f32)                  # (k, vv)
    inter_row = jnp.repeat(params['inter'].astype(f32), mid, axis=0)  # (km, 1)
    intra_k = params['intra'].astype(f32)                           # (k, 1)

    def w(name):
        return params[name].astype(bf16)

    def b(name):
        return params[name].astype(f32)

    inputs = [x2, avg_R, avg_T, colsum, RT_t, S_t, abase,
              w('wq_w'), b('wq_b'), w('wk_w'), b('wk_b'),
              w('pre_w'), b('pre_b'), w('post_w'), b('post_b')]
    if has_res:
        inputs += [w('res_w'), b('res_b')]
    inputs += [inter_row, intra_k]

    def full(arr):
        shp = arr.shape
        zeros = (0,) * len(shp)
        return pl.BlockSpec(shp, lambda i, _z=zeros: _z)

    in_specs = [pl.BlockSpec((c_in, tv), lambda i: (i, 0))] + [full(a) for a in inputs[1:]]

    kern = _make_kernel(k=k, mid=mid, t=t, v=v, has_res=has_res)

    # advisory cost estimate for XLA scheduling of the surrounding glue.
    macs = (3 * km * c_in * tv + 2 * km * tv * vv + k * vv * vv
            + 2 * km * tv * t * vv + out_channels * km * tv
            + (out_channels * c_in * tv if has_res else 0))
    const_bytes = sum(int(a.size) * int(a.dtype.itemsize) for a in inputs[1:])
    cost = pl.CostEstimate(
        flops=int(2 * macs * n),
        transcendentals=int((km * vv + k * vv) * n),
        bytes_accessed=int(int(x2.size) * 2 + n * out_channels * tv * 4
                           + n * km * vv * 4 + const_bytes))

    y, aex = pl.pallas_call(
        kern,
        grid=(n,),
        in_specs=in_specs,
        out_specs=[pl.BlockSpec((out_channels, tv), lambda i: (i, 0)),
                   pl.BlockSpec((km, vv), lambda i: (i, 0))],
        out_shape=[jax.ShapeDtypeStruct((n * out_channels, tv), f32),
                   jax.ShapeDtypeStruct((n * km, vv), f32)],
        compiler_params=pltpu.CompilerParams(
            dimension_semantics=("parallel",),
            vmem_limit_bytes=32 * 1024 * 1024),
        cost_estimate=cost,
    )(*inputs)

    # free reshapes back to PyTorch NCHW-style outputs (no HBM transposes).
    y = y.reshape(n, out_channels, t, v)
    aex = aex.reshape(n, km, vv)
    return y, aex


# ----------------------------------------------------------------------------- params
def make_params(key, c_in, out_channels, k, v):
    mid = out_channels // k
    km = k * mid
    keys = iter(jax.random.split(key, 32))
    eps = 1e-5

    def rnd(shape, scale=0.2):
        return jax.random.normal(next(keys), shape, dtype=jnp.float32) * scale

    def fold_bn(w, b, gamma, beta, mean, var):
        s = gamma / jnp.sqrt(var + eps)
        return w * s[:, None], (b - mean) * s + beta

    A = rnd((k, v, v), 0.3)
    wq_w, wq_b = rnd((km, c_in)), rnd((km,), 0.1)
    wk_w, wk_b = rnd((km, c_in)), rnd((km,), 0.1)

    pre_w, pre_b = rnd((km, c_in)), rnd((km,), 0.1)
    pre_w, pre_b = fold_bn(pre_w, pre_b,
                           1.0 + rnd((km,), 0.1), rnd((km,), 0.1),
                           rnd((km,), 0.1), jnp.abs(rnd((km,), 0.1)) + 0.5)

    post_w, post_b = rnd((out_channels, km)), rnd((out_channels,), 0.1)
    post_w, post_b = fold_bn(post_w, post_b,
                             1.0 + rnd((out_channels,), 0.1), rnd((out_channels,), 0.1),
                             rnd((out_channels,), 0.1), jnp.abs(rnd((out_channels,), 0.1)) + 0.5)

    if c_in != out_channels:
        res_w, res_b = rnd((out_channels, c_in)), rnd((out_channels,), 0.1)
        res_w, res_b = fold_bn(res_w, res_b,
                               1.0 + rnd((out_channels,), 0.1), rnd((out_channels,), 0.1),
                               rnd((out_channels,), 0.1), jnp.abs(rnd((out_channels,), 0.1)) + 0.5)
    else:  # nn.Identity residual (kernel skips the matmul at trace time; eye kept for the ref)
        res_w = jnp.eye(out_channels, dtype=jnp.float32)
        res_b = jnp.zeros((out_channels,), jnp.float32)

    # PyTorch inits intra_kernel / inter_kernel to zeros; use nonzero deterministic
    # values so the topology-enhancement path is actually exercised.
    inter = rnd((k,), 0.5)
    intra = rnd((k,), 0.5)

    return dict(
        A=A,
        wq_w=wq_w, wq_b=wq_b[:, None], wk_w=wk_w, wk_b=wk_b[:, None],
        pre_w=pre_w, pre_b=pre_b[:, None],
        post_w=post_w, post_b=post_b[:, None],
        res_w=res_w, res_b=res_b[:, None],
        inter=inter[:, None], intra=intra[:, None],
    )


# ----------------------------------------------------------------------------- reference (plain JAX, f32 HIGHEST)
def ref_forward(x, p, *, k, mid, t, v, out_channels):
    prec = jax.lax.Precision.HIGHEST
    n, c_in = x.shape[0], x.shape[1]
    tv = t * v
    xf = x.reshape(n, c_in, tv).astype(jnp.float32)

    def conv1x1(w, b, inp):
        return jnp.einsum('oc,ncp->nop', w, inp, precision=prec) + b[None]

    hq = conv1x1(p['wq_w'], p['wq_b'], xf).reshape(n, k, mid, t, v)
    hw = conv1x1(p['wk_w'], p['wk_b'], xf).reshape(n, k, mid, t, v)
    hq = hq.mean(axis=3, keepdims=True)                               # (n,k,mid,1,v)
    hw = hw.mean(axis=3, keepdims=True)
    diff = hq[..., :, None] - hw[..., None, :]                        # (n,k,mid,1,v,v)
    A_inter = jnp.tanh(diff) * p['inter'].reshape(1, k, 1, 1, 1, 1)
    A = A_inter + p['A'].reshape(1, k, 1, 1, v, v)
    s = jnp.einsum('nkctv,nkctw->nktvw', hq, hw, precision=prec)[:, :, None]   # (n,k,1,1,v,v)
    A_intra = jax.nn.softmax(s, axis=-2) * p['intra'].reshape(1, k, 1, 1, 1, 1)
    A = A_intra + A
    A = A.squeeze(3)                                                  # (n,k,mid,v,v)
    px = jax.nn.relu(conv1x1(p['pre_w'], p['pre_b'], xf)).reshape(n, k, mid, t, v)
    y = jnp.einsum('nkmtv,nkmvw->nkmtw', px, A, precision=prec).reshape(n, k * mid, tv)
    y = conv1x1(p['post_w'], p['post_b'], y)
    res = conv1x1(p['res_w'], p['res_b'], xf)
    out = jax.nn.relu(y + res).reshape(n, out_channels, t, v)
    A_extra = (A_inter + A_intra).squeeze(3).reshape(n, k * mid, v * v)
    return out, A_extra


# ----------------------------------------------------------------------------- main
if __name__ == "__main__":
    N, C_IN, OUT, K, T, V = 2, 8, 32, 4, 8, 16
    MID = OUT // K

    kx, kp = jax.random.split(jax.random.PRNGKey(0))
    x = jax.random.normal(kx, (N, C_IN, T, V), dtype=jnp.float32)
    params = make_params(kp, C_IN, OUT, K, V)

    y, a_extra = mte_gcn_forward(x, params, k=K, mid=MID, t=T, v=V, out_channels=OUT)
    y = jax.block_until_ready(y)
    a_extra = jax.block_until_ready(a_extra)

    y_ref, a_ref = ref_forward(x, params, k=K, mid=MID, t=T, v=V, out_channels=OUT)

    assert y.shape == (N, OUT, T, V) and a_extra.shape == (N, K * MID, V * V)

    # Kernel matmuls run as single-pass bf16 on the MXU (f32 accumulate), so compare against
    # the f32 HIGHEST-precision reference with a bf16-level, scale-aware tolerance.
    def _assert_close(name, got, want, tol):
        err = float(jnp.max(jnp.abs(got - want)))
        scale = 1.0 + float(jnp.max(jnp.abs(want)))
        assert err <= tol * scale, f"{name}: max|err|={err:.4e} scale={scale:.3f}"

    _assert_close("y", y, y_ref, 5e-2)
    _assert_close("A_extra", a_extra, a_ref, 5e-2)
    print("KERNEL_OK")
</pallas_src>

<mosaic_0001>
module attributes {stable_mosaic.version = 11 : i64} {
  func.func @kernel(%arg0: i32, %arg1: memref<8x128xbf16, #tpu.memory_space<vmem>>, %arg2: memref<128x256xbf16, #tpu.memory_space<vmem>>, %arg3: memref<128x256xbf16, #tpu.memory_space<vmem>>, %arg4: memref<256x256xbf16, #tpu.memory_space<vmem>>, %arg5: memref<128x2048xbf16, #tpu.memory_space<vmem>>, %arg6: memref<2048x128xbf16, #tpu.memory_space<vmem>>, %arg7: memref<4x256xf32, #tpu.memory_space<vmem>>, %arg8: memref<32x8xbf16, #tpu.memory_space<vmem>>, %arg9: memref<32x1xf32, #tpu.memory_space<vmem>>, %arg10: memref<32x8xbf16, #tpu.memory_space<vmem>>, %arg11: memref<32x1xf32, #tpu.memory_space<vmem>>, %arg12: memref<32x8xbf16, #tpu.memory_space<vmem>>, %arg13: memref<32x1xf32, #tpu.memory_space<vmem>>, %arg14: memref<32x32xbf16, #tpu.memory_space<vmem>>, %arg15: memref<32x1xf32, #tpu.memory_space<vmem>>, %arg16: memref<32x8xbf16, #tpu.memory_space<vmem>>, %arg17: memref<32x1xf32, #tpu.memory_space<vmem>>, %arg18: memref<32x1xf32, #tpu.memory_space<vmem>>, %arg19: memref<4x1xf32, #tpu.memory_space<vmem>>, %arg20: memref<32x128xf32, #tpu.memory_space<vmem>>, %arg21: memref<32x256xf32, #tpu.memory_space<vmem>>) attributes {dimension_semantics = [#tpu.dimension_semantics<parallel>], iteration_bounds = array<i64: 2>, scalar_prefetch = 0 : i64, scratch_operands = 0 : i64, tpu.core_type = #tpu.core_type<tc>, window_params = [{transform_indices = @transform_0, window_bounds = array<i64: 8, 128>}, {pipeline_mode = #tpu.pipeline_mode<synchronous>, transform_indices = @transform_1, window_bounds = array<i64: 128, 256>}, {pipeline_mode = #tpu.pipeline_mode<synchronous>, transform_indices = @transform_2, window_bounds = array<i64: 128, 256>}, {pipeline_mode = #tpu.pipeline_mode<synchronous>, transform_indices = @transform_3, window_bounds = array<i64: 256, 256>}, {pipeline_mode = #tpu.pipeline_mode<synchronous>, transform_indices = @transform_4, window_bounds = array<i64: 128, 2048>}, {pipeline_mode = #tpu.pipeline_mode<synchronous>, transform_indices = @transform_5, window_bounds = array<i64: 2048, 128>}, {pipeline_mode = #tpu.pipeline_mode<synchronous>, transform_indices = @transform_6, window_bounds = array<i64: 4, 256>}, {pipeline_mode = #tpu.pipeline_mode<synchronous>, transform_indices = @transform_7, window_bounds = array<i64: 32, 8>}, {pipeline_mode = #tpu.pipeline_mode<synchronous>, transform_indices = @transform_8, window_bounds = array<i64: 32, 1>}, {pipeline_mode = #tpu.pipeline_mode<synchronous>, transform_indices = @transform_9, window_bounds = array<i64: 32, 8>}, {pipeline_mode = #tpu.pipeline_mode<synchronous>, transform_indices = @transform_10, window_bounds = array<i64: 32, 1>}, {pipeline_mode = #tpu.pipeline_mode<synchronous>, transform_indices = @transform_11, window_bounds = array<i64: 32, 8>}, {pipeline_mode = #tpu.pipeline_mode<synchronous>, transform_indices = @transform_12, window_bounds = array<i64: 32, 1>}, {pipeline_mode = #tpu.pipeline_mode<synchronous>, transform_indices = @transform_13, window_bounds = array<i64: 32, 32>}, {pipeline_mode = #tpu.pipeline_mode<synchronous>, transform_indices = @transform_14, window_bounds = array<i64: 32, 1>}, {pipeline_mode = #tpu.pipeline_mode<synchronous>, transform_indices = @transform_15, window_bounds = array<i64: 32, 8>}, {pipeline_mode = #tpu.pipeline_mode<synchronous>, transform_indices = @transform_16, window_bounds = array<i64: 32, 1>}, {pipeline_mode = #tpu.pipeline_mode<synchronous>, transform_indices = @transform_17, window_bounds = array<i64: 32, 1>}, {pipeline_mode = #tpu.pipeline_mode<synchronous>, transform_indices = @transform_18, window_bounds = array<i64: 4, 1>}, {transform_indices = @transform_19, window_bounds = array<i64: 32, 128>}, {transform_indices = @transform_20, window_bounds = array<i64: 32, 256>}]} {
    %c0 = arith.constant 0 : index
    %c0_0 = arith.constant 0 : index
    %0 = vector.load %arg1[%c0, %c0_0] : memref<8x128xbf16, #tpu.memory_space<vmem>>, vector<8x128xbf16>
    %c0_1 = arith.constant 0 : index
    %c0_2 = arith.constant 0 : index
    %1 = vector.load %arg8[%c0_1, %c0_2] : memref<32x8xbf16, #tpu.memory_space<vmem>>, vector<32x8xbf16>
    %cst = arith.constant dense<0.000000e+00> : vector<32x128xf32>
    %2 = tpu.matmul %1, %0, %cst {dimension_numbers = #tpu.dot_dimension_numbers<[1], [0], [0], [1], [0, 0, 1, 1], [], []>} : vector<32x8xbf16>, vector<8x128xbf16>, vector<32x128xf32> -> vector<32x128xf32>
    %c0_3 = arith.constant 0 : index
    %c0_4 = arith.constant 0 : index
    %3 = vector.load %arg9[%c0_3, %c0_4] : memref<32x1xf32, #tpu.memory_space<vmem>>, vector<32x1xf32>
    %4 = vector.broadcast %3 : vector<32x1xf32> to vector<32x128xf32>
    %5 = arith.addf %2, %4 : vector<32x128xf32>
    %c0_5 = arith.constant 0 : index
    %c0_6 = arith.constant 0 : index
    %6 = vector.load %arg10[%c0_5, %c0_6] : memref<32x8xbf16, #tpu.memory_space<vmem>>, vector<32x8xbf16>
    %cst_7 = arith.constant dense<0.000000e+00> : vector<32x128xf32>
    %7 = tpu.matmul %6, %0, %cst_7 {dimension_numbers = #tpu.dot_dimension_numbers<[1], [0], [0], [1], [0, 0, 1, 1], [], []>} : vector<32x8xbf16>, vector<8x128xbf16>, vector<32x128xf32> -> vector<32x128xf32>
    %c0_8 = arith.constant 0 : index
    %c0_9 = arith.constant 0 : index
    %8 = vector.load %arg11[%c0_8, %c0_9] : memref<32x1xf32, #tpu.memory_space<vmem>>, vector<32x1xf32>
    %9 = vector.broadcast %8 : vector<32x1xf32> to vector<32x128xf32>
    %10 = arith.addf %7, %9 : vector<32x128xf32>
    %c0_10 = arith.constant 0 : index
    %c0_11 = arith.constant 0 : index
    %11 = vector.load %arg2[%c0_10, %c0_11] : memref<128x256xbf16, #tpu.memory_space<vmem>>, vector<128x256xbf16>
    %12 = arith.truncf %5 : vector<32x128xf32> to vector<32x128xbf16>
    %cst_12 = arith.constant dense<0.000000e+00> : vector<32x256xf32>
    %13 = tpu.matmul %12, %11, %cst_12 {dimension_numbers = #tpu.dot_dimension_numbers<[1], [0], [0], [1], [0, 0, 1, 1], [], []>} : vector<32x128xbf16>, vector<128x256xbf16>, vector<32x256xf32> -> vector<32x256xf32>
    %c0_13 = arith.constant 0 : index
    %c0_14 = arith.constant 0 : index
    %14 = vector.load %arg3[%c0_13, %c0_14] : memref<128x256xbf16, #tpu.memory_space<vmem>>, vector<128x256xbf16>
    %15 = arith.truncf %10 : vector<32x128xf32> to vector<32x128xbf16>
    %cst_15 = arith.constant dense<0.000000e+00> : vector<32x256xf32>
    %16 = tpu.matmul %15, %14, %cst_15 {dimension_numbers = #tpu.dot_dimension_numbers<[1], [0], [0], [1], [0, 0, 1, 1], [], []>} : vector<32x128xbf16>, vector<128x256xbf16>, vector<32x256xf32> -> vector<32x256xf32>
    %17 = arith.subf %13, %16 : vector<32x256xf32>
    %18 = math.tanh %17 : vector<32x256xf32>
    %c0_16 = arith.constant 0 : index
    %c0_17 = arith.constant 0 : index
    %19 = vector.load %arg18[%c0_16, %c0_17] : memref<32x1xf32, #tpu.memory_space<vmem>>, vector<32x1xf32>
    %20 = vector.broadcast %19 : vector<32x1xf32> to vector<32x256xf32>
    %21 = arith.mulf %18, %20 : vector<32x256xf32>
    %22 = arith.mulf %13, %16 : vector<32x256xf32>
    %23 = vector.shape_cast %22 : vector<32x256xf32> to vector<4x8x256xf32>
    %cst_18 = arith.constant dense<0.000000e+00> : vector<4x256xf32>
    %24 = vector.multi_reduction <add>, %23, %cst_18 [1] : vector<4x8x256xf32> to vector<4x256xf32>
    %cst_19 = arith.constant dense<0xFF800000> : vector<4xf32>
    %25 = vector.multi_reduction <maximumf>, %24, %cst_19 [1] : vector<4x256xf32> to vector<4xf32>
    %26 = vector.shape_cast %25 : vector<4xf32> to vector<4x1xf32>
    %27 = vector.broadcast %26 : vector<4x1xf32> to vector<4x256xf32>
    %28 = arith.subf %24, %27 : vector<4x256xf32>
    %29 = math.exp %28 : vector<4x256xf32>
    %c0_20 = arith.constant 0 : index
    %c0_21 = arith.constant 0 : index
    %30 = vector.load %arg4[%c0_20, %c0_21] : memref<256x256xbf16, #tpu.memory_space<vmem>>, vector<256x256xbf16>
    %31 = arith.truncf %29 : vector<4x256xf32> to vector<4x256xbf16>
    %cst_22 = arith.constant dense<0.000000e+00> : vector<4x256xf32>
    %32 = tpu.matmul %31, %30, %cst_22 {dimension_numbers = #tpu.dot_dimension_numbers<[1], [0], [0], [1], [0, 0, 1, 1], [], []>} : vector<4x256xbf16>, vector<256x256xbf16>, vector<4x256xf32> -> vector<4x256xf32>
    %33 = tpu.reciprocal %32 {approx = true} : vector<4x256xf32> -> vector<4x256xf32>
    %34 = arith.mulf %29, %33 : vector<4x256xf32>
    %c0_23 = arith.constant 0 : index
    %c0_24 = arith.constant 0 : index
    %35 = vector.load %arg19[%c0_23, %c0_24] : memref<4x1xf32, #tpu.memory_space<vmem>>, vector<4x1xf32>
    %36 = vector.broadcast %35 : vector<4x1xf32> to vector<4x256xf32>
    %37 = arith.mulf %34, %36 : vector<4x256xf32>
    %38 = vector.shape_cast %21 : vector<32x256xf32> to vector<4x8x256xf32>
    %39 = vector.shape_cast %37 : vector<4x256xf32> to vector<4x1x256xf32>
    %40 = vector.broadcast %39 : vector<4x1x256xf32> to vector<4x8x256xf32>
    %41 = arith.addf %38, %40 : vector<4x8x256xf32>
    %42 = vector.shape_cast %41 : vector<4x8x256xf32> to vector<32x256xf32>
    %c0_25 = arith.constant 0 : index
    %c0_26 = arith.constant 0 : index
    %43 = vector.load %arg21[%c0_25, %c0_26] : memref<32x256xf32, #tpu.memory_space<vmem>>, vector<32x256xf32>
    tpu.vector_store %arg21[%c0_25, %c0_26], %42 {strides = array<i32>} : memref<32x256xf32, #tpu.memory_space<vmem>>, vector<32x256xf32>,
    %c0_27 = arith.constant 0 : index
    %c0_28 = arith.constant 0 : index
    %44 = vector.load %arg7[%c0_27, %c0_28] : memref<4x256xf32, #tpu.memory_space<vmem>>, vector<4x256xf32>
    %45 = arith.addf %37, %44 : vector<4x256xf32>
    %46 = vector.shape_cast %45 : vector<4x256xf32> to vector<4x1x256xf32>
    %47 = vector.broadcast %46 : vector<4x1x256xf32> to vector<4x8x256xf32>
    %48 = arith.addf %38, %47 : vector<4x8x256xf32>
    %49 = vector.shape_cast %48 : vector<4x8x256xf32> to vector<32x256xf32>
    %c0_29 = arith.constant 0 : index
    %c0_30 = arith.constant 0 : index
    %50 = vector.load %arg12[%c0_29, %c0_30] : memref<32x8xbf16, #tpu.memory_space<vmem>>, vector<32x8xbf16>
    %cst_31 = arith.constant dense<0.000000e+00> : vector<32x128xf32>
    %51 = tpu.matmul %50, %0, %cst_31 {dimension_numbers = #tpu.dot_dimension_numbers<[1], [0], [0], [1], [0, 0, 1, 1], [], []>} : vector<32x8xbf16>, vector<8x128xbf16>, vector<32x128xf32> -> vector<32x128xf32>
    %c0_32 = arith.constant 0 : index
    %c0_33 = arith.constant 0 : index
    %52 = vector.load %arg13[%c0_32, %c0_33] : memref<32x1xf32, #tpu.memory_space<vmem>>, vector<32x1xf32>
    %53 = vector.broadcast %52 : vector<32x1xf32> to vector<32x128xf32>
    %54 = arith.addf %51, %53 : vector<32x128xf32>
    %cst_34 = arith.constant 0.000000e+00 : f32
    %55 = vector.broadcast %cst_34 : f32 to vector<32x128xf32>
    %56 = arith.maximumf %54, %55 : vector<32x128xf32>
    %c0_35 = arith.constant 0 : index
    %c0_36 = arith.constant 0 : index
    %57 = vector.load %arg5[%c0_35, %c0_36] : memref<128x2048xbf16, #tpu.memory_space<vmem>>, vector<128x2048xbf16>
    %58 = arith.truncf %56 : vector<32x128xf32> to vector<32x128xbf16>
    %cst_37 = arith.constant dense<0.000000e+00> : vector<32x2048xf32>
    %59 = tpu.matmul %58, %57, %cst_37 {dimension_numbers = #tpu.dot_dimension_numbers<[1], [0], [0], [1], [0, 0, 1, 1], [], []>} : vector<32x128xbf16>, vector<128x2048xbf16>, vector<32x2048xf32> -> vector<32x2048xf32>
    %60 = tpu.concatenate %49, %49, %49, %49, %49, %49, %49, %49 in 1 : vector<32x256xf32>, vector<32x256xf32>, vector<32x256xf32>, vector<32x256xf32>, vector<32x256xf32>, vector<32x256xf32>, vector<32x256xf32>, vector<32x256xf32> -> vector<32x2048xf32>
    %61 = arith.mulf %59, %60 : vector<32x2048xf32>
    %c0_38 = arith.constant 0 : index
    %c0_39 = arith.constant 0 : index
    %62 = vector.load %arg6[%c0_38, %c0_39] : memref<2048x128xbf16, #tpu.memory_space<vmem>>, vector<2048x128xbf16>
    %63 = arith.truncf %61 : vector<32x2048xf32> to vector<32x2048xbf16>
    %cst_40 = arith.constant dense<0.000000e+00> : vector<32x128xf32>
    %64 = tpu.matmul %63, %62, %cst_40 {dimension_numbers = #tpu.dot_dimension_numbers<[1], [0], [0], [1], [0, 0, 1, 1], [], []>} : vector<32x2048xbf16>, vector<2048x128xbf16>, vector<32x128xf32> -> vector<32x128xf32>
    %c0_41 = arith.constant 0 : index
    %c0_42 = arith.constant 0 : index
    %65 = vector.load %arg14[%c0_41, %c0_42] : memref<32x32xbf16, #tpu.memory_space<vmem>>, vector<32x32xbf16>
    %66 = arith.truncf %64 : vector<32x128xf32> to vector<32x128xbf16>
    %cst_43 = arith.constant dense<0.000000e+00> : vector<32x128xf32>
    %67 = tpu.matmul %65, %66, %cst_43 {dimension_numbers = #tpu.dot_dimension_numbers<[1], [0], [0], [1], [0, 0, 1, 1], [], []>} : vector<32x32xbf16>, vector<32x128xbf16>, vector<32x128xf32> -> vector<32x128xf32>
    %c0_44 = arith.constant 0 : index
    %c0_45 = arith.constant 0 : index
    %68 = vector.load %arg15[%c0_44, %c0_45] : memref<32x1xf32, #tpu.memory_space<vmem>>, vector<32x1xf32>
    %69 = vector.broadcast %68 : vector<32x1xf32> to vector<32x128xf32>
    %70 = arith.addf %67, %69 : vector<32x128xf32>
    %c0_46 = arith.constant 0 : index
    %c0_47 = arith.constant 0 : index
    %71 = vector.load %arg16[%c0_46, %c0_47] : memref<32x8xbf16, #tpu.memory_space<vmem>>, vector<32x8xbf16>
    %cst_48 = arith.constant dense<0.000000e+00> : vector<32x128xf32>
    %72 = tpu.matmul %71, %0, %cst_48 {dimension_numbers = #tpu.dot_dimension_numbers<[1], [0], [0], [1], [0, 0, 1, 1], [], []>} : vector<32x8xbf16>, vector<8x128xbf16>, vector<32x128xf32> -> vector<32x128xf32>
    %73 = arith.addf %70, %72 : vector<32x128xf32>
    %c0_49 = arith.constant 0 : index
    %c0_50 = arith.constant 0 : index
    %74 = vector.load %arg17[%c0_49, %c0_50] : memref<32x1xf32, #tpu.memory_space<vmem>>, vector<32x1xf32>
    %75 = vector.broadcast %74 : vector<32x1xf32> to vector<32x128xf32>
    %76 = arith.addf %73, %75 : vector<32x128xf32>
    %cst_51 = arith.constant 0.000000e+00 : f32
    %77 = vector.broadcast %cst_51 : f32 to vector<32x128xf32>
    %78 = arith.maximumf %76, %77 : vector<32x128xf32>
    %c0_52 = arith.constant 0 : index
    %c0_53 = arith.constant 0 : index
    %79 = vector.load %arg20[%c0_52, %c0_53] : memref<32x128xf32, #tpu.memory_space<vmem>>, vector<32x128xf32>
    tpu.vector_store %arg20[%c0_52, %c0_53], %78 {strides = array<i32>} : memref<32x128xf32, #tpu.memory_space<vmem>>, vector<32x128xf32>,
    return
  }
  func.func @transform_0(%arg0: i32) -> (i32, i32) {
    %c0_i32 = arith.constant 0 : i32
    %c0_i32_0 = arith.constant 0 : i32
    return %arg0, %c0_i32 : i32, i32
  }
  func.func @transform_1(%arg0: i32) -> (i32, i32) {
    %c0_i32 = arith.constant 0 : i32
    %c0_i32_0 = arith.constant 0 : i32
    %c0_i32_1 = arith.constant 0 : i32
    return %c0_i32, %c0_i32_0 : i32, i32
  }
  func.func @transform_2(%arg0: i32) -> (i32, i32) {
    %c0_i32 = arith.constant 0 : i32
    %c0_i32_0 = arith.constant 0 : i32
    %c0_i32_1 = arith.constant 0 : i32
    return %c0_i32, %c0_i32_0 : i32, i32
  }
  func.func @transform_3(%arg0: i32) -> (i32, i32) {
    %c0_i32 = arith.constant 0 : i32
    %c0_i32_0 = arith.constant 0 : i32
    %c0_i32_1 = arith.constant 0 : i32
    return %c0_i32, %c0_i32_0 : i32, i32
  }
  func.func @transform_4(%arg0: i32) -> (i32, i32) {
    %c0_i32 = arith.constant 0 : i32
    %c0_i32_0 = arith.constant 0 : i32
    %c0_i32_1 = arith.constant 0 : i32
    return %c0_i32, %c0_i32_0 : i32, i32
  }
  func.func @transform_5(%arg0: i32) -> (i32, i32) {
    %c0_i32 = arith.constant 0 : i32
    %c0_i32_0 = arith.constant 0 : i32
    %c0_i32_1 = arith.constant 0 : i32
    return %c0_i32, %c0_i32_0 : i32, i32
  }
  func.func @transform_6(%arg0: i32) -> (i32, i32) {
    %c0_i32 = arith.constant 0 : i32
    %c0_i32_0 = arith.constant 0 : i32
    %c0_i32_1 = arith.constant 0 : i32
    return %c0_i32, %c0_i32_0 : i32, i32
  }
  func.func @transform_7(%arg0: i32) -> (i32, i32) {
    %c0_i32 = arith.constant 0 : i32
    %c0_i32_0 = arith.constant 0 : i32
    %c0_i32_1 = arith.constant 0 : i32
    return %c0_i32, %c0_i32_0 : i32, i32
  }
  func.func @transform_8(%arg0: i32) -> (i32, i32) {
    %c0_i32 = arith.constant 0 : i32
    %c0_i32_0 = arith.constant 0 : i32
    %c0_i32_1 = arith.constant 0 : i32
    return %c0_i32, %c0_i32_0 : i32, i32
  }
  func.func @transform_9(%arg0: i32) -> (i32, i32) {
    %c0_i32 = arith.constant 0 : i32
    %c0_i32_0 = arith.constant 0 : i32
    %c0_i32_1 = arith.constant 0 : i32
    return %c0_i32, %c0_i32_0 : i32, i32
  }
  func.func @transform_10(%arg0: i32) -> (i32, i32) {
    %c0_i32 = arith.constant 0 : i32
    %c0_i32_0 = arith.constant 0 : i32
    %c0_i32_1 = arith.constant 0 : i32
    return %c0_i32, %c0_i32_0 : i32, i32
  }
  func.func @transform_11(%arg0: i32) -> (i32, i32) {
    %c0_i32 = arith.constant 0 : i32
    %c0_i32_0 = arith.constant 0 : i32
    %c0_i32_1 = arith.constant 0 : i32
    return %c0_i32, %c0_i32_0 : i32, i32
  }
  func.func @transform_12(%arg0: i32) -> (i32, i32) {
    %c0_i32 = arith.constant 0 : i32
    %c0_i32_0 = arith.constant 0 : i32
    %c0_i32_1 = arith.constant 0 : i32
    return %c0_i32, %c0_i32_0 : i32, i32
  }
  func.func @transform_13(%arg0: i32) -> (i32, i32) {
    %c0_i32 = arith.constant 0 : i32
    %c0_i32_0 = arith.constant 0 : i32
    %c0_i32_1 = arith.constant 0 : i32
    return %c0_i32, %c0_i32_0 : i32, i32
  }
  func.func @transform_14(%arg0: i32) -> (i32, i32) {
    %c0_i32 = arith.constant 0 : i32
    %c0_i32_0 = arith.constant 0 : i32
    %c0_i32_1 = arith.constant 0 : i32
    return %c0_i32, %c0_i32_0 : i32, i32
  }
  func.func @transform_15(%arg0: i32) -> (i32, i32) {
    %c0_i32 = arith.constant 0 : i32
    %c0_i32_0 = arith.constant 0 : i32
    %c0_i32_1 = arith.constant 0 : i32
    return %c0_i32, %c0_i32_0 : i32, i32
  }
  func.func @transform_16(%arg0: i32) -> (i32, i32) {
    %c0_i32 = arith.constant 0 : i32
    %c0_i32_0 = arith.constant 0 : i32
    %c0_i32_1 = arith.constant 0 : i32
    return %c0_i32, %c0_i32_0 : i32, i32
  }
  func.func @transform_17(%arg0: i32) -> (i32, i32) {
    %c0_i32 = arith.constant 0 : i32
    %c0_i32_0 = arith.constant 0 : i32
    %c0_i32_1 = arith.constant 0 : i32
    return %c0_i32, %c0_i32_0 : i32, i32
  }
  func.func @transform_18(%arg0: i32) -> (i32, i32) {
    %c0_i32 = arith.constant 0 : i32
    %c0_i32_0 = arith.constant 0 : i32
    %c0_i32_1 = arith.constant 0 : i32
    return %c0_i32, %c0_i32_0 : i32, i32
  }
  func.func @transform_19(%arg0: i32) -> (i32, i32) {
    %c0_i32 = arith.constant 0 : i32
    %c0_i32_0 = arith.constant 0 : i32
    return %arg0, %c0_i32 : i32, i32
  }
  func.func @transform_20(%arg0: i32) -> (i32, i32) {
    %c0_i32 = arith.constant 0 : i32
    %c0_i32_0 = arith.constant 0 : i32
    return %arg0, %c0_i32 : i32, i32
  }
}

</mosaic_0001>

<bundles_post_ra>
// kernel: tpu_custom_call.1
= control target key start
LH: loop header
LB: loop body
LE: loop exit
PB: predicated region body
PF: predicated region fallthrough
CT: control target
= control target key end

     0   :  { %s7559_s0 = inlined_call_operand.vmem [shape: bf16[16,128], index: 0, kind: input, shape index: {}]   ;;  %s7560_s1 = inlined_call_operand.hbm [shape: bf16[128,256], index: 1, kind: input, shape index: {}]   ;;  %s7561_s2 = inlined_call_operand.hbm [shape: bf16[128,256], index: 2, kind: input, shape index: {}]   ;;  %s7562_s3 = inlined_call_operand.vmem [shape: bf16[256,256], index: 3, kind: input, shape index: {}]   ;;  %s7563_s4 = inlined_call_operand.hbm [shape: bf16[128,2048], index: 4, kind: input, shape index: {}]   ;;  %s7564_s5 = inlined_call_operand.hbm [shape: bf16[2048,128], index: 5, kind: input, shape index: {}]   ;;  %s7565_s6 = inlined_call_operand.vmem [shape: f32[4,256], index: 6, kind: input, shape index: {}]   ;;  %s7566_s7 = inlined_call_operand.vmem [shape: bf16[32,8], index: 7, kind: input, shape index: {}]   ;;  %s7567_s8 = inlined_call_operand.vmem [shape: f32[32,1], index: 8, kind: input, shape index: {}]   ;;  %s7568_s9 = inlined_call_operand.vmem [shape: bf16[32,8], index: 9, kind: input, shape index: {}]   ;;  %s7569_s10 = inlined_call_operand.vmem [shape: f32[32,1], index: 10, kind: input, shape index: {}]   ;;  %s7570_s11 = inlined_call_operand.vmem [shape: bf16[32,8], index: 11, kind: input, shape index: {}]   ;;  %s7571_s12 = inlined_call_operand.vmem [shape: f32[32,1], index: 12, kind: input, shape index: {}]   ;;  %s7572_s13 = inlined_call_operand.vmem [shape: bf16[32,32], index: 13, kind: input, shape index: {}]   ;;  %s7573_s14 = inlined_call_operand.vmem [shape: f32[32,1], index: 14, kind: input, shape index: {}]   ;;  %s7574_s15 = inlined_call_operand.vmem [shape: bf16[32,8], index: 15, kind: input, shape index: {}]   ;;  %s7575_s16 = inlined_call_operand.vmem [shape: f32[32,1], index: 16, kind: input, shape index: {}]   ;;  %s7576_s17 = inlined_call_operand.vmem [shape: f32[32,1], index: 17, kind: input, shape index: {}]   ;;  %s7577_s18 = inlined_call_operand.vmem [shape: f32[4,1], index: 18, kind: input, shape index: {}]   ;;  %s7578_s19 = inlined_call_operand.hbm [shape: f32[64,128], index: 19, kind: output, shape index: {0}]   ;;  %s7579_s20 = inlined_call_operand.hbm [shape: f32[64,256], index: 20, kind: output, shape index: {1}]  }
   0x1   :  { %7603 = sst [smem:[#allocation48_spill]] %s7559_s0 }
   0x2   :  { %7604 = sst [smem:[#allocation49_spill]] %s7560_s1 }
   0x3   :  { %7605 = sst [smem:[#allocation50_spill]] %s7561_s2 }
   0x4   :  { %7606 = sst [smem:[#allocation51_spill]] %s7562_s3 }
   0x5   :  { %7607 = sst [smem:[#allocation52_spill]] %s7563_s4 }
   0x6   :  { %7608 = sst [smem:[#allocation53_spill]] %s7565_s6 }
   0x7   :  { %7609 = sst [smem:[#allocation54_spill]] %s7572_s13 }
   0x8   :  { %7610 = sst [smem:[#allocation55_spill]] %s7574_s15 }
   0x9   :  { %7611 = sst [smem:[#allocation56_spill]] %s7578_s19 }
   0xa   :  { %7612 = sst [smem:[#allocation57_spill]] %s7579_s20 }
   0xb   :  { %26 = vsyncpa [#allocation3], 0 }
   0xc   :  { %27 = vsyncpa [#allocation6], 0 }
   0xd   :  { %28 = vsyncpa [#allocation9], 0 }
   0xe   :  { %29 = vsyncpa [#allocation4], 0 }
   0xf   :  { %31 = vsyncpa [#allocation4 + $0x1], 0 }
  0x10   :  { %32 = vsyncpa [#allocation12], 0 }
  0x11   :  { %34 = vsyncpa [#allocation12 + $0x1], 0  ;;  %s6324_s1 = smov 0   ;;  %s6326_s22 = smov 0  }
  0x12   :  { %s6328_s23 = smov 0   ;;  %s6330_s24 = smov 0  }
  0x13 LB: > { %7613 = sst [smem:[#allocation18_spill]] %s6189_s1  ;;  %s6345_s2 = sadd.s32 4294967295, %s6201_s24   ;;  %s6201_s24 = sphi %s6330_s24, %s7723_s24   ;;  %s6197_s23 = sphi %s6328_s23, %s7726_s23   ;;  %s6193_s22 = sphi %s6326_s22, %s7725_s22   ;;  %s6189_s1 = sphi %s6324_s1, %s7724_s1  }
  0x14   : > { %7614 = sst [smem:[#allocation19_spill]] %s6193_s22  ;;  %s4963_s25 = sadd.s32 4294967294, %s6201_s24  }
  0x15   : > { %7615 = sst [smem:[#allocation20_spill]] %s6197_s23  ;;  %s6349_s3 = sadd.s32 1, %s6201_s24  }
  0x16   : > { %7616 = sst [smem:[#allocation21_spill]] %s6201_s24  ;;  %s451_s26 = sadd.s32 1, %s6197_s23 }
  0x17   : > { %7617 = sst [smem:[#allocation22_spill]] %s6349_s3  ;;  %s448_s27 = ssub.s32 %s6201_s24, %s6349_s3 }
  0x18   : > { %p461_p0 = scmp.ne.s32.totalorder %s6197_s23, %s6193_s22  ;;  %p449_p1 = scmp.eq.s32.totalorder %s448_s27, 0 }
  0x19   : > { %p462_p2 = scmp.eq.s32.totalorder %s6345_s2, 1  ;;  %p467_p3 = scmp.ne.s32.totalorder %s6193_s22, %s6189_s1 }
  0x1a   : > { %p468_p4 = scmp.eq.s32.totalorder %s4963_s25, 1  ;;  %p4964_p7 = scmp.ge.s32.totalorder %s6201_s24, 1 }
  0x1b   : > { %s6360_s28 = scalar_select %p449_p1, %s6197_s23, %s451_s26  }
  0x1c   : > { %p6362_p5 = por %p462_p2, %p461_p0  ;;  %p6366_p6 = por %p468_p4, %p467_p3 }
  0x1d   : > { %7618 = sst [smem:[#allocation23_spill]] %s6360_s28  ;;  %p501_p8 = scmp.lt.s32.totalorder %s6201_s24, 3 }
  0x1e   : > { %s7619_s4 = scalar_select %p6362_p5, 1, 0 }
  0x1f   : > { %s7621_s29 = scalar_select %p6366_p6, 1, 0 }
  0x20   : > { %7620 = sst [smem:[#allocation24_spill]] %s7619_s4  ;;  %p7594_p9 = scmp.eq.s32.totalorder %s6345_s2, 0 }
  0x21   : > { %7622 = sst [smem:[#allocation25_spill]] %s7621_s29  ;;  %p6373_p10 = pnand %p4964_p7, %p501_p8 }
  0x22   : > { %s6203_s0 = smov [#allocation5]   ;;  %s6204_s26 = smov [#allocation2]  }
  0x23   : > { %s7623_s30 = scalar_select %p6373_p10, 1, 0 }
  0x24   : > { %p5634_p11 = pneg %p6373_p10  ;;  %s526_s21 = sshll.u32 %s6203_s0, 4  ;;  %s6379_s21 = int_to_ptr.vmem [resolvable:$true] %s526_s21 }
  0x25   : > { %s513_s27 = sshll.u32 %s6204_s26, 4  ;;  %s6205_s28 = smov [#allocation7]   ;;  %s6387_s27 = int_to_ptr.vmem [resolvable:$true] %s513_s27 }
  0x26   : > { %p6383_p12 = pnand %p7594_p9, %p5634_p11  ;;  %s6389_s23 = sshll.u32 %s6205_s28, 4  ;;  %s543_s23 = int_to_ptr.vmem [resolvable:$true] %s6389_s23 }
  0x27   : > { %s7625_s1 = sld [smem:[#allocation50_spill]] }
  0x28   : > { %p6399_p0 = pneg %p6383_p12 }
  0x2d   : > { %s7626_s19 = smov %s7625_s1  ;;  %s5983_s24 = scalar_lea.hbm %s7625_s1, 2048 }
  0x2e   : > { %p5984_p13 = scmp.ne.s32.totalorder %s7626_s19, %s5983_s24  ;;  %p5990_p3 = scmp.lt.u32.totalorder %s5983_s24, %s7626_s19 }
  0x30   : > { %p5986_p1 = pnand %p6399_p0, %p5984_p13 }
  0x32   : > { %p5987_p2 = pneg %p5986_p1 }
  0x34   : > { %p5992_p4 = pnand %p5990_p3, %p5987_p2 }
  0x36   : > { %5995 = shalt.err (!%p5992_p4)
}
  0x37   : > { %s5996_s20 = scalar_lea.vmem %s6379_s21, 2048  ;;  %p6004_p9 = scmp.lt.s32.totalorder %s6379_s21, %s6379_s21 }
  0x38   : > { %p5997_p7 = scmp.ne.s32.totalorder %s6379_s21, %s5996_s20  ;;  %p6005_p6 = scmp.lt.s32.totalorder %s5996_s20, %s5996_s20 }
  0x3a   : > { %p5999_p8 = pnand %p5997_p7, %p6399_p0  ;;  %p6006_p13 = por %p6005_p6, %p6004_p9 }
  0x3c   : > { %p6000_p11 = pneg %p5999_p8 }
  0x3e   : > { %p6007_p1 = pnand %p6006_p13, %p6000_p11 }
  0x40   : > { %6010 = shalt.err (!%p6007_p1)
}
  0x41   : > { %s6206_s1 = smov 128   ;;  %s6207_s24 = smov 8  }
  0x42   : > { %5640 = dma.hbm_to_vmem [thread:$0]  (!%p6383_p12), %s7626_s19, 2048, %s6379_s21, [#allocation6], %s6206_s1, %s6206_s1, %s6207_s24  }
  0x43   : > { %s7628_s28 = sld [smem:[#allocation49_spill]] }
  0x49   : > { %s6011_s15 = scalar_lea.hbm %s7628_s28, 2048 }
  0x4a   : > { %p6012_p6 = scmp.ne.s32.totalorder %s7628_s28, %s6011_s15  ;;  %p6018_p3 = scmp.lt.u32.totalorder %s6011_s15, %s7628_s28 }
  0x4c   : > { %p6014_p9 = pnand %p6012_p6, %p6399_p0 }
  0x4e   : > { %p6015_p2 = pneg %p6014_p9 }
  0x50   : > { %p6020_p4 = pnand %p6018_p3, %p6015_p2 }
  0x52   : > { %6023 = shalt.err (!%p6020_p4)
}
  0x53   : > { %s6024_s21 = scalar_lea.vmem %s6387_s27, 2048  ;;  %p6032_p13 = scmp.lt.s32.totalorder %s6387_s27, %s6387_s27 }
  0x54   : > { %p6025_p7 = scmp.ne.s32.totalorder %s6387_s27, %s6024_s21  ;;  %p6033_p1 = scmp.lt.s32.totalorder %s6024_s21, %s6024_s21 }
  0x56   : > { %p6027_p8 = pnand %p6025_p7, %p6399_p0  ;;  %p6034_p6 = por %p6033_p1, %p6032_p13 }
  0x58   : > { %p6028_p11 = pneg %p6027_p8 }
  0x5a   : > { %p6035_p9 = pnand %p6034_p6, %p6028_p11 }
  0x5c   : > { %6038 = shalt.err (!%p6035_p9)
}
  0x5d   : > { %5637 = dma.hbm_to_vmem [thread:$0]  (!%p6383_p12), %s7628_s28, 2048, %s6387_s27, [#allocation3], %s6206_s1, %s6206_s1, %s6207_s24  }
  0x5e   : > { %s7629_s3 = sld [smem:[#allocation52_spill]] }
  0x64   : > { %s6039_s29 = scalar_lea.hbm %s7629_s3, 16384 }
  0x65   : > { %p6040_p2 = scmp.ne.s32.totalorder %s7629_s3, %s6039_s29  ;;  %p6046_p7 = scmp.lt.u32.totalorder %s6039_s29, %s7629_s3 }
  0x67   : > { %p6042_p3 = pnand %p6040_p2, %p6399_p0 }
  0x69   : > { %p6043_p4 = pneg %p6042_p3 }
  0x6b   : > { %p6048_p8 = pnand %p6046_p7, %p6043_p4 }
  0x6d   : > { %6051 = shalt.err (!%p6048_p8)
}
  0x6e   : > { %s6052_s6 = scalar_lea.vmem %s543_s23, 16384  ;;  %p6060_p6 = scmp.lt.s32.totalorder %s543_s23, %s543_s23 }
  0x6f   : > { %p6053_p11 = scmp.ne.s32.totalorder %s543_s23, %s6052_s6  ;;  %p6061_p9 = scmp.lt.s32.totalorder %s6052_s6, %s6052_s6 }
  0x71   : > { %p6055_p13 = pnand %p6053_p11, %p6399_p0  ;;  %p6062_p5 = por %p6061_p9, %p6060_p6 }
  0x73   : > { %p6056_p1 = pneg %p6055_p13 }
  0x75   : > { %p6063_p10 = pnand %p6062_p5, %p6056_p1 }
  0x77   : > { %6066 = shalt.err (!%p6063_p10)
}
  0x78   : > { %s6208_s27 = smov 1024   ;;  %s6209_s1 = smov 64  }
  0x79   : > { %5643 = dma.hbm_to_vmem [thread:$0]  (!%p6383_p12), %s7629_s3, 16384, %s543_s23, [#allocation6], %s6208_s27, %s6208_s27, %s6209_s1  }
  0x7a   : > { %s6210_s15 = smov [#allocation8]   ;;  %s6067_s26 = scalar_lea.hbm %s7564_s5, 16384 }
  0x7b   : > { %s555_s22 = sshll.u32 %s6210_s15, 4  ;;  %p6068_p5 = scmp.ne.s32.totalorder %s7564_s5, %s6067_s26  ;;  %s556_s22 = int_to_ptr.vmem [resolvable:$true] %s555_s22 }
  0x7c   : > { %p6074_p3 = scmp.lt.u32.totalorder %s6067_s26, %s7564_s5 }
  0x7d   : > { %p6070_p10 = pnand %p6068_p5, %p6399_p0 }
  0x7f   : > { %p6071_p2 = pneg %p6070_p10 }
  0x81   : > { %p6076_p4 = pnand %p6074_p3, %p6071_p2 }
  0x83   : > { %6079 = shalt.err (!%p6076_p4)
}
  0x84   : > { %s6080_s23 = scalar_lea.vmem %s556_s22, 16384  ;;  %p6088_p13 = scmp.lt.s32.totalorder %s556_s22, %s556_s22 }
  0x85   : > { %p6081_p7 = scmp.ne.s32.totalorder %s556_s22, %s6080_s23  ;;  %p6089_p1 = scmp.lt.s32.totalorder %s6080_s23, %s6080_s23 }
  0x87   : > { %p6083_p8 = pnand %p6081_p7, %p6399_p0  ;;  %p6090_p6 = por %p6089_p1, %p6088_p13 }
  0x89   : > { %p6084_p11 = pneg %p6083_p8 }
  0x8b   : > { %p6091_p9 = pnand %p6090_p6, %p6084_p11 }
  0x8d   : > { %6094 = shalt.err (!%p6091_p9)
}
  0x8e   : > { %s6211_s27 = smov 4   ;;  %p7630_p5 = scmp.ne.s32.totalorder %s7623_s30, 0 }
  0x8f   : > { %5646 = dma.hbm_to_vmem [thread:$0]  (!%p6383_p12), %s7564_s5, 16384, %s556_s22, [#allocation9], %s6209_s1, %s6209_s1, %s6211_s27  }
  0x90   : > { %617 = sbr.rel (%p7630_p5) target bundleno = 1633 (0x661), region = 96 }
  0x97   : > { %p7631_p10 = scmp.eq.s32.totalorder %s6345_s2, 0 }
  0x99   : > { %6168 = dma.done.wait (%p7631_p10), [#allocation3], 2048   ;;  %p7632_p0 = pmov %p7631_p10 }
  0x9b   : > { %6170 = vsyncadd (%p7632_p0), [#allocation3], 4294965248  ;;  %p7633_p2 = pmov %p7632_p0 }
  0x9c   : > { %p7634_p3 = pmov %p7632_p0 }
  0x9d   : > { %6172 = dma.done.wait (%p7633_p2), [#allocation6], 18432  }
  0x9e   : > { %6174 = vsyncadd (%p7634_p3), [#allocation6], 4294948864  ;;  %p7635_p4 = pmov %p7632_p0 }
  0x9f   : > { %p7636_p12 = pmov %p7632_p0 }
  0xa0   : > { %6176 = dma.done.wait (%p7635_p4), [#allocation9], 16384  }
  0xa1   : > { %6178 = vsyncadd (%p7636_p12), [#allocation9], 4294950912  ;;  %p691_p7 = scmp.lt.s32.totalorder %s6345_s2, 1  ;;  %v6212_v0 = vmov 0   ;;  %s7637_s1 = sld [smem:[#allocation48_spill]]  ;;  %vm744_vm0 = vcmask 1043456  }
  0xa2   : > { %5710 = vset.pattern.permute.xlu1 %v6212_v0  ;;  %5709 = vset.pattern.permute.xlu0 %v6212_v0  ;;  %vm737_vm1 = vcmask 64512   ;;  %v5711_v3 = vld [vmem:[%s7566_s7] sm:$0xff]   ;;  %v5713_v5 = vld [vmem:[%s7566_s7 + $0x8] sm:$0xff]   ;;  %v706_v10 = vld [vmem:[%s7567_s8 + $0x18] sm:$0xff]  ;;  %vm1304_vm2 = vcmask 1041409   ;;  %vm1306_vm3 = vcmask 1042434  }
  0xa3   : > { %s692_s19 = scalar_select %p691_p7, %s6345_s2, 1  ;;  %v5712_v4 = vld [vmem:[%s7568_s9] sm:$0xff]   ;;  %5572 = vmatprep.mubr.msk.bf16.mxu0 %vm737_vm1, %v5711_v3  ;;  %v5714_v6 = vld [vmem:[%s7568_s9 + $0x8] sm:$0xff]   ;;  %v804_v12 = vld [vmem:[%s7569_s10 + $0x18] sm:$0xff]  ;;  %vm1308_vm4 = vcmask 1043459   ;;  %vm4627_vm5 = vcmask 261120  }
  0xa4   : > { %5578 = vmatprep.mubr.msk.bf16.mxu1 %vm737_vm1, %v5712_v4  ;;  %v801_v7 = vld [vmem:[%s7569_s10] sm:$0xff]  ;;  %v802_v8 = vld [vmem:[%s7569_s10 + $0x8] sm:$0xff]  ;;  %v705_v13 = vld [vmem:[%s7567_s8 + $0x10] sm:$0xff]  ;;  %s7669_s21 = sld [smem:[#allocation53_spill]]  ;;  %s7677_s6 = sld [smem:[#allocation19_spill]] }
  0xa5   : > { %s4977_s4 = sshll.u32 %s692_s19, 2  ;;  %807 = vperm.xlu1 %5710, %v801_v7   ;;  %v703_v9 = vld [vmem:[%s7567_s8] sm:$0xff]  ;;  %v704_v11 = vld [vmem:[%s7567_s8 + $0x8] sm:$0xff]  ;;  %v803_v15 = vld [vmem:[%s7569_s10 + $0x10] sm:$0xff]  ;;  %s7712_s30 = sld [smem:[#allocation54_spill]] }
  0xa6   : > { %709 = vperm.xlu0 %5709, %v703_v9   ;;  %v1788_v14 = vld [vmem:[%s7571_s12] sm:$0xff]  ;;  %v1789_v16 = vld [vmem:[%s7571_s12 + $0x8] sm:$0xff]  ;;  %v1790_v17 = vld [vmem:[%s7571_s12 + $0x10] sm:$0xff]  ;;  %s7713_s0 = sld [smem:[#allocation55_spill]]  ;;  %s7714_s26 = sld [smem:[#allocation24_spill]] }
  0xa7   : > { %s6501_s15 = scalar_lea.vmem %s7637_s1, %s4977_s4  ;;  %v1791_v18 = vld [vmem:[%s7571_s12 + $0x18] sm:$0xff]  ;;  %v1651_v19 = vld [vmem:[%s7577_s18] sm:$0xf]  ;;  %v1209_v21 = vld [vmem:[%s7576_s17 + $0x8] sm:$0xff]  ;;  %s7639_s4 = sld [smem:[#allocation51_spill]] }
  0xa8   : > { %v6504_v1 = vld [vmem:[%s6501_s15] sm:$0xf]  ;;  %v1210_v22 = vld [vmem:[%s7576_s17 + $0x10] sm:$0xff]  ;;  %v4594_v24 = vld [vmem:[%s7573_s14 + $0x8] sm:$0xff]  ;;  %s7716_s19 = sld [smem:[#allocation57_spill]]  ;;  %s6213_s29 = smov [#allocation11]  }
  0xa9   : > { %5610 = vmatprep.subr.msk.bf16.mxu0 %vm744_vm0, %v6504_v1  ;;  %5611 = vmatprep.subr.msk.bf16.mxu1 %vm744_vm0, %v6504_v1  ;;  %v6512_v2 = vsel %vm744_vm0, %v6504_v1, 0  ;;  %v1208_v20 = vld [vmem:[%s7576_s17] sm:$0xff]  ;;  %v4595_v29 = vld [vmem:[%s7573_s14 + $0x10] sm:$0xff]  ;;  %v4596_v34 = vld [vmem:[%s7573_s14 + $0x18] sm:$0xff]  ;;  %s6099_s20 = sshll.u32 %s6213_s29, 4  ;;  %s6100_s20 = int_to_ptr.vmem [resolvable:$false] %s6099_s20 }
  0xaa   : > { %7638 = vst [vmem:[#allocation26_spill] sm:$0xff] %v6512_v2  ;;  %5571 = vmatpush3.bf16.msra.mxu0 %v6512_v2  ;;  %5577 = vmatpush3.bf16.msra.mxu1 %v6512_v2  ;;  %v4593_v23 = vld [vmem:[%s7573_s14] sm:$0xff]  ;;  %v5721_v30 = vld [vmem:[#allocation2 + $0x10] ss:$8 sps:$4 sm:$0xff]   ;;  %v5723_v31 = vld [vmem:[#allocation2 + $0x14] ss:$8 sps:$4 sm:$0xff]  }
  0xab   : > { %812 = vperm.xlu1 %5710, %v802_v8   ;;  %714 = vperm.xlu0 %5709, %v704_v11   ;;  %v5715_v25 = vld [vmem:[#allocation2] ss:$8 sps:$4 sm:$0xff]   ;;  %v5717_v26 = vld [vmem:[#allocation2 + $0x4] ss:$8 sps:$4 sm:$0xff]   ;;  %v5724_v32 = vld [vmem:[#allocation5 + $0x10] ss:$8 sps:$4 sm:$0xff]  }
  0xac   : > { %v5718_v27 = vld [vmem:[#allocation5] ss:$8 sps:$4 sm:$0xff]   ;;  %v5720_v28 = vld [vmem:[#allocation5 + $0x4] ss:$8 sps:$4 sm:$0xff]   ;;  %988 = vmatprep.subr.bf16.mxu0 %v5717_v26  ;;  %v5726_v33 = vld [vmem:[#allocation5 + $0x14] ss:$8 sps:$4 sm:$0xff]  }
  0xad   : > { %5573 = vmatmul.mubr.msk.bf16.vlgmr.msra.gmra.mrb[0].mxu0 %vm737_vm1, %v5713_v5  ;;  %5579 = vmatmul.mubr.msk.bf16.vlgmr.msra.gmra.mrb[0].mxu1 %vm737_vm1, %v5714_v6  ;;  %v5727_v35 = vld [vmem:[#allocation2 + $0x20] ss:$8 sps:$4 sm:$0xff]   ;;  %v5729_v36 = vld [vmem:[#allocation2 + $0x24] ss:$8 sps:$4 sm:$0xff]   ;;  %v5733_v40 = vld [vmem:[#allocation2 + $0x30] ss:$8 sps:$4 sm:$0xff]  }
  0xae   : > { %1020 = vmatprep.mubr.bf16.mxu0 %v6212_v0  ;;  %1171 = vmatprep.mubr.bf16.mxu1 %v6212_v0  ;;  %v5730_v37 = vld [vmem:[#allocation5 + $0x20] ss:$8 sps:$4 sm:$0xff]   ;;  %v5732_v38 = vld [vmem:[#allocation5 + $0x24] ss:$8 sps:$4 sm:$0xff]   ;;  %v5735_v41 = vld [vmem:[#allocation2 + $0x34] ss:$8 sps:$4 sm:$0xff]  }
  0xaf   : > { %724 = vperm.xlu1 %5710, %v706_v10   ;;  %719 = vperm.xlu0 %5709, %v705_v13   ;;  %v4756_v39 = vld [vmem:[%s7575_s16] sm:$0xff]  ;;  %v5736_v42 = vld [vmem:[#allocation5 + $0x30] ss:$8 sps:$4 sm:$0xff]   ;;  %v5738_v43 = vld [vmem:[#allocation5 + $0x34] ss:$8 sps:$4 sm:$0xff]   ;;  %s7263_s23 = sand.u32 1, %s7677_s6  }
  0xb0   : > { %1139 = vmatprep.subr.bf16.mxu1 %v5720_v28  ;;  %989 = vmatpush1.bf16.msra.mxu0 %v5715_v25  ;;  %v4757_v44 = vld [vmem:[%s7575_s16 + $0x8] sm:$0xff]  ;;  %v4759_v49 = vld [vmem:[%s7575_s16 + $0x18] sm:$0xff]  ;;  %s4976_s27 = sshll.u32 %s7263_s23, 6  ;;  %s4798_s1 = scalar_lea.sflag [#allocation12], %s7263_s23 }
  0xb1   : > { %1140 = vmatpush1.bf16.msra.mxu1 %v5718_v27  ;;  %990 = vmatprep.subr.bf16.mxu0 %v5723_v31  ;;  %v5739_v45 = vld [vmem:[#allocation2 + $0x40] ss:$8 sps:$4 sm:$0xff]   ;;  %v5741_v46 = vld [vmem:[#allocation2 + $0x44] ss:$8 sps:$4 sm:$0xff]   ;;  %v5745_v50 = vld [vmem:[#allocation2 + $0x50] ss:$8 sps:$4 sm:$0xff]  }
  0xb2   : > { %1141 = vmatprep.subr.bf16.mxu1 %v5726_v33  ;;  %v5742_v47 = vld [vmem:[#allocation5 + $0x40] ss:$8 sps:$4 sm:$0xff]   ;;  %v5744_v48 = vld [vmem:[#allocation5 + $0x44] ss:$8 sps:$4 sm:$0xff]   ;;  %v5747_v51 = vld [vmem:[#allocation2 + $0x54] ss:$8 sps:$4 sm:$0xff]  }
  0xb3   : > { %822 = vperm.xlu1 %5710, %v804_v12   ;;  %817 = vperm.xlu0 %5709, %v803_v15   ;;  %v5748_v52 = vld [vmem:[#allocation5 + $0x50] ss:$8 sps:$4 sm:$0xff]   ;;  %v5750_v53 = vld [vmem:[#allocation5 + $0x54] ss:$8 sps:$4 sm:$0xff]   ;;  %v5753_v54 = vld [vmem:[#allocation2 + $0x64] ss:$8 sps:$4 sm:$0xff]  }
  0xb4   : > { %991 = vmatpush1.bf16.msra.mxu0 %v5721_v30  ;;  %v5756_v55 = vld [vmem:[#allocation5 + $0x64] ss:$8 sps:$4 sm:$0xff]   ;;  %v5751_v56 = vld [vmem:[#allocation2 + $0x60] ss:$8 sps:$4 sm:$0xff]   ;;  %v5759_v58 = vld [vmem:[#allocation2 + $0x74] ss:$8 sps:$4 sm:$0xff]  }
  0xb5   : > { %1142 = vmatpush1.bf16.msra.mxu1 %v5724_v32  ;;  %992 = vmatprep.subr.bf16.mxu0 %v5729_v36  ;;  %v5754_v57 = vld [vmem:[#allocation5 + $0x60] ss:$8 sps:$4 sm:$0xff]   ;;  %v5762_v59 = vld [vmem:[#allocation5 + $0x74] ss:$8 sps:$4 sm:$0xff]   ;;  %v5757_v60 = vld [vmem:[#allocation2 + $0x70] ss:$8 sps:$4 sm:$0xff]  }
  0xb6   : > { %1143 = vmatprep.subr.bf16.mxu1 %v5732_v38  ;;  %v5760_v61 = vld [vmem:[#allocation5 + $0x70] ss:$8 sps:$4 sm:$0xff]   ;;  %v5763_v31 = vld [vmem:[%s7570_s11] sm:$0xff]   ;;  %s7361_s24 = scalar_lea.vmem [#allocation11], %s4976_s27  ;;  %p7717_p11 = scmp.ne.s32.totalorder %s7714_s26, 0 }
  0xb7   : > { %1794 = vperm.xlu1 %5710, %v1788_v14   ;;  %v1897_v32 = vld [vmem:[#allocation7 + $0x80] sm:$0xff]  ;;  %s4828_s6 = sshll.u32 %s7361_s24, 4  ;;  %s7477_s6 = int_to_ptr.vmem [resolvable:$true] %s4828_s6 }
  0xb8   : > { %993 = vmatpush1.bf16.msra.mxu0 %v5727_v35  ;;  %v1905_v33 = vld [vmem:[#allocation7 + $0xc0] sm:$0xff]  ;;  %s6095_s22 = scalar_lea.vmem %s7477_s6, 1024  ;;  %p6102_p6 = scmp.lt.s32.totalorder %s7477_s6, %s6100_s20 }
  0xb9   : > { %1144 = vmatpush1.bf16.msra.mxu1 %v5730_v37  ;;  %994 = vmatprep.subr.bf16.mxu0 %v5735_v41  ;;  %v5071_v36 = vcombine.high %v1897_v32, %v1905_v33  ;;  %v5070_v37 = vcombine.low %v1897_v32, %v1905_v33  ;;  %v1913_v38 = vld [vmem:[#allocation7 + $0x100] sm:$0xff]  ;;  %p6096_p8 = scmp.ne.s32.totalorder %s7477_s6, %s6095_s22 }
  0xba   : > { %1145 = vmatprep.subr.bf16.mxu1 %v5738_v43  ;;  %v1937_v43 = vld [vmem:[#allocation7 + $0x1c0] sm:$0xff] }
  0xbb   : > { %1799 = vperm.xlu1 %5710, %v1789_v16   ;;  %v5765_v33 = vld [vmem:[%s7639_s4] ss:$8 sps:$4 sm:$0xff]   ;;  %p6097_p13 = pnand %p6096_p8, %p7717_p11 }
  0xbc   : > { %995 = vmatpush1.bf16.msra.mxu0 %v5733_v40 }
  0xbd   : > { %1146 = vmatpush1.bf16.msra.mxu1 %v5736_v42  ;;  %996 = vmatprep.subr.bf16.mxu0 %v5741_v46  ;;  %v1929_v42 = vld [vmem:[#allocation7 + $0x180] sm:$0xff]  ;;  %p6098_p1 = pneg %p6097_p13 }
  0xbe   : > { %1147 = vmatprep.subr.bf16.mxu1 %v5744_v48  ;;  %v1945_v46 = vld [vmem:[#allocation7 + $0x200] sm:$0xff] }
  0xbf   : > { %1804 = vperm.xlu1 %5710, %v1790_v17  }
  0xc0   : > { %997 = vmatpush1.bf16.msra.mxu0 %v5739_v45  ;;  %v5102_v45 = vcombine.low %v1929_v42, %v1937_v43 }
  0xc1   : > { %1148 = vmatpush1.bf16.msra.mxu1 %v5742_v47  ;;  %998 = vmatprep.subr.bf16.mxu0 %v5747_v51  ;;  %v1953_v47 = vld [vmem:[#allocation7 + $0x240] sm:$0xff] }
  0xc2   : > { %1149 = vmatprep.subr.bf16.mxu1 %v5750_v53  ;;  %v5119_v48 = vcombine.high %v1945_v46, %v1953_v47  ;;  %v1969_v51 = vld [vmem:[#allocation7 + $0x2c0] sm:$0xff] }
  0xc3   : > { %1809 = vperm.xlu1 %5710, %v1791_v18  }
  0xc4   : > { %999 = vmatpush1.bf16.msra.mxu0 %v5745_v50  ;;  %v1961_v50 = vld [vmem:[#allocation7 + $0x280] sm:$0xff] }
  0xc5   : > { %1150 = vmatpush1.bf16.msra.mxu1 %v5748_v52  ;;  %1000 = vmatprep.subr.bf16.mxu0 %v5753_v54  ;;  %v5135_v52 = vcombine.high %v1961_v50, %v1969_v51  ;;  %v5134_v53 = vcombine.low %v1961_v50, %v1969_v51  ;;  %v1977_v54 = vld [vmem:[#allocation7 + $0x300] sm:$0xff] }
  0xc6   : > { %1151 = vmatprep.subr.bf16.mxu1 %v5756_v55  ;;  %v1985_v55 = vld [vmem:[#allocation7 + $0x340] sm:$0xff] }
  0xc7   : > { %1654 = vperm.xlu1 %5710, %v1651_v19  }
  0xc8   : > { %1001 = vmatpush1.bf16.msra.mxu0 %v5751_v56  ;;  %v5151_v56 = vcombine.high %v1977_v54, %v1985_v55 }
  0xc9   : > { %1152 = vmatpush1.bf16.msra.mxu1 %v5754_v57  ;;  %1002 = vmatprep.subr.bf16.mxu0 %v5759_v58  ;;  %v5150_v57 = vcombine.low %v1977_v54, %v1985_v55  ;;  %v1993_v58 = vld [vmem:[#allocation7 + $0x380] sm:$0xff] }
  0xca   : > { %1153 = vmatprep.subr.bf16.mxu1 %v5762_v59  ;;  %v2001_v59 = vld [vmem:[#allocation7 + $0x3c0] sm:$0xff] }
  0xcb   : > { %1214 = vperm.xlu1 %5710, %v1208_v20  }
  0xcc   : > { %1003 = vmatpush1.bf16.msra.mxu0 %v5757_v60  ;;  %v5167_v60 = vcombine.high %v1993_v58, %v2001_v59 }
  0xcd   : > { %1154 = vmatpush1.bf16.msra.mxu1 %v5760_v61  ;;  %v5166_v61 = vcombine.low %v1993_v58, %v2001_v59 }
  0xce   : > { %5612 = vmatprep.subr.msk.bf16.mxu1 %vm744_vm0, %v6504_v1 }
  0xcf   : > { %1219 = vperm.xlu1 %5710, %v1209_v21  }
  0xd3   : > { %1224 = vperm.xlu1 %5710, %v1210_v22   ;;  %v1881_v22 = vld [vmem:[#allocation7] sm:$0xff] }
  0xd7   : > { %4599 = vperm.xlu1 %5710, %v4593_v23   ;;  %v1889_v23 = vld [vmem:[#allocation7 + $0x40] sm:$0xff] }
  0xd8   : > { %v5055_v30 = vcombine.high %v1881_v22, %v1889_v23  ;;  %v5054_v35 = vcombine.low %v1881_v22, %v1889_v23 }
  0xdb   : > { %4604 = vperm.xlu1 %5710, %v4594_v24  }
  0xdf   : > { %4609 = vperm.xlu1 %5710, %v4595_v29  }
  0xe3   : > { %4614 = vperm.xlu1 %5710, %v4596_v34   ;;  %v5764_v34 = vld [vmem:[%s7570_s11 + $0x8] sm:$0xff]  }
  0xe7   : > { %4762 = vperm.xlu1 %5710, %v4756_v39   ;;  %v1921_v39 = vld [vmem:[#allocation7 + $0x140] sm:$0xff] }
  0xe8   : > { %v5087_v40 = vcombine.high %v1913_v38, %v1921_v39  ;;  %v5086_v41 = vcombine.low %v1913_v38, %v1921_v39  ;;  %v5767_v39 = vld [vmem:[%s7639_s4 + $0x4] ss:$8 sps:$4 sm:$0xff]  }
  0xe9   : > { %1584 = vmatprep.subr.bf16.mxu0 %v5767_v39 }
  0xeb   : > { %4767 = vperm.xlu1 %5710, %v4757_v44   ;;  %v5103_v44 = vcombine.high %v1929_v42, %v1937_v43 }
  0xef   : > { %4777 = vperm.xlu1 %5710, %v4759_v49   ;;  %v5118_v49 = vcombine.low %v1945_v46, %v1953_v47 }
 0x124   : > { %v808_v62 = vpop.permute.xlu1 %807 }
 0x125   : > { %v710_v63 = vpop.permute.xlu0 %709 }
 0x12a   : > { %v813_v3 = vpop.permute.xlu1 %812  ;;  %v715_v4 = vpop.permute.xlu0 %714 }
 0x12e   : > { %v725_v5 = vpop.permute.xlu1 %724  ;;  %v720_v6 = vpop.permute.xlu0 %719 }
 0x132   : > { %v823_v7 = vpop.permute.xlu1 %822  ;;  %v818_v8 = vpop.permute.xlu0 %817 }
 0x180   : > { %v5574_v9 = vpop.f32.mrb[0].mxu0  ;;  %v5580_v10 = vpop.f32.mrb[0].mxu1 }
 0x181   : > { %v782_v11 = vpop.f32.mrb[1].mxu0  ;;  %v875_v12 = vpop.f32.mrb[1].mxu1  ;;  %v791_v14 = vadd.f32 %v5574_v9, %v720_v6  ;;  %v884_v18 = vadd.f32 %v5580_v10, %v818_v8 }
 0x182   : > { %v5575_v13 = vpop.f32.mrb[2].mxu0  ;;  %v5581_v16 = vpop.f32.mrb[2].mxu1  ;;  %v783_v19 = vadd.f32 %v782_v11, %v710_v63  ;;  %v876_v24 = vadd.f32 %v875_v12, %v808_v62  ;;  %v6617_v62 = vld [vmem:[#allocation7 + $0x8] sm:$0xff] }
 0x183   : > { %v794_v15 = vadd.f32 %v5575_v13, %v725_v5  ;;  %v785_v17 = vpop.f32.mrb[3].mxu0  ;;  %v887_v1 = vadd.f32 %v5581_v16, %v823_v7  ;;  %v878_v21 = vpop.f32.mrb[3].mxu1  ;;  %v6619_v63 = vld [vmem:[#allocation7 + $0x48] sm:$0xff]  ;;  %v5837_v13 = vld [vmem:[#allocation8 + $0x70] sm:$0xff]  }
 0x184   : > { %v786_v20 = vadd.f32 %v785_v17, %v715_v4  ;;  %v879_v26 = vadd.f32 %v878_v21, %v813_v3  ;;  %v5057_v3 = vcombine.high %v6617_v62, %v6619_v63  ;;  %v5056_v4 = vcombine.low %v6617_v62, %v6619_v63  ;;  %v6625_v5 = vpop.permute.xlu1 %1794  ;;  %v1930_v62 = vld [vmem:[#allocation7 + $0x188] sm:$0xff]  ;;  %v1999_v21 = vld [vmem:[#allocation7 + $0x3b0] sm:$0xff] }
 0x185   : > { %v907_v25 = vpack.c.bf16 %v794_v15, %v791_v14  ;;  %v1058_v27 = vpack.c.bf16 %v887_v1, %v884_v18  ;;  %v1938_v63 = vld [vmem:[#allocation7 + $0x1c8] sm:$0xff]  ;;  %v2007_v18 = vld [vmem:[#allocation7 + $0x3f0] sm:$0xff] }
 0x186   : > { %v906_v28 = vpack.c.bf16 %v786_v20, %v783_v19  ;;  %v1057_v29 = vpack.c.bf16 %v879_v26, %v876_v24 }
 0x188   : > { %1021 = vmatmul.mubr.bf16.vlgmr.msra.gmra.mrb[4].mxu0 %v906_v28  ;;  %1172 = vmatmul.mubr.bf16.vlgmr.msra.gmra.mrb[4].mxu1 %v1057_v29  ;;  %v6659_v24 = vpop.permute.xlu1 %1799 }
 0x189   : > { %1030 = vmatprep.mubr.bf16.mxu0 %v6212_v0  ;;  %1181 = vmatprep.mubr.bf16.mxu1 %v6212_v0 }
 0x18a   : > { %5583 = vmatpush3.bf16.msra.mxu1 %v6512_v2  ;;  %1585 = vmatpush1.bf16.msra.mxu0 %v5765_v33 }
 0x18b   : > { %2651 = vmatprep.subr.bf16.mxu1 %v5055_v30 }
 0x190   : > { %1031 = vmatmul.mubr.bf16.gmra.mrb[8].mxu0 %v907_v25  ;;  %1182 = vmatmul.mubr.bf16.gmra.mrb[8].mxu1 %v1058_v27 }
 0x191   : > { %5584 = vmatprep.mubr.msk.bf16.mxu1 %vm737_vm1, %v5763_v31 }
 0x198   : > { %5585 = vmatmul.mubr.msk.bf16.vlgmr.msra.gmra.mrb[12].mxu1 %vm737_vm1, %v5764_v34 }
 0x199   : > { %2652 = vmatpush1.bf16.msra.mxu1 %v5054_v35  ;;  %2683 = vmatprep.mubr.bf16.mxu1 %v6212_v0 }
 0x19a   : > { %2653 = vmatprep.subr.bf16.mxu1 %v5071_v36 }
 0x19d   : > { %2654 = vmatpush1.bf16.msra.mxu1 %v5070_v37 }
 0x19e   : > { %2655 = vmatprep.subr.bf16.mxu1 %v5087_v40 }
 0x1a1   : > { %2656 = vmatpush1.bf16.msra.mxu1 %v5086_v41 }
 0x1a2   : > { %2657 = vmatprep.subr.bf16.mxu1 %v5103_v44 }
 0x1a5   : > { %2658 = vmatpush1.bf16.msra.mxu1 %v5102_v45 }
 0x1a6   : > { %2659 = vmatprep.subr.bf16.mxu1 %v5119_v48 }
 0x1a9   : > { %2660 = vmatpush1.bf16.msra.mxu1 %v5118_v49  ;;  %v1805_v49 = vpop.permute.xlu1 %1804 }
 0x1aa   : > { %2661 = vmatprep.subr.bf16.mxu1 %v5135_v52  ;;  %v5768_v52 = vld [vmem:[%s7639_s4 + $0x10] ss:$8 sps:$4 sm:$0xff]  }
 0x1ad   : > { %2662 = vmatpush1.bf16.msra.mxu1 %v5134_v53  ;;  %v5770_v53 = vld [vmem:[%s7639_s4 + $0x14] ss:$8 sps:$4 sm:$0xff]  }
 0x1ae   : > { %2663 = vmatprep.subr.bf16.mxu1 %v5151_v56  ;;  %1586 = vmatprep.subr.bf16.mxu0 %v5770_v53  ;;  %v5774_v53 = vld [vmem:[%s7639_s4 + $0x30] ss:$8 sps:$4 sm:$0xff]  }
 0x1af   : > { %1587 = vmatpush1.bf16.msra.mxu0 %v5768_v52  ;;  %v1991_v56 = vld [vmem:[#allocation7 + $0x370] sm:$0xff] }
 0x1b1   : > { %2664 = vmatpush1.bf16.msra.mxu1 %v5150_v57 }
 0x1b2   : > { %2665 = vmatprep.subr.bf16.mxu1 %v5167_v60 }
 0x1b5   : > { %2666 = vmatpush1.bf16.msra.mxu1 %v5166_v61 }
 0x1b6   : > { %2704 = vmatprep.subr.bf16.mxu1 %v5057_v3 }
 0x25b   : > { %v6627_v6 = vpop.f32.mrb[4].mxu0  ;;  %v6629_v7 = vpop.f32.mrb[4].mxu1 }
 0x25c   : > { %v6631_v8 = vpop.f32.mrb[5].mxu0  ;;  %v1240_v10 = vmul.f32 %v6629_v7, %v6627_v6  ;;  %v6637_v11 = vpop.f32.mrb[5].mxu1 }
 0x25d   : > { %v6639_v12 = vpop.f32.mrb[6].mxu0  ;;  %v1241_v14 = vmul.f32 %v6637_v11, %v6631_v8  ;;  %v6645_v15 = vpop.f32.mrb[6].mxu1 }
 0x25e   : > { %v6647_v16 = vpop.f32.mrb[7].mxu0  ;;  %v1248_v17 = vrot.slane %v1240_v10, 4  ;;  %v1242_v19 = vmul.f32 %v6645_v15, %v6639_v12  ;;  %v6653_v1 = vpop.f32.mrb[7].mxu1 }
 0x25f   : > { %v1254_v20 = vrot.slane %v1241_v14, 4  ;;  %v1243_v22 = vmul.f32 %v6653_v1, %v6647_v16 }
 0x260   : > { %v1260_v23 = vrot.slane %v1242_v19, 4  ;;  %v1249_v26 = vadd.f32 %v1248_v17, %v1240_v10  ;;  %v5771_v17 = vld [vmem:[%s7639_s4 + $0x20] ss:$8 sps:$4 sm:$0xff]  }
 0x261   : > { %v1266_v25 = vrot.slane %v1243_v22, 4  ;;  %v1255_v29 = vadd.f32 %v1254_v20, %v1241_v14 }
 0x262   : > { %v1261_v27 = vadd.f32 %v1260_v23, %v1242_v19  ;;  %v1250_v45 = vrot.slane %v1249_v26, 2  ;;  %v5773_v19 = vld [vmem:[%s7639_s4 + $0x24] ss:$8 sps:$4 sm:$0xff]   ;;  %v1983_v23 = vld [vmem:[#allocation7 + $0x330] sm:$0xff] }
 0x263   : > { %v6661_v28 = vpop.f32.mrb[8].mxu0  ;;  %v1267_v30 = vadd.f32 %v1266_v25, %v1243_v22  ;;  %v6663_v31 = vpop.f32.mrb[8].mxu1  ;;  %v1256_v50 = vrot.slane %v1255_v29, 2  ;;  %1588 = vmatprep.subr.bf16.mxu0 %v5773_v19  ;;  %v5163_v35 = vcombine.high %v1983_v23, %v1991_v56 }
 0x264   : > { %v6665_v32 = vpop.f32.mrb[9].mxu0  ;;  %v1262_v34 = vrot.slane %v1261_v27, 2  ;;  %v1244_v36 = vmul.f32 %v6663_v31, %v6661_v28  ;;  %v6674_v37 = vpop.f32.mrb[9].mxu1  ;;  %v1251_v60 = vadd.f32 %v1250_v45, %v1249_v26  ;;  %1589 = vmatpush1.bf16.msra.mxu0 %v5771_v17  ;;  %v1898_v17 = vld [vmem:[#allocation7 + $0x88] sm:$0xff] }
 0x265   : > { %v6676_v38 = vpop.f32.mrb[10].mxu0  ;;  %v1268_v40 = vrot.slane %v1267_v30, 2  ;;  %v1245_v42 = vmul.f32 %v6674_v37, %v6665_v32  ;;  %v6685_v43 = vpop.f32.mrb[10].mxu1  ;;  %v1257_v61 = vadd.f32 %v1256_v50, %v1255_v29 }
 0x266   : > { %v6687_v44 = vpop.f32.mrb[11].mxu0  ;;  %v1263_v46 = vadd.f32 %v1262_v34, %v1261_v27  ;;  %v1272_v47 = vrot.slane %v1244_v36, 4  ;;  %v6689_v48 = vpop.f32.mrb[11].mxu1  ;;  %v1246_v10 = vmul.f32 %v6685_v43, %v6676_v38 }
 0x267   : > { %v1278_v51 = vrot.slane %v1245_v42, 4  ;;  %v1269_v54 = vadd.f32 %v1268_v40, %v1267_v30  ;;  %v1247_v25 = vmul.f32 %v6689_v48, %v6687_v44  ;;  %v1810_v27 = vpop.permute.xlu1 %1809  ;;  %v1258_v50 = vrot.slane %v1257_v61, 1 }
 0x268   : > { %v1273_v55 = vadd.f32 %v1272_v47, %v1244_v36  ;;  %v1264_v58 = vrot.slane %v1263_v46, 1  ;;  %v1284_v30 = vrot.slane %v1246_v10, 4  ;;  %v1252_v47 = vrot.slane %v1251_v60, 1 }
 0x269   : > { %v1279_v57 = vadd.f32 %v1278_v51, %v1245_v42  ;;  %v1270_v20 = vrot.slane %v1269_v54, 1  ;;  %v1290_v40 = vrot.slane %v1247_v25, 4 }
 0x26a   : > { %v1274_v59 = vrot.slane %v1273_v55, 2  ;;  %v1285_v52 = vadd.f32 %v1284_v30, %v1246_v10 }
 0x26b   : > { %v1280_v3 = vrot.slane %v1279_v57, 2  ;;  %v5586_v14 = vpop.f32.mrb[12].mxu1 }
 0x26c   : > { %v1275_v22 = vadd.f32 %v1274_v59, %v1273_v55  ;;  %v1862_v26 = vpop.f32.mrb[13].mxu1  ;;  %v1871_v33 = vadd.f32 %v5586_v14, %v1805_v49  ;;  %v1291_v55 = vadd.f32 %v1290_v40, %v1247_v25  ;;  %v5776_v59 = vld [vmem:[%s7639_s4 + $0x34] ss:$8 sps:$4 sm:$0xff]   ;;  %v6721_v14 = vadd.f32 %v1270_v20, %v1269_v54 }
 0x26d   : > { %v1281_v29 = vadd.f32 %v1280_v3, %v1279_v57  ;;  %v1863_v34 = vadd.f32 %v1862_v26, %v6625_v5  ;;  %v5587_v36 = vpop.f32.mrb[14].mxu1  ;;  %v6719_v3 = vadd.f32 %v1264_v58, %v1263_v46  ;;  %v1286_v19 = vrot.slane %v1285_v52, 2  ;;  %v1906_v26 = vld [vmem:[#allocation7 + $0xc8] sm:$0xff]  ;;  %1590 = vmatprep.subr.bf16.mxu0 %v5776_v59 }
 0x26e   : > { %v1276_v39 = vrot.slane %v1275_v22, 1  ;;  %v1874_v42 = vadd.f32 %v5587_v36, %v1810_v27  ;;  %v1865_v45 = vpop.f32.mrb[15].mxu1  ;;  %v1879_v49 = vmax.f32 %v1871_v33, 0.0  ;;  %v1292_v30 = vrot.slane %v1291_v55, 2  ;;  %1591 = vmatpush1.bf16.msra.mxu0 %v5774_v53  ;;  %v5779_v46 = vld [vmem:[%s7639_s4 + $0x44] ss:$8 sps:$4 sm:$0xff]  }
 0x26f   : > { %v1282_v51 = vrot.slane %v1281_v29, 1  ;;  %v1866_v5 = vadd.f32 %v1865_v45, %v6659_v24  ;;  %v1877_v10 = vmax.f32 %v1863_v34, 0.0  ;;  %v6727_v24 = vadd.f32 %v1252_v47, %v1251_v60  ;;  %v5777_v60 = vld [vmem:[%s7639_s4 + $0x40] ss:$8 sps:$4 sm:$0xff]   ;;  %1592 = vmatprep.subr.bf16.mxu0 %v5779_v46 }
 0x270   : > { %v1880_v57 = vmax.f32 %v1874_v42, 0.0  ;;  %v6723_v27 = vadd.f32 %v1276_v39, %v1275_v22  ;;  %v1287_v40 = vadd.f32 %v1286_v19, %v1285_v52  ;;  %v6734_v54 = vadd.f32 %v1258_v50, %v1257_v61  ;;  %v1914_v39 = vld [vmem:[#allocation7 + $0x108] sm:$0xff]  ;;  %v5782_v50 = vld [vmem:[%s7639_s4 + $0x54] ss:$8 sps:$4 sm:$0xff]  }
 0x271   : > { %v1878_v33 = vmax.f32 %v1866_v5, 0.0  ;;  %v6729_v36 = vadd.f32 %v1282_v51, %v1281_v29  ;;  %v1293_v58 = vadd.f32 %v1292_v30, %v1291_v55  ;;  %v5073_v22 = vcombine.high %v1898_v17, %v1906_v26  ;;  %v1922_v42 = vld [vmem:[#allocation7 + $0x148] sm:$0xff] }
 0x272   : > { %v6725_v25 = vpack.c.bf16 %v1880_v57, %v1879_v49  ;;  %v1288_v34 = vrot.slane %v1287_v40, 1  ;;  %v1305_v29 = vsel %vm1304_vm2, %v6719_v3, %v6727_v24  ;;  %v1310_v47 = vsel %vm1304_vm2, %v6721_v14, %v6734_v54  ;;  %1593 = vmatpush1.bf16.msra.mxu0 %v5777_v60  ;;  %v5780_v57 = vld [vmem:[%s7639_s4 + $0x50] ss:$8 sps:$4 sm:$0xff]   ;;  %v1954_v46 = vld [vmem:[#allocation7 + $0x248] sm:$0xff] }
 0x273   : > { %v6736_v20 = vpack.c.bf16 %v1878_v33, %v1877_v10  ;;  %v1294_v45 = vrot.slane %v1293_v58, 1  ;;  %v1307_v61 = vsel %vm1306_vm3, %v6723_v27, %v1305_v29  ;;  %v5072_v52 = vcombine.low %v1898_v17, %v1906_v26  ;;  %1594 = vmatprep.subr.bf16.mxu0 %v5782_v50  ;;  %v5783_v33 = vld [vmem:[%s7639_s4 + $0x60] ss:$8 sps:$4 sm:$0xff]  }
 0x274   : > { %v6753_v51 = vadd.f32 %v1288_v34, %v1287_v40  ;;  %v1311_v53 = vsel %vm1306_vm3, %v6729_v36, %v1310_v47  ;;  %v5089_v49 = vcombine.high %v1914_v39, %v1922_v42  ;;  %v5088_v17 = vcombine.low %v1914_v39, %v1922_v42  ;;  %v1946_v40 = vld [vmem:[#allocation7 + $0x208] sm:$0xff]  ;;  %v5786_v34 = vld [vmem:[%s7639_s4 + $0x70] ss:$8 sps:$4 sm:$0xff]  }
 0x275   : > { %2684 = vmatmul.mubr.bf16.vlgmr.msra.gmra.mrb[16].mxu1 %v6736_v20  ;;  %v6761_v55 = vadd.f32 %v1294_v45, %v1293_v58  ;;  %v5105_v30 = vcombine.high %v1930_v62, %v1938_v63  ;;  %v5788_v58 = vld [vmem:[%s7639_s4 + $0x74] ss:$8 sps:$4 sm:$0xff]   ;;  %v5121_v60 = vcombine.high %v1946_v40, %v1954_v46  ;;  %v1962_v29 = vld [vmem:[#allocation7 + $0x288] sm:$0xff]  ;;  %v5120_v45 = vcombine.low %v1946_v40, %v1954_v46  ;;  %v5792_v40 = vld [vmem:[%s7639_s4 + $0x90] ss:$8 sps:$4 sm:$0xff]  }
 0x276   : > { %2705 = vmatpush1.bf16.msra.mxu1 %v5056_v4  ;;  %2693 = vmatprep.mubr.bf16.mxu1 %v6212_v0  ;;  %v1309_v5 = vsel %vm1308_vm4, %v6753_v51, %v1307_v61  ;;  %v5785_v4 = vld [vmem:[%s7639_s4 + $0x64] ss:$8 sps:$4 sm:$0xff]   ;;  %v5789_v47 = vld [vmem:[%s7639_s4 + $0x80] ss:$8 sps:$4 sm:$0xff]  }
 0x277   : > { %2706 = vmatprep.subr.bf16.mxu1 %v5073_v22  ;;  %v1312_v59 = vsel %vm1308_vm4, %v6761_v55, %v1311_v53  ;;  %v1315_v19 = vsel %vm744_vm0, %v1309_v5, -inf  ;;  %1595 = vmatpush1.bf16.msra.mxu0 %v5780_v57  ;;  %v5104_v22 = vcombine.low %v1930_v62, %v1938_v63  ;;  %v1970_v39 = vld [vmem:[#allocation7 + $0x2c8] sm:$0xff] }
 0x278   : > { %v1316_v10 = vsel %vm744_vm0, %v1312_v59, -inf  ;;  %1596 = vmatprep.subr.bf16.mxu0 %v5785_v4  ;;  %v5791_v42 = vld [vmem:[%s7639_s4 + $0x84] ss:$8 sps:$4 sm:$0xff]   ;;  %v5137_v61 = vcombine.high %v1962_v29, %v1970_v39  ;;  %v5136_v53 = vcombine.low %v1962_v29, %v1970_v39  ;;  %v1884_v4 = vld [vmem:[#allocation7 + $0x18] sm:$0xff]  ;;  %v5795_v39 = vld [vmem:[%s7639_s4 + $0xa0] ss:$8 sps:$4 sm:$0xff]  }
 0x279   : > { %v1317_v26 = vmax.f32 %v1315_v19, %v1316_v10  ;;  %v1978_v50 = vld [vmem:[#allocation7 + $0x308] sm:$0xff]  ;;  %v1892_v59 = vld [vmem:[#allocation7 + $0x58] sm:$0xff] }
 0x27a   : > { %2707 = vmatpush1.bf16.msra.mxu1 %v5072_v52  ;;  %v1986_v52 = vld [vmem:[#allocation7 + $0x348] sm:$0xff]  ;;  %v1211_v10 = vld [vmem:[%s7576_s17 + $0x18] sm:$0xff]  ;;  %v5060_v46 = vcombine.low %v1884_v4, %v1892_v59 }
 0x27b   : > { %2708 = vmatprep.subr.bf16.mxu1 %v5089_v49  ;;  %1318 = vmax.xlane.f32.xlu0 %v1317_v26  ;;  %v5153_v49 = vcombine.high %v1978_v50, %v1986_v52  ;;  %v1994_v57 = vld [vmem:[#allocation7 + $0x388] sm:$0xff]  ;;  %v5152_v62 = vcombine.low %v1978_v50, %v1986_v52  ;;  %v5794_v26 = vld [vmem:[%s7639_s4 + $0x94] ss:$8 sps:$4 sm:$0xff]   ;;  %v5798_v52 = vld [vmem:[%s7639_s4 + $0xb0] ss:$8 sps:$4 sm:$0xff]  }
 0x27c   : > { %1597 = vmatpush1.bf16.msra.mxu0 %v5783_v33  ;;  %v2002_v5 = vld [vmem:[#allocation7 + $0x3c8] sm:$0xff]  ;;  %v1908_v33 = vld [vmem:[#allocation7 + $0xd8] sm:$0xff] }
 0x27d   : > { %2694 = vmatmul.mubr.bf16.gmra.mrb[20].mxu1 %v6725_v25  ;;  %1598 = vmatprep.subr.bf16.mxu0 %v5788_v58  ;;  %v5169_v63 = vcombine.high %v1994_v57, %v2002_v5  ;;  %v5168_v19 = vcombine.low %v1994_v57, %v2002_v5  ;;  %v4758_v58 = vld [vmem:[%s7575_s16 + $0x10] sm:$0xff]  ;;  %v1924_v29 = vld [vmem:[#allocation7 + $0x158] sm:$0xff]  ;;  %v5803_v57 = vld [vmem:[%s7639_s4 + $0xc4] ss:$8 sps:$4 sm:$0xff]  }
 0x27e   : > { %2709 = vmatpush1.bf16.msra.mxu1 %v5088_v17  ;;  %2736 = vmatprep.mubr.bf16.mxu1 %v6212_v0  ;;  %v5061_v17 = vcombine.high %v1884_v4, %v1892_v59  ;;  %v1940_v50 = vld [vmem:[#allocation7 + $0x1d8] sm:$0xff] }
 0x27f   : > { %2710 = vmatprep.subr.bf16.mxu1 %v5105_v30  ;;  %v1900_v30 = vld [vmem:[#allocation7 + $0x98] sm:$0xff] }
 0x280   : > { %1599 = vmatpush1.bf16.msra.mxu0 %v5786_v34  ;;  %v1916_v34 = vld [vmem:[#allocation7 + $0x118] sm:$0xff] }
 0x281   : > { %1600 = vmatprep.subr.bf16.mxu0 %v5791_v42  ;;  %v5076_v42 = vcombine.low %v1900_v30, %v1908_v33  ;;  %v1948_v5 = vld [vmem:[#allocation7 + $0x218] sm:$0xff] }
 0x282   : > { %2711 = vmatpush1.bf16.msra.mxu1 %v5104_v22  ;;  %v5077_v22 = vcombine.high %v1900_v30, %v1908_v33  ;;  %v5806_v4 = vld [vmem:[%s7639_s4 + $0xd4] ss:$8 sps:$4 sm:$0xff]   ;;  %v5809_v30 = vld [vmem:[%s7639_s4 + $0xe4] ss:$8 sps:$4 sm:$0xff]  }
 0x283   : > { %2712 = vmatprep.subr.bf16.mxu1 %v5121_v60  ;;  %v5797_v60 = vld [vmem:[%s7639_s4 + $0xa4] ss:$8 sps:$4 sm:$0xff]  }
 0x284   : > { %1601 = vmatpush1.bf16.msra.mxu0 %v5789_v47  ;;  %v1932_v47 = vld [vmem:[#allocation7 + $0x198] sm:$0xff] }
 0x285   : > { %1602 = vmatprep.subr.bf16.mxu0 %v5794_v26  ;;  %v5108_v59 = vcombine.low %v1932_v47, %v1940_v50  ;;  %v5804_v26 = vld [vmem:[%s7639_s4 + $0xd0] ss:$8 sps:$4 sm:$0xff]  }
 0x286   : > { %2713 = vmatpush1.bf16.msra.mxu1 %v5120_v45  ;;  %v5093_v45 = vcombine.high %v1916_v34, %v1924_v29 }
 0x287   : > { %2714 = vmatprep.subr.bf16.mxu1 %v5137_v61  ;;  %v5800_v61 = vld [vmem:[%s7639_s4 + $0xb4] ss:$8 sps:$4 sm:$0xff]  }
 0x288   : > { %1603 = vmatpush1.bf16.msra.mxu0 %v5792_v40 }
 0x289   : > { %1604 = vmatprep.subr.bf16.mxu0 %v5797_v60  ;;  %v5812_v60 = vld [vmem:[%s7639_s4 + $0xf4] ss:$8 sps:$4 sm:$0xff]  }
 0x28a   : > { %2715 = vmatpush1.bf16.msra.mxu1 %v5136_v53  ;;  %v5092_v53 = vcombine.low %v1916_v34, %v1924_v29 }
 0x28b   : > { %2716 = vmatprep.subr.bf16.mxu1 %v5153_v49  ;;  %v5109_v49 = vcombine.high %v1932_v47, %v1940_v50  ;;  %v6844_v47 = vld [vmem:[#allocation7 + $0x10] sm:$0xff] }
 0x28c   : > { %1605 = vmatpush1.bf16.msra.mxu0 %v5795_v39  ;;  %v1996_v39 = vld [vmem:[#allocation7 + $0x398] sm:$0xff]  ;;  %v6846_v50 = vld [vmem:[#allocation7 + $0x50] sm:$0xff] }
 0x28d   : > { %1606 = vmatprep.subr.bf16.mxu0 %v5800_v61 }
 0x28e   : > { %2717 = vmatpush1.bf16.msra.mxu1 %v5152_v62  ;;  %v1956_v62 = vld [vmem:[#allocation7 + $0x258] sm:$0xff] }
 0x28f   : > { %2718 = vmatprep.subr.bf16.mxu1 %v5169_v63  ;;  %v5801_v63 = vld [vmem:[%s7639_s4 + $0xc0] ss:$8 sps:$4 sm:$0xff]   ;;  %v5124_v33 = vcombine.low %v1948_v5, %v1956_v62 }
 0x290   : > { %1607 = vmatpush1.bf16.msra.mxu0 %v5798_v52 }
 0x291   : > { %1229 = vperm.xlu0 %5709, %v1211_v10   ;;  %1608 = vmatprep.subr.bf16.mxu0 %v5803_v57  ;;  %v1964_v10 = vld [vmem:[#allocation7 + $0x298] sm:$0xff]  ;;  %v1886_v57 = vld [vmem:[#allocation7 + $0x28] sm:$0xff] }
 0x292   : > { %2719 = vmatpush1.bf16.msra.mxu1 %v5168_v19  ;;  %v5125_v19 = vcombine.high %v1948_v5, %v1956_v62  ;;  %v1894_v5 = vld [vmem:[#allocation7 + $0x68] sm:$0xff] }
 0x293   : > { %2810 = vmatprep.subr.bf16.mxu1 %v5061_v17  ;;  %v1972_v17 = vld [vmem:[#allocation7 + $0x2d8] sm:$0xff] }
 0x294   : > { %1609 = vmatpush1.bf16.msra.mxu0 %v5801_v63  ;;  %v5141_v40 = vcombine.high %v1964_v10, %v1972_v17  ;;  %v5140_v34 = vcombine.low %v1964_v10, %v1972_v17  ;;  %v5065_v63 = vcombine.high %v1886_v57, %v1894_v5  ;;  %v1918_v17 = vld [vmem:[#allocation7 + $0x128] sm:$0xff] }
 0x295   : > { %2737 = vmatmul.mubr.bf16.vlgmr.msra.gmra.mrb[24].mxu1 %v6736_v20  ;;  %4772 = vperm.xlu0 %5709, %v4758_v58   ;;  %v1988_v58 = vld [vmem:[#allocation7 + $0x358] sm:$0xff] }
 0x296   : > { %2811 = vmatpush1.bf16.msra.mxu1 %v5060_v46  ;;  %2746 = vmatprep.mubr.bf16.mxu1 %v6212_v0  ;;  %v1980_v46 = vld [vmem:[#allocation7 + $0x318] sm:$0xff] }
 0x297   : > { %2812 = vmatprep.subr.bf16.mxu1 %v5077_v22  ;;  %1610 = vmatprep.subr.bf16.mxu0 %v5806_v4  ;;  %v5807_v22 = vld [vmem:[%s7639_s4 + $0xe0] ss:$8 sps:$4 sm:$0xff]   ;;  %v5157_v29 = vcombine.high %v1980_v46, %v1988_v58  ;;  %v5156_v61 = vcombine.low %v1980_v46, %v1988_v58 }
 0x298   : > { %1611 = vmatpush1.bf16.msra.mxu0 %v5804_v26  ;;  %v1902_v4 = vld [vmem:[#allocation7 + $0xa8] sm:$0xff] }
 0x299   : > { %1612 = vmatprep.subr.bf16.mxu0 %v5809_v30  ;;  %v1926_v26 = vld [vmem:[#allocation7 + $0x168] sm:$0xff] }
 0x29a   : > { %2813 = vmatpush1.bf16.msra.mxu1 %v5076_v42  ;;  %v2004_v42 = vld [vmem:[#allocation7 + $0x3d8] sm:$0xff]  ;;  %v1942_v46 = vld [vmem:[#allocation7 + $0x1e8] sm:$0xff]  ;;  %v5096_v58 = vcombine.low %v1918_v17, %v1926_v26 }
 0x29b   : > { %2814 = vmatprep.subr.bf16.mxu1 %v5093_v45  ;;  %v5810_v45 = vld [vmem:[%s7639_s4 + $0xf0] ss:$8 sps:$4 sm:$0xff]   ;;  %v5173_v52 = vcombine.high %v1996_v39, %v2004_v42  ;;  %v5172_v62 = vcombine.low %v1996_v39, %v2004_v42  ;;  %v1966_v42 = vld [vmem:[#allocation7 + $0x2a8] sm:$0xff] }
 0x29c   : > { %1613 = vmatpush1.bf16.msra.mxu0 %v5807_v22 }
 0x29d   : > { %2747 = vmatmul.mubr.bf16.gmra.mrb[28].mxu1 %v6725_v25  ;;  %1614 = vmatprep.subr.bf16.mxu0 %v5812_v60  ;;  %v1950_v60 = vld [vmem:[#allocation7 + $0x228] sm:$0xff] }
 0x29e   : > { %2815 = vmatpush1.bf16.msra.mxu1 %v5092_v53  ;;  %2842 = vmatprep.mubr.bf16.mxu1 %v6212_v0  ;;  %v5058_v53 = vcombine.low %v6844_v47, %v6846_v50 }
 0x29f   : > { %2816 = vmatprep.subr.bf16.mxu1 %v5109_v49  ;;  %v5059_v49 = vcombine.high %v6844_v47, %v6846_v50  ;;  %v1971_v47 = vld [vmem:[#allocation7 + $0x2d0] sm:$0xff] }
 0x2a0   : > { %1615 = vmatpush1.bf16.msra.mxu0 %v5810_v45  ;;  %v1974_v45 = vld [vmem:[#allocation7 + $0x2e8] sm:$0xff] }
 0x2a1   : > { %2757 = vmatprep.subr.bf16.mxu0 %v5059_v49  ;;  %v1982_v49 = vld [vmem:[#allocation7 + $0x328] sm:$0xff] }
 0x2a2   : > { %2817 = vmatpush1.bf16.msra.mxu1 %v5108_v59  ;;  %v1910_v59 = vld [vmem:[#allocation7 + $0xe8] sm:$0xff] }
 0x2a3   : > { %2818 = vmatprep.subr.bf16.mxu1 %v5125_v19  ;;  %v5064_v19 = vcombine.low %v1886_v57, %v1894_v5  ;;  %v5081_v10 = vcombine.high %v1902_v4, %v1910_v59  ;;  %v5080_v30 = vcombine.low %v1902_v4, %v1910_v59  ;;  %v1990_v57 = vld [vmem:[#allocation7 + $0x368] sm:$0xff]  ;;  %v5144_v5 = vcombine.low %v1966_v42, %v1974_v45 }
 0x2a4   : > { %v2006_v4 = vld [vmem:[#allocation7 + $0x3e8] sm:$0xff]  ;;  %v5160_v59 = vcombine.low %v1982_v49, %v1990_v57 }
 0x2a6   : > { %2819 = vmatpush1.bf16.msra.mxu1 %v5124_v33  ;;  %v5097_v33 = vcombine.high %v1918_v17, %v1926_v26  ;;  %v1896_v17 = vld [vmem:[#allocation7 + $0x78] sm:$0xff] }
 0x2a7   : > { %2820 = vmatprep.subr.bf16.mxu1 %v5141_v40  ;;  %v1934_v40 = vld [vmem:[#allocation7 + $0x1a8] sm:$0xff] }
 0x2a8   : > { %v5113_v22 = vcombine.high %v1934_v40, %v1942_v46 }
 0x2aa   : > { %2821 = vmatpush1.bf16.msra.mxu1 %v5140_v34  ;;  %v1958_v34 = vld [vmem:[#allocation7 + $0x268] sm:$0xff] }
 0x2ab   : > { %2822 = vmatprep.subr.bf16.mxu1 %v5157_v29  ;;  %v5112_v29 = vcombine.low %v1934_v40, %v1942_v46  ;;  %v5129_v39 = vcombine.high %v1950_v60, %v1958_v34  ;;  %v1912_v40 = vld [vmem:[#allocation7 + $0xf8] sm:$0xff] }
 0x2ae   : > { %2823 = vmatpush1.bf16.msra.mxu1 %v5156_v61  ;;  %v5128_v61 = vcombine.low %v1950_v60, %v1958_v34  ;;  %v1928_v60 = vld [vmem:[#allocation7 + $0x178] sm:$0xff] }
 0x2af   : > { %2824 = vmatprep.subr.bf16.mxu1 %v5173_v52  ;;  %v5145_v52 = vcombine.high %v1966_v42, %v1974_v45  ;;  %v1944_v42 = vld [vmem:[#allocation7 + $0x1f8] sm:$0xff] }
 0x2b2   : > { %2825 = vmatpush1.bf16.msra.mxu1 %v5172_v62  ;;  %v5161_v62 = vcombine.high %v1982_v49, %v1990_v57  ;;  %v1960_v49 = vld [vmem:[#allocation7 + $0x278] sm:$0xff] }
 0x2b3   : > { %2916 = vmatprep.subr.bf16.mxu1 %v5065_v63  ;;  %v1998_v63 = vld [vmem:[#allocation7 + $0x3a8] sm:$0xff] }
 0x2b4   : > { %v5176_v26 = vcombine.low %v1998_v63, %v2006_v4 }
 0x2b5   : > { %2843 = vmatmul.mubr.bf16.vlgmr.msra.gmra.mrb[32].mxu1 %v6736_v20 }
 0x2b6   : > { %2917 = vmatpush1.bf16.msra.mxu1 %v5064_v19  ;;  %2852 = vmatprep.mubr.bf16.mxu1 %v6212_v0  ;;  %v5177_v19 = vcombine.high %v1998_v63, %v2006_v4  ;;  %v1976_v63 = vld [vmem:[#allocation7 + $0x2f8] sm:$0xff] }
 0x2b7   : > { %2918 = vmatprep.subr.bf16.mxu1 %v5081_v10  ;;  %v1888_v10 = vld [vmem:[#allocation7 + $0x38] sm:$0xff] }
 0x2b8   : > { %v5068_v46 = vcombine.low %v1888_v10, %v1896_v17 }
 0x2ba   : > { %2919 = vmatpush1.bf16.msra.mxu1 %v5080_v30  ;;  %v5069_v30 = vcombine.high %v1888_v10, %v1896_v17  ;;  %v1992_v10 = vld [vmem:[#allocation7 + $0x378] sm:$0xff] }
 0x2bb   : > { %2920 = vmatprep.subr.bf16.mxu1 %v5097_v33  ;;  %v1904_v33 = vld [vmem:[#allocation7 + $0xb8] sm:$0xff] }
 0x2bc   : > { %v5084_v34 = vcombine.low %v1904_v33, %v1912_v40 }
 0x2bd   : > { %2853 = vmatmul.mubr.bf16.gmra.mrb[36].mxu1 %v6725_v25 }
 0x2be   : > { %2921 = vmatpush1.bf16.msra.mxu1 %v5096_v58  ;;  %2948 = vmatprep.mubr.bf16.mxu1 %v6212_v0  ;;  %v5085_v58 = vcombine.high %v1904_v33, %v1912_v40  ;;  %v2008_v33 = vld [vmem:[#allocation7 + $0x3f8] sm:$0xff] }
 0x2bf   : > { %2922 = vmatprep.subr.bf16.mxu1 %v5113_v22  ;;  %v1920_v22 = vld [vmem:[#allocation7 + $0x138] sm:$0xff] }
 0x2c0   : > { %v5100_v45 = vcombine.low %v1920_v22, %v1928_v60 }
 0x2c2   : > { %2923 = vmatpush1.bf16.msra.mxu1 %v5112_v29  ;;  %v5101_v29 = vcombine.high %v1920_v22, %v1928_v60 }
 0x2c3   : > { %2924 = vmatprep.subr.bf16.mxu1 %v5129_v39  ;;  %v1936_v39 = vld [vmem:[#allocation7 + $0x1b8] sm:$0xff] }
 0x2c4   : > { %v5116_v57 = vcombine.low %v1936_v39, %v1944_v42 }
 0x2c6   : > { %2925 = vmatpush1.bf16.msra.mxu1 %v5128_v61  ;;  %v5117_v61 = vcombine.high %v1936_v39, %v1944_v42 }
 0x2c7   : > { %2926 = vmatprep.subr.bf16.mxu1 %v5145_v52  ;;  %v1952_v52 = vld [vmem:[#allocation7 + $0x238] sm:$0xff] }
 0x2c8   : > { %v5132_v4 = vcombine.low %v1952_v52, %v1960_v49 }
 0x2ca   : > { %2927 = vmatpush1.bf16.msra.mxu1 %v5144_v5  ;;  %v5133_v5 = vcombine.high %v1952_v52, %v1960_v49 }
 0x2cb   : > { %2928 = vmatprep.subr.bf16.mxu1 %v5161_v62  ;;  %v1968_v62 = vld [vmem:[#allocation7 + $0x2b8] sm:$0xff] }
 0x2cc   : > { %v5148_v17 = vcombine.low %v1968_v62, %v1976_v63 }
 0x2ce   : > { %2929 = vmatpush1.bf16.msra.mxu1 %v5160_v59  ;;  %v5149_v59 = vcombine.high %v1968_v62, %v1976_v63 }
 0x2cf   : > { %2930 = vmatprep.subr.bf16.mxu1 %v5177_v19  ;;  %v1984_v19 = vld [vmem:[#allocation7 + $0x338] sm:$0xff] }
 0x2d0   : > { %v5164_v40 = vcombine.low %v1984_v19, %v1992_v10 }
 0x2d2   : > { %2931 = vmatpush1.bf16.msra.mxu1 %v5176_v26  ;;  %v5165_v26 = vcombine.high %v1984_v19, %v1992_v10 }
 0x2d3   : > { %3022 = vmatprep.subr.bf16.mxu1 %v5069_v30  ;;  %v2000_v30 = vld [vmem:[#allocation7 + $0x3b8] sm:$0xff] }
 0x2d5   : > { %2949 = vmatmul.mubr.bf16.vlgmr.msra.gmra.mrb[40].mxu1 %v6736_v20 }
 0x2d6   : > { %3023 = vmatpush1.bf16.msra.mxu1 %v5068_v46  ;;  %2958 = vmatprep.mubr.bf16.mxu1 %v6212_v0  ;;  %v5181_v46 = vcombine.high %v2000_v30, %v2008_v33 }
 0x2d7   : > { %3024 = vmatprep.subr.bf16.mxu1 %v5085_v58  ;;  %v5180_v58 = vcombine.low %v2000_v30, %v2008_v33 }
 0x2da   : > { %3025 = vmatpush1.bf16.msra.mxu1 %v5084_v34 }
 0x2db   : > { %3026 = vmatprep.subr.bf16.mxu1 %v5101_v29 }
 0x2dd   : > { %2959 = vmatmul.mubr.bf16.gmra.mrb[44].mxu1 %v6725_v25 }
 0x2de   : > { %3027 = vmatpush1.bf16.msra.mxu1 %v5100_v45  ;;  %3054 = vmatprep.mubr.bf16.mxu1 %v6212_v0 }
 0x2df   : > { %3028 = vmatprep.subr.bf16.mxu1 %v5117_v61 }
 0x2e2   : > { %3029 = vmatpush1.bf16.msra.mxu1 %v5116_v57 }
 0x2e3   : > { %3030 = vmatprep.subr.bf16.mxu1 %v5133_v5 }
 0x2e6   : > { %3031 = vmatpush1.bf16.msra.mxu1 %v5132_v4 }
 0x2e7   : > { %3032 = vmatprep.subr.bf16.mxu1 %v5149_v59 }
 0x2ea   : > { %3033 = vmatpush1.bf16.msra.mxu1 %v5148_v17 }
 0x2eb   : > { %3034 = vmatprep.subr.bf16.mxu1 %v5165_v26 }
 0x2ee   : > { %3035 = vmatpush1.bf16.msra.mxu1 %v5164_v40 }
 0x2ef   : > { %3036 = vmatprep.subr.bf16.mxu1 %v5181_v46 }
 0x2f2   : > { %3037 = vmatpush1.bf16.msra.mxu1 %v5180_v58 }
 0x2f5   : > { %3055 = vmatmul.mubr.bf16.vlgmr.msra.gmra.mrb[48].mxu1 %v6736_v20 }
 0x2f6   : > { %3064 = vmatprep.mubr.bf16.mxu1 %v6212_v0 }
 0x2fd   : > { %3065 = vmatmul.mubr.bf16.gmra.mrb[52].mxu1 %v6725_v25 }
 0x308   : > { %v1319_v22 = vpop.xlane.xlu0 %1318 }
 0x309   : > { %v1321_v60 = vrot.slane %v1319_v22, 1  ;;  %v1322_v34 = vrot.slane %v1319_v22, 2  ;;  %v1323_v29 = vrot.slane %v1319_v22, 3  ;;  %v1328_v39 = vsub.f32 %v6727_v24, %v1319_v22 }
 0x30a   : > { %v1329_v42 = vsub.f32 %v6734_v54, %v1319_v22 }
 0x30b   : > { %v1330_v45 = vsub.f32 %v6719_v3, %v1321_v60  ;;  %v1331_v61 = vsub.f32 %v6721_v14, %v1321_v60  ;;  %v1332_v52 = vsub.f32 %v6723_v27, %v1322_v34  ;;  %v1333_v49 = vsub.f32 %v6729_v36, %v1322_v34 }
 0x30c   : > { %v1334_v57 = vsub.f32 %v6753_v51, %v1323_v29  ;;  %v1336_v5 = vmul.f32 1.442695, %v1328_v39  ;;  %v1338_v62 = vmul.f32 1.442695, %v1329_v42  ;;  %v1335_v63 = vsub.f32 %v6761_v55, %v1323_v29 }
 0x30d   : > { %v1340_v4 = vmul.f32 1.442695, %v1330_v45  ;;  %v1342_v59 = vmul.f32 1.442695, %v1331_v61  ;;  %v1344_v24 = vmul.f32 1.442695, %v1332_v52 }
 0x30e   : > { %5946 = vpow2.f32 %v1336_v5  ;;  %v1346_v54 = vmul.f32 1.442695, %v1333_v49  ;;  %v1348_v3 = vmul.f32 1.442695, %v1334_v57  ;;  %v1350_v14 = vmul.f32 1.442695, %v1335_v63 }
 0x30f   : > { %5948 = vpow2.f32 %v1338_v62 }
 0x310   : > { %5950 = vpow2.f32 %v1340_v4 }
 0x311   : > { %5952 = vpow2.f32 %v1342_v59 }
 0x312   : > { %5954 = vpow2.f32 %v1344_v24 }
 0x313   : > { %5956 = vpow2.f32 %v1346_v54 }
 0x314   : > { %5958 = vpow2.f32 %v1348_v3 }
 0x315   : > { %5960 = vpow2.f32 %v1350_v14 }
 0x318   : > { %v6871_v27 = vpop.eup %5946 }
 0x319   : > { %v6873_v36 = vpop.eup %5948  ;;  %v1384_v19 = vpack.c.bf16 %v6871_v27, %v6871_v27 }
 0x31a   : > { %v6875_v51 = vpop.eup %5950  ;;  %v1385_v26 = vpack.c.bf16 %v6873_v36, %v6873_v36 }
 0x31b   : > { %v6877_v55 = vpop.eup %5952  ;;  %v1386_v10 = vpack.c.bf16 %v6875_v51, %v6875_v51  ;;  %v1400_v29 = vunpack.c.l.b16 %v1384_v19 }
 0x31c   : > { %v6883_v17 = vpop.eup %5954  ;;  %v1387_v30 = vpack.c.bf16 %v6877_v55, %v6877_v55  ;;  %v1401_v52 = vunpack.c.l.b16 %v1385_v26  ;;  %v1907_v26 = vld [vmem:[#allocation7 + $0xd0] sm:$0xff] }
 0x31d   : > { %v6889_v33 = vpop.eup %5956  ;;  %v1388_v40 = vpack.c.bf16 %v6883_v17, %v6883_v17  ;;  %v1402_v46 = vunpack.c.l.b16 %v1386_v10 }
 0x31e   : > { %v6893_v58 = vpop.eup %5958  ;;  %v1389_v22 = vpack.c.bf16 %v6889_v33, %v6889_v33  ;;  %v1403_v60 = vunpack.c.l.b16 %v1387_v30  ;;  %v1899_v30 = vld [vmem:[#allocation7 + $0x90] sm:$0xff] }
 0x31f   : > { %v6897_v34 = vpop.eup %5960  ;;  %v1390_v39 = vpack.c.bf16 %v6893_v58, %v6893_v58  ;;  %v1404_v42 = vunpack.c.l.b16 %v1388_v40  ;;  %v1408_v45 = vrot.slane %v1402_v46, 7 }
 0x320   : > { %v1391_v61 = vpack.c.bf16 %v6897_v34, %v6897_v34  ;;  %v1405_v49 = vunpack.c.l.b16 %v1389_v22  ;;  %v1414_v57 = vrot.slane %v1403_v60, 7  ;;  %v5075_v60 = vcombine.high %v1899_v30, %v1907_v26 }
 0x321   : > { %v1406_v5 = vunpack.c.l.b16 %v1390_v39  ;;  %v1409_v62 = vsel %vm1304_vm2, %v1408_v45, %v1400_v29  ;;  %v1410_v63 = vrot.slane %v1404_v42, 6  ;;  %v1915_v29 = vld [vmem:[#allocation7 + $0x110] sm:$0xff]  ;;  %v5074_v42 = vcombine.low %v1899_v30, %v1907_v26 }
 0x322   : > { %v1407_v4 = vunpack.c.l.b16 %v1391_v61  ;;  %v1415_v59 = vsel %vm1304_vm2, %v1414_v57, %v1401_v52  ;;  %v1416_v24 = vrot.slane %v1405_v49, 6  ;;  %v1923_v39 = vld [vmem:[#allocation7 + $0x150] sm:$0xff] }
 0x323   : > { %v1411_v54 = vsel %vm1306_vm3, %v1410_v63, %v1409_v62  ;;  %v1412_v3 = vrot.slane %v1406_v5, 5  ;;  %v5091_v45 = vcombine.high %v1915_v29, %v1923_v39  ;;  %v1931_v61 = vld [vmem:[#allocation7 + $0x190] sm:$0xff]  ;;  %v5090_v49 = vcombine.low %v1915_v29, %v1923_v39  ;;  %v1901_v29 = vld [vmem:[#allocation7 + $0xa0] sm:$0xff] }
 0x324   : > { %v1417_v14 = vsel %vm1306_vm3, %v1416_v24, %v1415_v59  ;;  %v1418_v19 = vrot.slane %v1407_v4, 5  ;;  %v1939_v52 = vld [vmem:[#allocation7 + $0x1d0] sm:$0xff]  ;;  %v1909_v39 = vld [vmem:[#allocation7 + $0xe0] sm:$0xff] }
 0x325   : > { %v1413_v10 = vsel %vm1308_vm4, %v1412_v3, %v1411_v54  ;;  %v5107_v57 = vcombine.high %v1931_v61, %v1939_v52  ;;  %v1947_v5 = vld [vmem:[#allocation7 + $0x210] sm:$0xff]  ;;  %v5106_v63 = vcombine.low %v1931_v61, %v1939_v52  ;;  %v5079_v52 = vcombine.high %v1901_v29, %v1909_v39 }
 0x326   : > { %v1419_v40 = vsel %vm1308_vm4, %v1418_v19, %v1417_v14  ;;  %v1420_v46 = vpack.c.b16 %v1413_v10, %v1413_v10  ;;  %v1955_v62 = vld [vmem:[#allocation7 + $0x250] sm:$0xff] }
 0x327   : > { %v1421_v22 = vpack.c.b16 %v1419_v40, %v1419_v40  ;;  %v5123_v4 = vcombine.high %v1947_v5, %v1955_v62  ;;  %v1963_v59 = vld [vmem:[#allocation7 + $0x290] sm:$0xff]  ;;  %v5122_v50 = vcombine.low %v1947_v5, %v1955_v62  ;;  %v1885_v40 = vld [vmem:[#allocation7 + $0x20] sm:$0xff] }
 0x328   : > { %v1979_v24 = vld [vmem:[#allocation7 + $0x310] sm:$0xff]  ;;  %v5138_v3 = vcombine.low %v1963_v59, %v1971_v47  ;;  %v1917_v5 = vld [vmem:[#allocation7 + $0x120] sm:$0xff] }
 0x329   : > { %1616 = vmatprep.mubr.bf16.mxu0 %v1421_v22  ;;  %v1987_v54 = vld [vmem:[#allocation7 + $0x350] sm:$0xff]  ;;  %v1925_v62 = vld [vmem:[#allocation7 + $0x160] sm:$0xff] }
 0x32a   : > { %1617 = vmatmul.mubr.bf16.vlgmr.msra.gmra.mrb[12].mxu0 %v1420_v46  ;;  %v5155_v14 = vcombine.high %v1979_v24, %v1987_v54  ;;  %v1995_v19 = vld [vmem:[#allocation7 + $0x390] sm:$0xff]  ;;  %v5154_v30 = vcombine.low %v1979_v24, %v1987_v54  ;;  %v1893_v46 = vld [vmem:[#allocation7 + $0x60] sm:$0xff] }
 0x32b   : > { %2758 = vmatpush1.bf16.msra.mxu0 %v5058_v53  ;;  %2789 = vmatprep.mubr.bf16.mxu0 %v6212_v0  ;;  %v5139_v53 = vcombine.high %v1963_v59, %v1971_v47  ;;  %v2003_v10 = vld [vmem:[#allocation7 + $0x3d0] sm:$0xff]  ;;  %v1933_v59 = vld [vmem:[#allocation7 + $0x1a0] sm:$0xff] }
 0x32c   : > { %2759 = vmatprep.subr.bf16.mxu0 %v5075_v60  ;;  %v5171_v26 = vcombine.high %v1995_v19, %v2003_v10  ;;  %v5170_v22 = vcombine.low %v1995_v19, %v2003_v10  ;;  %v5063_v60 = vcombine.high %v1885_v40, %v1893_v46  ;;  %v1941_v47 = vld [vmem:[#allocation7 + $0x1e0] sm:$0xff] }
 0x32d   : > { %v5111_v54 = vcombine.high %v1933_v59, %v1941_v47  ;;  %v1949_v19 = vld [vmem:[#allocation7 + $0x220] sm:$0xff] }
 0x32e   : > { %v1957_v10 = vld [vmem:[#allocation7 + $0x260] sm:$0xff] }
 0x32f   : > { %2760 = vmatpush1.bf16.msra.mxu0 %v5074_v42 }
 0x330   : > { %2761 = vmatprep.subr.bf16.mxu0 %v5091_v45  ;;  %v5062_v45 = vcombine.low %v1885_v40, %v1893_v46  ;;  %v5110_v40 = vcombine.low %v1933_v59, %v1941_v47  ;;  %v5127_v46 = vcombine.high %v1949_v19, %v1957_v10 }
 0x333   : > { %2762 = vmatpush1.bf16.msra.mxu0 %v5090_v49 }
 0x334   : > { %2763 = vmatprep.subr.bf16.mxu0 %v5107_v57 }
 0x337   : > { %2764 = vmatpush1.bf16.msra.mxu0 %v5106_v63  ;;  %v5078_v63 = vcombine.low %v1901_v29, %v1909_v39  ;;  %v5126_v29 = vcombine.low %v1949_v19, %v1957_v10  ;;  %v1903_v10 = vld [vmem:[#allocation7 + $0xb0] sm:$0xff] }
 0x338   : > { %2765 = vmatprep.subr.bf16.mxu0 %v5123_v4  ;;  %v5095_v4 = vcombine.high %v1917_v5, %v1925_v62 }
 0x33b   : > { %2766 = vmatpush1.bf16.msra.mxu0 %v5122_v50 }
 0x33c   : > { %2767 = vmatprep.subr.bf16.mxu0 %v5139_v53  ;;  %v5094_v53 = vcombine.low %v1917_v5, %v1925_v62 }
 0x33f   : > { %2768 = vmatpush1.bf16.msra.mxu0 %v5138_v3 }
 0x340   : > { %2769 = vmatprep.subr.bf16.mxu0 %v5155_v14 }
 0x343   : > { %2770 = vmatpush1.bf16.msra.mxu0 %v5154_v30  ;;  %v5814_v30 = vld [vmem:[#allocation8 + $0xc0] sm:$0xff]  }
 0x344   : > { %2771 = vmatprep.subr.bf16.mxu0 %v5171_v26  ;;  %v5816_v26 = vld [vmem:[#allocation8 + $0x80] sm:$0xff]   ;;  %5367 = vmatprep.subr.bf16.mxu1 %v5814_v30 }
 0x345   : > { %5368 = vmatpush3.bf16.msra.mxu1 %v5816_v26  ;;  %v1911_v26 = vld [vmem:[#allocation7 + $0xf0] sm:$0xff] }
 0x347   : > { %2772 = vmatpush1.bf16.msra.mxu0 %v5170_v22  ;;  %v1965_v22 = vld [vmem:[#allocation7 + $0x2a0] sm:$0xff] }
 0x348   : > { %v6913_v42 = vpop.f32.mrb[16].mxu1  ;;  %2863 = vmatprep.subr.bf16.mxu0 %v5063_v60  ;;  %v1973_v60 = vld [vmem:[#allocation7 + $0x2e0] sm:$0xff] }
 0x349   : > { %v6915_v61 = vpop.f32.mrb[17].mxu1  ;;  %v5143_v39 = vcombine.high %v1965_v22, %v1973_v60  ;;  %v5142_v5 = vcombine.low %v1965_v22, %v1973_v60  ;;  %v5083_v60 = vcombine.high %v1903_v10, %v1911_v26 }
 0x34a   : > { %v6917_v49 = vpop.f32.mrb[18].mxu1  ;;  %2790 = vmatmul.mubr.bf16.vlgmr.msra.gmra.mrb[16].mxu0 %v6736_v20 }
 0x34b   : > { %v6919_v57 = vpop.f32.mrb[19].mxu1  ;;  %2864 = vmatpush1.bf16.msra.mxu0 %v5062_v45  ;;  %2799 = vmatprep.mubr.bf16.mxu0 %v6212_v0  ;;  %v1981_v45 = vld [vmem:[#allocation7 + $0x320] sm:$0xff] }
 0x34c   : > { %2865 = vmatprep.subr.bf16.mxu0 %v5079_v52  ;;  %v1989_v52 = vld [vmem:[#allocation7 + $0x360] sm:$0xff] }
 0x34d   : > { %v5159_v62 = vcombine.high %v1981_v45, %v1989_v52  ;;  %v5158_v59 = vcombine.low %v1981_v45, %v1989_v52  ;;  %v1919_v45 = vld [vmem:[#allocation7 + $0x130] sm:$0xff] }
 0x34e   : > { %v1927_v52 = vld [vmem:[#allocation7 + $0x170] sm:$0xff] }
 0x34f   : > { %2866 = vmatpush1.bf16.msra.mxu0 %v5078_v63  ;;  %v1997_v63 = vld [vmem:[#allocation7 + $0x3a0] sm:$0xff] }
 0x350   : > { %v6923_v50 = vpop.f32.mrb[20].mxu1  ;;  %2867 = vmatprep.subr.bf16.mxu0 %v5095_v4  ;;  %v2005_v4 = vld [vmem:[#allocation7 + $0x3e0] sm:$0xff] }
 0x351   : > { %v6925_v24 = vpop.f32.mrb[21].mxu1  ;;  %v5175_v47 = vcombine.high %v1997_v63, %v2005_v4  ;;  %v5174_v30 = vcombine.low %v1997_v63, %v2005_v4  ;;  %v1935_v63 = vld [vmem:[#allocation7 + $0x1b0] sm:$0xff] }
 0x352   : > { %v6927_v3 = vpop.f32.mrb[22].mxu1  ;;  %2800 = vmatmul.mubr.bf16.gmra.mrb[20].mxu0 %v6725_v25  ;;  %v1943_v4 = vld [vmem:[#allocation7 + $0x1f0] sm:$0xff] }
 0x353   : > { %7640 = vst [vmem:[#allocation27_spill] sm:$0xff] %v6927_v3  ;;  %v6929_v14 = vpop.f32.mrb[23].mxu1  ;;  %2868 = vmatpush1.bf16.msra.mxu0 %v5094_v53  ;;  %2895 = vmatprep.mubr.bf16.mxu0 %v6212_v0  ;;  %v1887_v53 = vld [vmem:[#allocation7 + $0x30] sm:$0xff] }
 0x354   : > { %2869 = vmatprep.subr.bf16.mxu0 %v5111_v54  ;;  %v1895_v54 = vld [vmem:[#allocation7 + $0x70] sm:$0xff] }
 0x355   : > { %v5067_v19 = vcombine.high %v1887_v53, %v1895_v54 }
 0x357   : > { %2870 = vmatpush1.bf16.msra.mxu0 %v5110_v40 }
 0x358   : > { %2871 = vmatprep.subr.bf16.mxu0 %v5127_v46  ;;  %v5066_v46 = vcombine.low %v1887_v53, %v1895_v54  ;;  %v5115_v54 = vcombine.high %v1935_v63, %v1943_v4 }
 0x35b   : > { %2872 = vmatpush1.bf16.msra.mxu0 %v5126_v29 }
 0x35c   : > { %2873 = vmatprep.subr.bf16.mxu0 %v5143_v39 }
 0x35f   : > { %2874 = vmatpush1.bf16.msra.mxu0 %v5142_v5  ;;  %v5082_v5 = vcombine.low %v1903_v10, %v1911_v26  ;;  %v1959_v10 = vld [vmem:[#allocation7 + $0x270] sm:$0xff]  ;;  %v5114_v26 = vcombine.low %v1935_v63, %v1943_v4  ;;  %v5162_v63 = vcombine.low %v1983_v23, %v1991_v56  ;;  %v5820_v4 = vld [vmem:[#allocation8 + $0x88] sm:$0xff]   ;;  %v5828_v56 = vld [vmem:[#allocation8 + $0x98] sm:$0xff]  }
 0x360   : > { %2875 = vmatprep.subr.bf16.mxu0 %v5159_v62  ;;  %v5099_v62 = vcombine.high %v1919_v45, %v1927_v52  ;;  %v5817_v23 = vld [vmem:[#allocation8 + $0x48] sm:$0xff]  }
 0x363   : > { %2876 = vmatpush1.bf16.msra.mxu0 %v5158_v59 }
 0x364   : > { %2877 = vmatprep.subr.bf16.mxu0 %v5175_v47  ;;  %v5098_v47 = vcombine.low %v1919_v45, %v1927_v52  ;;  %v1975_v45 = vld [vmem:[#allocation7 + $0x2f0] sm:$0xff] }
 0x367   : > { %2878 = vmatpush1.bf16.msra.mxu0 %v5174_v30 }
 0x368   : > { %v6933_v40 = vpop.f32.mrb[24].mxu1  ;;  %2969 = vmatprep.subr.bf16.mxu0 %v5067_v19 }
 0x369   : > { %v6935_v22 = vpop.f32.mrb[25].mxu1 }
 0x36a   : > { %v6937_v29 = vpop.f32.mrb[26].mxu1  ;;  %2896 = vmatmul.mubr.bf16.vlgmr.msra.gmra.mrb[24].mxu0 %v6736_v20 }
 0x36b   : > { %v6939_v39 = vpop.f32.mrb[27].mxu1  ;;  %2970 = vmatpush1.bf16.msra.mxu0 %v5066_v46  ;;  %2905 = vmatprep.mubr.bf16.mxu0 %v6212_v0  ;;  %v1951_v46 = vld [vmem:[#allocation7 + $0x230] sm:$0xff] }
 0x36c   : > { %2971 = vmatprep.subr.bf16.mxu0 %v5083_v60  ;;  %v5131_v60 = vcombine.high %v1951_v46, %v1959_v10  ;;  %v5130_v52 = vcombine.low %v1951_v46, %v1959_v10  ;;  %v5178_v46 = vcombine.low %v1999_v21, %v2007_v18  ;;  %v5824_v10 = vld [vmem:[#allocation8 + $0x90] sm:$0xff]  }
 0x36f   : > { %2972 = vmatpush1.bf16.msra.mxu0 %v5082_v5  ;;  %v1967_v5 = vld [vmem:[#allocation7 + $0x2b0] sm:$0xff] }
 0x370   : > { %v6943_v59 = vpop.f32.mrb[28].mxu1  ;;  %2973 = vmatprep.subr.bf16.mxu0 %v5099_v62  ;;  %v5147_v62 = vcombine.high %v1967_v5, %v1975_v45  ;;  %v5146_v41 = vcombine.low %v1967_v5, %v1975_v45  ;;  %v5826_v45 = vld [vmem:[#allocation8 + $0xd8] sm:$0xff]  }
 0x371   : > { %7641 = vst [vmem:[#allocation28_spill] sm:$0xff] %v6943_v59  ;;  %v6945_v53 = vpop.f32.mrb[29].mxu1 }
 0x372   : > { %v6947_v30 = vpop.f32.mrb[30].mxu1  ;;  %2906 = vmatmul.mubr.bf16.gmra.mrb[28].mxu0 %v6725_v25 }
 0x373   : > { %7642 = vst [vmem:[#allocation29_spill] sm:$0xff] %v6947_v30  ;;  %v6949_v19 = vpop.f32.mrb[31].mxu1  ;;  %2974 = vmatpush1.bf16.msra.mxu0 %v5098_v47  ;;  %3001 = vmatprep.mubr.bf16.mxu0 %v6212_v0  ;;  %v5818_v47 = vld [vmem:[#allocation8 + $0xc8] sm:$0xff]  }
 0x374   : > { %2975 = vmatprep.subr.bf16.mxu0 %v5115_v54  ;;  %v5179_v54 = vcombine.high %v1999_v21, %v2007_v18  ;;  %5369 = vmatprep.subr.bf16.mxu1 %v5818_v47  ;;  %v5830_v18 = vld [vmem:[#allocation8 + $0xe0] sm:$0xff]   ;;  %v5819_v21 = vld [vmem:[#allocation8 + $0x8] sm:$0xff]  }
 0x375   : > { %5370 = vmatpush3.bf16.msra.mxu1 %v5820_v4  ;;  %v5832_v47 = vld [vmem:[#allocation8 + $0xa0] sm:$0xff]   ;;  %v5834_v4 = vld [vmem:[#allocation8 + $0xe8] sm:$0xff]  }
 0x377   : > { %2976 = vmatpush1.bf16.msra.mxu0 %v5114_v26  ;;  %v5822_v26 = vld [vmem:[#allocation8 + $0xd0] sm:$0xff]  }
 0x378   : > { %2977 = vmatprep.subr.bf16.mxu0 %v5131_v60  ;;  %v5813_v60 = vld [vmem:[#allocation8 + $0x40] sm:$0xff]   ;;  %5371 = vmatprep.subr.bf16.mxu1 %v5822_v26  ;;  %v5836_v26 = vld [vmem:[#allocation8 + $0xa8] sm:$0xff]  }
 0x379   : > { %5372 = vmatpush3.bf16.msra.mxu1 %v5824_v10  ;;  %v5823_v10 = vld [vmem:[#allocation8 + $0x10] sm:$0xff]  }
 0x37a   : > { %5373 = vmatprep.subr.bf16.mxu1 %v5826_v45 }
 0x37b   : > { %2978 = vmatpush1.bf16.msra.mxu0 %v5130_v52 }
 0x37c   : > { %2979 = vmatprep.subr.bf16.mxu0 %v5147_v62 }
 0x37d   : > { %5374 = vmatpush3.bf16.msra.mxu1 %v5828_v56  ;;  %v5842_v56 = vld [vmem:[#allocation8 + $0xf8] sm:$0xff]  }
 0x37e   : > { %5375 = vmatprep.subr.bf16.mxu1 %v5830_v18  ;;  %v5829_v18 = vld [vmem:[#allocation8 + $0x60] sm:$0xff]  }
 0x37f   : > { %2980 = vmatpush1.bf16.msra.mxu0 %v5146_v41  ;;  %v5815_v41 = vld [vmem:[#allocation8] sm:$0xff]  }
 0x380   : > { %2981 = vmatprep.subr.bf16.mxu0 %v5163_v35 }
 0x381   : > { %5376 = vmatpush3.bf16.msra.mxu1 %v5832_v47  ;;  %v5831_v47 = vld [vmem:[#allocation8 + $0x20] sm:$0xff]  }
 0x382   : > { %5377 = vmatprep.subr.bf16.mxu1 %v5834_v4  ;;  %v5847_v4 = vld [vmem:[#allocation8 + $0x1c0] sm:$0xff]  }
 0x383   : > { %2982 = vmatpush1.bf16.msra.mxu0 %v5162_v63  ;;  %v5821_v63 = vld [vmem:[#allocation8 + $0x50] sm:$0xff]  }
 0x384   : > { %2983 = vmatprep.subr.bf16.mxu0 %v5179_v54 }
 0x385   : > { %5378 = vmatpush3.bf16.msra.mxu1 %v5836_v26  ;;  %v5835_v26 = vld [vmem:[#allocation8 + $0x28] sm:$0xff]  }
 0x387   : > { %2984 = vmatpush1.bf16.msra.mxu0 %v5178_v46 }
 0x388   : > { %v6953_v5 = vpop.f32.mrb[32].mxu1  ;;  %5339 = vmatprep.subr.bf16.mxu0 %v5813_v60 }
 0x389   : > { %v6955_v52 = vpop.f32.mrb[33].mxu1 }
 0x38a   : > { %v6957_v35 = vpop.f32.mrb[34].mxu1  ;;  %3002 = vmatmul.mubr.bf16.vlgmr.msra.gmra.mrb[32].mxu0 %v6736_v20  ;;  %v5838_v20 = vld [vmem:[#allocation8 + $0xf0] sm:$0xff]  }
 0x38b   : > { %v6959_v62 = vpop.f32.mrb[35].mxu1  ;;  %3011 = vmatprep.mubr.bf16.mxu0 %v6212_v0  ;;  %5340 = vmatpush3.bf16.msra.mxu0 %v5815_v41  ;;  %v5825_v0 = vld [vmem:[#allocation8 + $0x58] sm:$0xff]   ;;  %v5840_v41 = vld [vmem:[#allocation8 + $0xb0] sm:$0xff]  }
 0x38c   : > { %5341 = vmatprep.subr.bf16.mxu0 %v5817_v23  ;;  %5379 = vmatprep.subr.bf16.mxu1 %v5838_v20  ;;  %v5827_v23 = vld [vmem:[#allocation8 + $0x18] sm:$0xff]  }
 0x38d   : > { %5380 = vmatpush3.bf16.msra.mxu1 %v5840_v41  ;;  %v5843_v20 = vld [vmem:[#allocation8 + $0x38] sm:$0xff]  }
 0x38e   : > { %5381 = vmatprep.subr.bf16.mxu1 %v5842_v56 }
 0x38f   : > { %5342 = vmatpush3.bf16.msra.mxu0 %v5819_v21  ;;  %v5844_v21 = vld [vmem:[#allocation8 + $0xb8] sm:$0xff]  }
 0x390   : > { %v6963_v54 = vpop.f32.mrb[36].mxu1  ;;  %5343 = vmatprep.subr.bf16.mxu0 %v5821_v63  ;;  %v5833_v63 = vld [vmem:[#allocation8 + $0x68] sm:$0xff]  }
 0x391   : > { %7643 = vst [vmem:[#allocation30_spill] sm:$0xff] %v6963_v54  ;;  %v6965_v46 = vpop.f32.mrb[37].mxu1  ;;  %5382 = vmatpush3.bf16.msra.mxu1 %v5844_v21 }
 0x392   : > { %v6967_v60 = vpop.f32.mrb[38].mxu1  ;;  %3012 = vmatmul.mubr.bf16.gmra.mrb[36].mxu0 %v6725_v25  ;;  %5423 = vmatprep.subr.bf16.mxu1 %v5847_v4  ;;  %v5839_v25 = vld [vmem:[#allocation8 + $0x30] sm:$0xff]  }
 0x393   : > { %7644 = vst [vmem:[#allocation31_spill] sm:$0xff] %v6967_v60  ;;  %v6969_v45 = vpop.f32.mrb[39].mxu1  ;;  %5344 = vmatpush3.bf16.msra.mxu0 %v5823_v10  ;;  %v5841_v10 = vld [vmem:[#allocation8 + $0x78] sm:$0xff]  }
 0x394   : > { %5345 = vmatprep.subr.bf16.mxu0 %v5825_v0  ;;  %v5846_v0 = vld [vmem:[#allocation8 + $0x140] sm:$0xff]  }
 0x397   : > { %5346 = vmatpush3.bf16.msra.mxu0 %v5827_v23 }
 0x398   : > { %5347 = vmatprep.subr.bf16.mxu0 %v5829_v18 }
 0x39b   : > { %5348 = vmatpush3.bf16.msra.mxu0 %v5831_v47 }
 0x39c   : > { %5349 = vmatprep.subr.bf16.mxu0 %v5833_v63 }
 0x39f   : > { %5350 = vmatpush3.bf16.msra.mxu0 %v5835_v26 }
 0x3a0   : > { %5351 = vmatprep.subr.bf16.mxu0 %v5837_v13 }
 0x3a3   : > { %5352 = vmatpush3.bf16.msra.mxu0 %v5839_v25 }
 0x3a4   : > { %5353 = vmatprep.subr.bf16.mxu0 %v5841_v10 }
 0x3a7   : > { %5354 = vmatpush3.bf16.msra.mxu0 %v5843_v20 }
 0x3a8   : > { %v6972_v41 = vpop.f32.mrb[40].mxu1  ;;  %5395 = vmatprep.subr.bf16.mxu0 %v5846_v0 }
 0x3a9   : > { %7645 = vst [vmem:[#allocation32_spill] sm:$0xff] %v6972_v41  ;;  %v6974_v56 = vpop.f32.mrb[41].mxu1 }
 0x3aa   : > { %7646 = vst [vmem:[#allocation33_spill] sm:$0xff] %v6974_v56  ;;  %v6976_v23 = vpop.f32.mrb[42].mxu1 }
 0x3ab   : > { %7647 = vst [vmem:[#allocation34_spill] sm:$0xff] %v6976_v23  ;;  %v6978_v18 = vpop.f32.mrb[43].mxu1 }
 0x3ac   : > { %7648 = vst [vmem:[#allocation35_spill] sm:$0xff] %v6978_v18 }
 0x3b0   : > { %v6980_v21 = vpop.f32.mrb[44].mxu1 }
 0x3b1   : > { %7649 = vst [vmem:[#allocation36_spill] sm:$0xff] %v6980_v21  ;;  %v6982_v47 = vpop.f32.mrb[45].mxu1  ;;  %v7004_v21 = vpop.permute.xlu1 %1654 }
 0x3b2   : > { %7650 = vst [vmem:[#allocation37_spill] sm:$0xff] %v6982_v47  ;;  %v6984_v13 = vpop.f32.mrb[46].mxu1 }
 0x3b3   : > { %7651 = vst [vmem:[#allocation38_spill] sm:$0xff] %v6984_v13  ;;  %v6986_v63 = vpop.f32.mrb[47].mxu1  ;;  %v7661_v13 = vsub.f32 %v6627_v6, %v6629_v7  ;;  %v7666_v6 = vsub.f32 %v6665_v32, %v6674_v37  ;;  %v7667_v7 = vsub.f32 %v6676_v38, %v6685_v43  ;;  %v7033_v32 = vld [vmem:[%s7669_s21] sm:$0xff] }
 0x3b4   : > { %7652 = vst [vmem:[#allocation39_spill] sm:$0xff] %v6986_v63 }
 0x3b5   : > { %5962 = vtanh.f32 %v7661_v13 }
 0x3c8   : > { %v6988_v4 = vpop.f32.mrb[48].mxu1 }
 0x3c9   : > { %7653 = vst [vmem:[#allocation40_spill] sm:$0xff] %v6988_v4  ;;  %v6990_v26 = vpop.f32.mrb[49].mxu1  ;;  %v7662_v4 = vsub.f32 %v6631_v8, %v6637_v11  ;;  %v7668_v8 = vsub.f32 %v6687_v44, %v6689_v48  ;;  %v1230_v48 = vpop.permute.xlu0 %1229 }
 0x3ca   : > { %7654 = vst [vmem:[#allocation41_spill] sm:$0xff] %v6990_v26  ;;  %v6992_v25 = vpop.f32.mrb[50].mxu1 }
 0x3cb   : > { %7655 = vst [vmem:[#allocation42_spill] sm:$0xff] %v6992_v25  ;;  %v6994_v10 = vpop.f32.mrb[51].mxu1  ;;  %5964 = vtanh.f32 %v7662_v4  ;;  %v7663_v25 = vsub.f32 %v6639_v12, %v6645_v15  ;;  %v5963_v12 = vpop.eup %5962  ;;  %v7037_v4 = vcombine.high %v7033_v32, %v7033_v32 }
 0x3cc   : > { %7656 = vst [vmem:[#allocation43_spill] sm:$0xff] %v6994_v10 }
 0x3cd   : > { %5966 = vtanh.f32 %v7663_v25  ;;  %v1656_v25 = vrot.slane %v7004_v21, 1 }
 0x3d0   : > { %v6996_v20 = vpop.f32.mrb[52].mxu1 }
 0x3d1   : > { %7657 = vst [vmem:[#allocation44_spill] sm:$0xff] %v6996_v20  ;;  %v6998_v0 = vpop.f32.mrb[53].mxu1  ;;  %v7664_v20 = vsub.f32 %v6647_v16, %v6653_v1 }
 0x3d2   : > { %7658 = vst [vmem:[#allocation45_spill] sm:$0xff] %v6998_v0  ;;  %v7000_v9 = vpop.f32.mrb[54].mxu1 }
 0x3d3   : > { %7659 = vst [vmem:[#allocation46_spill] sm:$0xff] %v7000_v9  ;;  %v7002_v2 = vpop.f32.mrb[55].mxu1  ;;  %5968 = vtanh.f32 %v7664_v20  ;;  %v7665_v9 = vsub.f32 %v6661_v28, %v6663_v31  ;;  %v1657_v20 = vrot.slane %v7004_v21, 2 }
 0x3d4   : > { %7660 = vst [vmem:[#allocation47_spill] sm:$0xff] %v7002_v2  ;;  %v1215_v2 = vpop.permute.xlu1 %1214 }
 0x3d5   : > { %5970 = vtanh.f32 %v7665_v9  ;;  %v5965_v16 = vpop.eup %5964  ;;  %v1671_v9 = vlaneseq }
 0x3d6   : > { %5972 = vtanh.f32 %v7666_v6 }
 0x3d7   : > { %5974 = vtanh.f32 %v7667_v7  ;;  %v5967_v31 = vpop.eup %5966  ;;  %v1672_v13 = vshrl.u32 %v1671_v9, 7  ;;  %v1658_v7 = vrot.slane %v7004_v21, 3 }
 0x3d8   : > { %5976 = vtanh.f32 %v7668_v8  ;;  %v1220_v1 = vpop.permute.xlu1 %1219 }
 0x3d9   : > { %v7058_v47 = vsub.s32 0, %v1672_v13 }
 0x3dc   : > { %v1225_v8 = vpop.permute.xlu1 %1224 }
 0x3dd   : > { %v5969_v38 = vpop.eup %5968 }
 0x3de   : > { %v7048_v9 = vmul.f32 %v5969_v38, %v1220_v1  ;;  %v1724_v38 = vrot.slane %v7033_v32, 2 }
 0x3df   : > { %v5971_v43 = vpop.eup %5970 }
 0x3e0   : > { %v5973_v44 = vpop.eup %5972  ;;  %v7050_v0 = vmul.f32 %v5971_v43, %v1225_v8 }
 0x3e1   : > { %v5975_v6 = vpop.eup %5974  ;;  %v7052_v10 = vmul.f32 %v5973_v44, %v1225_v8 }
 0x3e2   : > { %v7054_v26 = vmul.f32 %v5975_v6, %v1230_v48 }
 0x3fd   : > { %v1618_v11 = vpop.f32.mrb[12].mxu0 }
 0x3fe   : > { %5978 = vrcp.f32 %v1618_v11  ;;  %v1620_v15 = vpop.f32.mrb[13].mxu0  ;;  %v7042_v11 = vmul.f32 %v5963_v12, %v1215_v2  ;;  %v1723_v12 = vrot.slane %v7037_v4, 1 }
 0x3ff   : > { %5980 = vrcp.f32 %v1620_v15  ;;  %v1622_v28 = vpop.f32.mrb[14].mxu0  ;;  %v7044_v15 = vmul.f32 %v5965_v16, %v1215_v2  ;;  %v1722_v2 = vrot.slane %v7033_v32, 1 }
 0x400   : > { %v1623_v37 = vpop.f32.mrb[15].mxu0  ;;  %v7046_v28 = vmul.f32 %v5967_v31, %v1220_v1  ;;  %v1725_v31 = vrot.slane %v7037_v4, 2  ;;  %v1727_v1 = vrot.slane %v7037_v4, 3 }
 0x401   : > { %v5977_v37 = vpop.eup %5976 }
 0x402   : > { %v7056_v63 = vmul.f32 %v5977_v37, %v1230_v48 }
 0x408   : > { %v5979_v16 = vpop.eup %5978 }
 0x409   : > { %v5981_v44 = vpop.eup %5980  ;;  %v1629_v6 = vrot.slane %v5979_v16, 1  ;;  %v1631_v8 = vrot.slane %v5979_v16, 2  ;;  %v1633_v48 = vrot.slane %v5979_v16, 3  ;;  %v1643_v13 = vmul.f32 %v5979_v16, %v6871_v27 }
 0x40a   : > { %v1630_v37 = vrot.slane %v5981_v44, 1  ;;  %v1632_v23 = vrot.slane %v5981_v44, 2  ;;  %v1634_v41 = vrot.slane %v5981_v44, 3  ;;  %v1644_v18 = vmul.f32 %v5981_v44, %v6873_v36 }
 0x40b   : > { %v1645_v56 = vmul.f32 %v6875_v51, %v1629_v6  ;;  %v7070_v60 = vmul.f32 %v7004_v21, %v1643_v13  ;;  %v1647_v54 = vmul.f32 %v6883_v17, %v1631_v8  ;;  %v1649_v43 = vmul.f32 %v6893_v58, %v1633_v48 }
 0x40c   : > { %v1646_v30 = vmul.f32 %v6877_v55, %v1630_v37  ;;  %v7076_v3 = vmul.f32 %v7004_v21, %v1644_v18  ;;  %v1648_v27 = vmul.f32 %v6889_v33, %v1632_v23  ;;  %v1650_v16 = vmul.f32 %v6897_v34, %v1634_v41 }
 0x40d   : > { %v7080_v59 = vmul.f32 %v1656_v25, %v1645_v56  ;;  %v1674_v36 = vrot.slane %v7070_v60, %v7058_v47  ;;  %v1736_v51 = vadd.f32 %v7033_v32, %v7070_v60  ;;  %v7086_v17 = vmul.f32 %v1657_v20, %v1647_v54 }
 0x40e   : > { %v7088_v58 = vmul.f32 %v1656_v25, %v1646_v30  ;;  %v1737_v33 = vadd.f32 %v7037_v4, %v7076_v3  ;;  %v7094_v23 = vmul.f32 %v1657_v20, %v1648_v27  ;;  %v7098_v56 = vmul.f32 %v1658_v7, %v1650_v16  ;;  %v7690_v4 = vld [vmem:[#allocation45_spill] sm:$0xff] }
 0x40f   : > { %v1738_v34 = vadd.f32 %v1722_v2, %v7080_v59  ;;  %v1747_v41 = vrot.slane %v1736_v51, %v7058_v47  ;;  %v7100_v18 = vmul.f32 %v1658_v7, %v1649_v43 }
 0x410   : > { %v1739_v54 = vadd.f32 %v1723_v12, %v7088_v58  ;;  %v1751_v21 = vrot.slane %v1737_v33, %v7058_v47  ;;  %v1741_v7 = vadd.f32 %v1725_v31, %v7094_v23  ;;  %v1743_v12 = vadd.f32 %v1727_v1, %v7098_v56  ;;  %v5865_v33 = vld [vmem:[#allocation8 + $0x1a0] sm:$0xff]  }
 0x411   : > { %v1755_v25 = vrot.slane %v1738_v34, %v7058_v47  ;;  %v7110_v20 = vadd.f32 %v1747_v41, %v7042_v11  ;;  %v7695_v60 = vrot.slane %v7088_v58, %v7058_v47 }
 0x412   : > { %v1759_v43 = vrot.slane %v1739_v54, %v7058_v47  ;;  %v7117_v44 = vadd.f32 %v1751_v21, %v7044_v15  ;;  %v1767_v31 = vrot.slane %v1741_v7, %v7058_v47  ;;  %v1775_v16 = vrot.slane %v1743_v12, %v7058_v47 }
 0x413   : > { %v7123_v8 = vadd.f32 %v1755_v25, %v7046_v28  ;;  %v3075_v48 = vmul.f32 %v6913_v42, %v7110_v20  ;;  %v3077_v13 = vmul.f32 %v6933_v40, %v7110_v20 }
 0x414   : > { %v7131_v37 = vadd.f32 %v1759_v43, %v7048_v9  ;;  %v3076_v1 = vmul.f32 %v6915_v61, %v7117_v44  ;;  %v3078_v27 = vmul.f32 %v6935_v22, %v7117_v44  ;;  %v7143_v40 = vadd.f32 %v1767_v31, %v7052_v10  ;;  %v5848_v43 = vld [vmem:[#allocation8 + $0x100] sm:$0xff]  }
 0x415   : > { %v3091_v51 = vmul.f32 %v6917_v49, %v7123_v8  ;;  %v3093_v42 = vmul.f32 %v6937_v29, %v7123_v8  ;;  %v7152_v34 = vadd.f32 %v1775_v16, %v7056_v63  ;;  %v1740_v49 = vadd.f32 %v1724_v38, %v7086_v17  ;;  %v5852_v16 = vld [vmem:[#allocation8 + $0x108] sm:$0xff]  }
 0x416   : > { %v3092_v61 = vmul.f32 %v6919_v57, %v7131_v37  ;;  %v3094_v22 = vmul.f32 %v6939_v39, %v7131_v37  ;;  %v3108_v29 = vmul.f32 %v6925_v24, %v7143_v40  ;;  %v3110_v21 = vmul.f32 %v6945_v53, %v7143_v40  ;;  %v5849_v57 = vld [vmem:[#allocation8 + $0x180] sm:$0xff]  }
 0x417   : > { %v3395_v41 = vpack.c.bf16 %v3091_v51, %v3075_v48  ;;  %v3397_v54 = vpack.c.bf16 %v3093_v42, %v3077_v13  ;;  %v3124_v39 = vmul.f32 %v6929_v14, %v7152_v34  ;;  %v3126_v12 = vmul.f32 %v6949_v19, %v7152_v34  ;;  %v5851_v19 = vld [vmem:[#allocation8 + $0x1c8] sm:$0xff]  }
 0x418   : > { %v3396_v25 = vpack.c.bf16 %v3092_v61, %v3076_v1  ;;  %v3398_v7 = vpack.c.bf16 %v3094_v22, %v3078_v27  ;;  %v7670_v38 = vrot.slane %v7033_v32, 3  ;;  %v1763_v13 = vrot.slane %v1740_v49, %v7058_v47  ;;  %v5850_v1 = vld [vmem:[#allocation8 + $0x148] sm:$0xff]   ;;  %v5854_v49 = vld [vmem:[#allocation8 + $0x150] sm:$0xff]  }
 0x419   : > { %v7169_v24 = vmul.f32 %v6955_v52, %v7117_v44  ;;  %v7173_v53 = vmul.f32 %v6959_v62, %v7131_v37  ;;  %v3412_v14 = vpack.c.bf16 %v3124_v39, %v3108_v29  ;;  %v3414_v31 = vpack.c.bf16 %v3126_v12, %v3110_v21  ;;  %v5853_v51 = vld [vmem:[#allocation8 + $0x188] sm:$0xff]   ;;  %v7671_v29 = vld [vmem:[#allocation28_spill] sm:$0xff]  ;;  %v7673_v12 = vld [vmem:[#allocation29_spill] sm:$0xff] }
 0x41a   : > { %v1742_v48 = vadd.f32 %v7670_v38, %v7100_v18  ;;  %4227 = vmatprep.mubr.bf16.mxu0 %v3396_v25  ;;  %4276 = vmatprep.mubr.bf16.mxu1 %v3398_v7  ;;  %v7177_v32 = vmul.f32 %v6953_v5, %v7110_v20  ;;  %v7181_v52 = vadd.f32 %v1763_v13, %v7050_v0 }
 0x41b   : > { %4228 = vmatmul.mubr.bf16.vlgmr.msra.gmra.mrb[40].mxu0 %v3395_v41  ;;  %4277 = vmatmul.mubr.bf16.vlgmr.msra.gmra.mrb[56].mxu1 %v3397_v54  ;;  %v3402_v62 = vpack.c.bf16 %v7173_v53, %v7169_v24  ;;  %v7187_v42 = vmul.f32 %v6957_v35, %v7123_v8  ;;  %v7191_v5 = vmul.f32 %v6965_v46, %v7143_v40  ;;  %v5855_v41 = vld [vmem:[#allocation8 + $0x1d0] sm:$0xff]  }
 0x41c   : > { %v1771_v27 = vrot.slane %v1742_v48, %v7058_v47  ;;  %5396 = vmatpush3.bf16.msra.mxu0 %v5848_v43  ;;  %5424 = vmatpush3.bf16.msra.mxu1 %v5849_v57  ;;  %v7195_v61 = vmul.f32 %v6969_v45, %v7152_v34  ;;  %v3107_v35 = vmul.f32 %v6923_v50, %v7181_v52  ;;  %v7672_v50 = vld [vmem:[#allocation27_spill] sm:$0xff]  ;;  %v7674_v48 = vld [vmem:[#allocation30_spill] sm:$0xff] }
 0x41d   : > { %v2791_v22 = vpop.f32.mrb[16].mxu0  ;;  %4235 = vmatprep.mubr.bf16.mxu0 %v3412_v14  ;;  %4284 = vmatprep.mubr.bf16.mxu1 %v3414_v31  ;;  %v3109_v21 = vmul.f32 %v7671_v29, %v7181_v52  ;;  %v7218_v13 = vmul.f32 %v7674_v48, %v7181_v52  ;;  %v5856_v14 = vld [vmem:[#allocation8 + $0x110] sm:$0xff]   ;;  %v7678_v48 = vld [vmem:[#allocation35_spill] sm:$0xff] }
 0x41e   : > { %v7198_v54 = vadd.f32 %v1771_v27, %v7054_v26  ;;  %v7205_v46 = vmul.f32 %v2791_v22, %v7110_v20  ;;  %v2793_v25 = vpop.f32.mrb[17].mxu0  ;;  %5397 = vmatprep.subr.bf16.mxu0 %v5850_v1  ;;  %5425 = vmatprep.subr.bf16.mxu1 %v5851_v19  ;;  %v5857_v31 = vld [vmem:[#allocation8 + $0x190] sm:$0xff]   ;;  %v7675_v1 = vld [vmem:[#allocation31_spill] sm:$0xff]  ;;  %v7676_v27 = vld [vmem:[#allocation33_spill] sm:$0xff] }
 0x41f   : > { %v3080_v43 = vmul.f32 %v2793_v25, %v7117_v44  ;;  %v2795_v57 = vpop.f32.mrb[18].mxu0  ;;  %v7229_v22 = vmul.f32 %v7676_v27, %v7117_v44  ;;  %v7679_v27 = vld [vmem:[#allocation32_spill] sm:$0xff] }
 0x420   : > { %v3123_v39 = vmul.f32 %v7672_v50, %v7198_v54  ;;  %v3125_v38 = vmul.f32 %v7673_v12, %v7198_v54  ;;  %v7221_v24 = vmul.f32 %v2795_v57, %v7123_v8  ;;  %v2797_v53 = vpop.f32.mrb[19].mxu0  ;;  %5398 = vmatpush3.bf16.msra.mxu0 %v5852_v16  ;;  %5426 = vmatpush3.bf16.msra.mxu1 %v5853_v51  ;;  %v5858_v51 = vld [vmem:[#allocation8 + $0x158] sm:$0xff]  }
 0x421   : > { %v7225_v19 = vmul.f32 %v7675_v1, %v7198_v54  ;;  %v3096_v29 = vmul.f32 %v2797_v53, %v7131_v37  ;;  %5399 = vmatprep.subr.bf16.mxu0 %v5854_v49  ;;  %5427 = vmatprep.subr.bf16.mxu1 %v5855_v41  ;;  %v5859_v50 = vld [vmem:[#allocation8 + $0x1d8] sm:$0xff]   ;;  %v7238_v1 = vmul.f32 %v7678_v48, %v7131_v37  ;;  %v7680_v41 = vld [vmem:[#allocation34_spill] sm:$0xff] }
 0x422   : > { %v3411_v25 = vpack.c.bf16 %v3123_v39, %v3107_v35  ;;  %v3413_v57 = vpack.c.bf16 %v3125_v38, %v3109_v21  ;;  %v7242_v53 = vmul.f32 %v7679_v27, %v7110_v20  ;;  %v7246_v35 = vmul.f32 %v7680_v41, %v7123_v8  ;;  %v7681_v21 = vld [vmem:[#allocation37_spill] sm:$0xff]  ;;  %v7682_v27 = vld [vmem:[#allocation39_spill] sm:$0xff] }
 0x423   : > { %v3400_v49 = vpack.c.bf16 %v3096_v29, %v3080_v43  ;;  %v7250_v39 = vmul.f32 %v7681_v21, %v7143_v40  ;;  %v5860_v38 = vld [vmem:[#allocation8 + $0x118] sm:$0xff]   ;;  %v7256_v43 = vmul.f32 %v7682_v27, %v7152_v34  ;;  %v7683_v29 = vld [vmem:[#allocation36_spill] sm:$0xff]  ;;  %v7684_v21 = vld [vmem:[#allocation38_spill] sm:$0xff] }
 0x424   : > { %4236 = vmatmul.mubr.bf16.gmra.mrb[44].mxu0 %v3411_v25  ;;  %4285 = vmatmul.mubr.bf16.gmra.mrb[60].mxu1 %v3413_v57  ;;  %v5861_v48 = vld [vmem:[#allocation8 + $0x198] sm:$0xff]   ;;  %v7260_v25 = vmul.f32 %v7683_v29, %v7181_v52  ;;  %v7269_v12 = vmul.f32 %v7684_v21, %v7198_v54 }
 0x425   : > { %5400 = vmatpush3.bf16.msra.mxu0 %v5856_v14  ;;  %5428 = vmatpush3.bf16.msra.mxu1 %v5857_v31  ;;  %v2801_v57 = vpop.f32.mrb[20].mxu0  ;;  %v5862_v14 = vld [vmem:[#allocation8 + $0x160] sm:$0xff]   ;;  %v7685_v27 = vld [vmem:[#allocation41_spill] sm:$0xff] }
 0x426   : > { %4325 = vmatprep.mubr.bf16.mxu0 %v3400_v49  ;;  %4374 = vmatprep.mubr.bf16.mxu1 %v3402_v62  ;;  %v5863_v31 = vld [vmem:[#allocation8 + $0x1e0] sm:$0xff]   ;;  %v7273_v7 = vmul.f32 %v7685_v27, %v7117_v44  ;;  %v7276_v29 = vmul.f32 %v2801_v57, %v7181_v52  ;;  %v2803_v45 = vpop.f32.mrb[21].mxu0  ;;  %v7686_v49 = vld [vmem:[#allocation43_spill] sm:$0xff]  ;;  %v7687_v57 = vld [vmem:[#allocation40_spill] sm:$0xff]  ;;  %v1703_v27 = vadd.f32 %v1674_v36, %v7042_v11 }
 0x427   : > { %5401 = vmatprep.subr.bf16.mxu0 %v5858_v51  ;;  %5429 = vmatprep.subr.bf16.mxu1 %v5859_v50  ;;  %v7282_v41 = vmul.f32 %v7686_v49, %v7131_v37  ;;  %v7285_v21 = vmul.f32 %v2803_v45, %v7143_v40  ;;  %v2805_v16 = vpop.f32.mrb[22].mxu0  ;;  %v7291_v2 = vmul.f32 %v7687_v57, %v7110_v20  ;;  %v7689_v51 = vld [vmem:[#allocation42_spill] sm:$0xff]  ;;  %v5870_v36 = vld [vmem:[#allocation8 + $0x170] sm:$0xff]  }
 0x428   : > { %v7295_v50 = vmul.f32 %v7689_v51, %v7123_v8  ;;  %v7299_v62 = vmul.f32 %v2805_v16, %v7198_v54  ;;  %v2807_v49 = vpop.f32.mrb[23].mxu0  ;;  %v5864_v45 = vld [vmem:[#allocation8 + $0x120] sm:$0xff]   ;;  %v7305_v57 = vmul.f32 %v7690_v4, %v7143_v40  ;;  %v5866_v51 = vld [vmem:[#allocation8 + $0x168] sm:$0xff]   ;;  %v7692_v4 = vld [vmem:[#allocation44_spill] sm:$0xff]  ;;  %v1706_v11 = vadd.f32 %v7695_v60, %v7048_v9  ;;  %1711 = vst [vmem:[%s7361_s24] sm:$0xff] %v1703_v27 }
 0x429   : > { %7688 = vst [vmem:[#allocation28_spill] sm:$0xff] %v7291_v2  ;;  %5402 = vmatpush3.bf16.msra.mxu0 %v5860_v38  ;;  %5430 = vmatpush3.bf16.msra.mxu1 %v5861_v48  ;;  %v7308_v6 = vmul.f32 %v2807_v49, %v7152_v34  ;;  %v5867_v16 = vld [vmem:[#allocation8 + $0x1e8] sm:$0xff]   ;;  %v7320_v55 = vmul.f32 %v7692_v4, %v7181_v52  ;;  %v7693_v49 = vld [vmem:[#allocation46_spill] sm:$0xff]  ;;  %v5873_v9 = vld [vmem:[#allocation8 + $0x1b0] sm:$0xff]  }
 0x42a   : > { %5403 = vmatprep.subr.bf16.mxu0 %v5862_v14  ;;  %5431 = vmatprep.subr.bf16.mxu1 %v5863_v31  ;;  %v7691_v48 = vld [vmem:[#allocation47_spill] sm:$0xff]  ;;  %v7324_v14 = vmul.f32 %v7693_v49, %v7198_v54  ;;  %v1682_v31 = vrot.slane %v7080_v59, %v7058_v47  ;;  %v7694_v4 = vrot.slane %v7076_v3, %v7058_v47  ;;  %v5871_v3 = vld [vmem:[#allocation8 + $0x1f0] sm:$0xff]   ;;  %v5877_v27 = vld [vmem:[#allocation8 + $0x1b8] sm:$0xff]  }
 0x42b   : > { %v7314_v30 = vmul.f32 %v7691_v48, %v7152_v34  ;;  %v3416_v38 = vpack.c.bf16 %v7308_v6, %v7285_v21  ;;  %v5868_v59 = vld [vmem:[#allocation8 + $0x128] sm:$0xff]   ;;  %1714 = vst [vmem:[%s7361_s24 + $0x18] sm:$0xff] %v1706_v11 }
 0x42c   : > { %v1704_v49 = vadd.f32 %v7694_v4, %v7044_v15  ;;  %v5869_v2 = vld [vmem:[#allocation8 + $0x1a8] sm:$0xff]   ;;  %v3425_v6 = vpack.c.bf16 %v7324_v14, %v7320_v55  ;;  %v1705_v21 = vadd.f32 %v1682_v31, %v7046_v28  ;;  %v7696_v15 = vrot.slane %v7086_v17, %v7058_v47  ;;  %v5874_v17 = vld [vmem:[#allocation8 + $0x178] sm:$0xff]  }
 0x42d   : > { %v3426_v48 = vpack.c.bf16 %v7314_v30, %v7305_v57  ;;  %5404 = vmatpush3.bf16.msra.mxu0 %v5864_v45  ;;  %5432 = vmatpush3.bf16.msra.mxu1 %v5865_v33  ;;  %v7697_v45 = vrot.slane %v7094_v23, %v7058_v47  ;;  %v7698_v28 = vrot.slane %v7100_v18, %v7058_v47  ;;  %v5875_v23 = vld [vmem:[#allocation8 + $0x1f8] sm:$0xff]   ;;  %v5884_v60 = vld [vmem:[#allocation8 + $0x208] sm:$0xff]  }
 0x42e   : > { %5405 = vmatprep.subr.bf16.mxu0 %v5866_v51  ;;  %5433 = vmatprep.subr.bf16.mxu1 %v5867_v16  ;;  %v1707_v33 = vadd.f32 %v7696_v15, %v7050_v0  ;;  %1712 = vst [vmem:[%s7361_s24 + $0x8] sm:$0xff] %v1704_v49  ;;  %1713 = vst [vmem:[%s7361_s24 + $0x10] sm:$0xff] %v1705_v21  ;;  %v5876_v18 = vld [vmem:[#allocation8 + $0x138] sm:$0xff]   ;;  %v5882_v51 = vld [vmem:[#allocation8 + $0x248] sm:$0xff]   ;;  %v7700_v31 = vpack.c.bf16 %v7221_v24, %v7205_v46 }
 0x42f   : > { %v1708_v4 = vadd.f32 %v7697_v45, %v7052_v10  ;;  %v1709_v58 = vadd.f32 %v7698_v28, %v7054_v26  ;;  %v7699_v10 = vrot.slane %v7098_v56, %v7058_v47  ;;  %v5872_v26 = vld [vmem:[#allocation8 + $0x130] sm:$0xff]   ;;  %v5878_v47 = vld [vmem:[#allocation8 + $0x240] sm:$0xff]   ;;  %v5883_v16 = vld [vmem:[#allocation8 + $0x2c8] sm:$0xff]   ;;  %v7701_v49 = vpack.c.bf16 %v7187_v42, %v7177_v32 }
 0x430   : > { %1715 = vst [vmem:[%s7361_s24 + $0x20] sm:$0xff] %v1707_v33  ;;  %v5880_v56 = vld [vmem:[#allocation8 + $0x200] sm:$0xff]   ;;  %v5885_v11 = vld [vmem:[#allocation8 + $0x288] sm:$0xff]   ;;  %v5887_v46 = vld [vmem:[#allocation8 + $0x2d0] sm:$0xff]  }
 0x431   : > { %v1710_v0 = vadd.f32 %v7699_v10, %v7056_v63  ;;  %1716 = vst [vmem:[%s7361_s24 + $0x28] sm:$0xff] %v1708_v4  ;;  %1717 = vst [vmem:[%s7361_s24 + $0x30] sm:$0xff] %v1709_v58  ;;  %5406 = vmatpush3.bf16.msra.mxu0 %v5868_v59  ;;  %5434 = vmatpush3.bf16.msra.mxu1 %v5869_v2  ;;  %v5879_v63 = vld [vmem:[#allocation8 + $0x2c0] sm:$0xff]   ;;  %v7702_v59 = vpack.c.bf16 %v7195_v61, %v7191_v5  ;;  %v5889_v33 = vld [vmem:[#allocation8 + $0x290] sm:$0xff]  }
 0x432   : > { %5407 = vmatprep.subr.bf16.mxu0 %v5870_v36  ;;  %5435 = vmatprep.subr.bf16.mxu1 %v5871_v3  ;;  %v5881_v2 = vld [vmem:[#allocation8 + $0x280] sm:$0xff]   ;;  %v5886_v3 = vld [vmem:[#allocation8 + $0x250] sm:$0xff]   ;;  %v5890_v4 = vld [vmem:[#allocation8 + $0x258] sm:$0xff]   ;;  %v7703_v58 = vpack.c.bf16 %v7299_v62, %v7276_v29  ;;  %v7704_v10 = vpack.c.bf16 %v7225_v19, %v7218_v13 }
 0x433   : > { %1718 = vst [vmem:[%s7361_s24 + $0x38] sm:$0xff] %v1710_v0  ;;  %v5891_v0 = vld [vmem:[#allocation8 + $0x2d8] sm:$0xff]   ;;  %v5895_v29 = vld [vmem:[#allocation8 + $0x2e0] sm:$0xff]   ;;  %s6101_s24 = scalar_lea.vmem %s6100_s20, 2048 }
 0x434   : > { %p6103_p9 = scmp.lt.s32.totalorder %s6101_s24, %s6095_s22 }
 0x435   : > { %5408 = vmatpush3.bf16.msra.mxu0 %v5872_v26  ;;  %5436 = vmatpush3.bf16.msra.mxu1 %v5873_v9  ;;  %v7705_v26 = vpack.c.bf16 %v7238_v1, %v7229_v22 }
 0x436   : > { %5409 = vmatprep.subr.bf16.mxu0 %v5874_v17  ;;  %5437 = vmatprep.subr.bf16.mxu1 %v5875_v23  ;;  %v5892_v17 = vld [vmem:[#allocation8 + $0x218] sm:$0xff]   ;;  %p6104_p5 = por %p6103_p9, %p6102_p6 }
 0x437   : > { %v5893_v23 = vld [vmem:[#allocation8 + $0x298] sm:$0xff]  }
 0x438   : > { %p6105_p10 = pnand %p6104_p5, %p6098_p1 }
 0x439   : > { %5410 = vmatpush3.bf16.msra.mxu0 %v5876_v18  ;;  %5438 = vmatpush3.bf16.msra.mxu1 %v5877_v27  ;;  %v5894_v27 = vld [vmem:[#allocation8 + $0x260] sm:$0xff]  }
 0x43a   : > { %5451 = vmatprep.subr.bf16.mxu0 %v5878_v47  ;;  %5479 = vmatprep.subr.bf16.mxu1 %v5879_v63  ;;  %v5896_v63 = vld [vmem:[#allocation8 + $0x220] sm:$0xff]  }
 0x43c   : > { %4326 = vmatmul.mubr.bf16.vlgmr.msra.gmra.mrb[48].mxu0 %v7700_v31  ;;  %4375 = vmatmul.mubr.bf16.vlgmr.msra.gmra.mrb[64].mxu1 %v7701_v49  ;;  %v5900_v49 = vld [vmem:[#allocation8 + $0x228] sm:$0xff]  }
 0x43d   : > { %4333 = vmatprep.mubr.bf16.mxu0 %v3416_v38  ;;  %4382 = vmatprep.mubr.bf16.mxu1 %v7702_v59  ;;  %v2897_v21 = vpop.f32.mrb[24].mxu0  ;;  %v5888_v38 = vld [vmem:[#allocation8 + $0x210] sm:$0xff]   ;;  %v5901_v59 = vld [vmem:[#allocation8 + $0x2a8] sm:$0xff]  }
 0x43e   : > { %5452 = vmatpush3.bf16.msra.mxu0 %v5880_v56  ;;  %5480 = vmatpush3.bf16.msra.mxu1 %v5881_v2  ;;  %v2899_v36 = vpop.f32.mrb[25].mxu0  ;;  %v7385_v15 = vmul.f32 %v2897_v21, %v7110_v20  ;;  %v5897_v56 = vld [vmem:[#allocation8 + $0x2a0] sm:$0xff]   ;;  %v5902_v21 = vld [vmem:[#allocation8 + $0x270] sm:$0xff]  }
 0x43f   : > { %5453 = vmatprep.subr.bf16.mxu0 %v5882_v51  ;;  %5481 = vmatprep.subr.bf16.mxu1 %v5883_v16  ;;  %v2901_v24 = vpop.f32.mrb[26].mxu0  ;;  %v3084_v5 = vmul.f32 %v2899_v36, %v7117_v44  ;;  %v5898_v51 = vld [vmem:[#allocation8 + $0x268] sm:$0xff]   ;;  %v5905_v36 = vld [vmem:[#allocation8 + $0x2b0] sm:$0xff]  }
 0x440   : > { %v7388_v32 = vmul.f32 %v2901_v24, %v7123_v8  ;;  %v2903_v42 = vpop.f32.mrb[27].mxu0  ;;  %v5899_v16 = vld [vmem:[#allocation8 + $0x2e8] sm:$0xff]   ;;  %v5908_v24 = vld [vmem:[#allocation8 + $0x238] sm:$0xff]  }
 0x441   : > { %v3100_v61 = vmul.f32 %v2903_v42, %v7131_v37  ;;  %v5909_v42 = vld [vmem:[#allocation8 + $0x2b8] sm:$0xff]  }
 0x442   : > { %5454 = vmatpush3.bf16.msra.mxu0 %v5884_v60  ;;  %5482 = vmatpush3.bf16.msra.mxu1 %v5885_v11  ;;  %v3403_v45 = vpack.c.bf16 %v7388_v32, %v7385_v15  ;;  %v5903_v60 = vld [vmem:[#allocation8 + $0x2f0] sm:$0xff]  }
 0x443   : > { %5455 = vmatprep.subr.bf16.mxu0 %v5886_v3  ;;  %5483 = vmatprep.subr.bf16.mxu1 %v5887_v46  ;;  %v3404_v28 = vpack.c.bf16 %v3100_v61, %v3084_v5  ;;  %v5904_v11 = vld [vmem:[#allocation8 + $0x230] sm:$0xff]   ;;  %v5906_v3 = vld [vmem:[#allocation8 + $0x278] sm:$0xff]   ;;  %v5910_v5 = vld [vmem:[#allocation8 + $0x340] sm:$0xff]  }
 0x444   : > { %4334 = vmatmul.mubr.bf16.gmra.mrb[52].mxu0 %v7703_v58  ;;  %4383 = vmatmul.mubr.bf16.gmra.mrb[68].mxu1 %v7704_v10  ;;  %v5907_v46 = vld [vmem:[#allocation8 + $0x2f8] sm:$0xff]   ;;  %v5911_v61 = vld [vmem:[#allocation8 + $0x3c0] sm:$0xff]   ;;  %v7706_v58 = vpack.c.bf16 %v7246_v35, %v7242_v53  ;;  %v7707_v10 = vpack.c.bf16 %v7256_v43, %v7250_v39  ;;  %v5918_v15 = vld [vmem:[#allocation8 + $0x350] sm:$0xff]  }
 0x445   : > { %4472 = vmatprep.mubr.bf16.mxu1 %v7705_v26  ;;  %v2907_v9 = vpop.f32.mrb[28].mxu0  ;;  %4423 = vmatprep.mubr.bf16.mxu0 %v3404_v28  ;;  %v5915_v28 = vld [vmem:[#allocation8 + $0x3c8] sm:$0xff]   ;;  %v5919_v32 = vld [vmem:[#allocation8 + $0x3d0] sm:$0xff]  }
 0x446   : > { %5456 = vmatpush3.bf16.msra.mxu0 %v5888_v38  ;;  %5484 = vmatpush3.bf16.msra.mxu1 %v5889_v33  ;;  %v2909_v18 = vpop.f32.mrb[29].mxu0  ;;  %v7404_v13 = vmul.f32 %v2907_v9, %v7181_v52  ;;  %v5912_v38 = vld [vmem:[#allocation8 + $0x300] sm:$0xff]   ;;  %v5916_v9 = vld [vmem:[#allocation8 + $0x308] sm:$0xff]  }
 0x447   : > { %5457 = vmatprep.subr.bf16.mxu0 %v5890_v4  ;;  %v2911_v62 = vpop.f32.mrb[30].mxu0  ;;  %5485 = vmatprep.subr.bf16.mxu1 %v5891_v0  ;;  %v3116_v1 = vmul.f32 %v2909_v18, %v7143_v40  ;;  %v5913_v33 = vld [vmem:[#allocation8 + $0x380] sm:$0xff]   ;;  %v5914_v4 = vld [vmem:[#allocation8 + $0x348] sm:$0xff]  }
 0x448   : > { %v7407_v19 = vmul.f32 %v2911_v62, %v7198_v54  ;;  %v2913_v22 = vpop.f32.mrb[31].mxu0 }
 0x449   : > { %v3132_v47 = vmul.f32 %v2913_v22, %v7152_v34  ;;  %v5923_v22 = vld [vmem:[#allocation8 + $0x3d8] sm:$0xff]  }
 0x44a   : > { %5458 = vmatpush3.bf16.msra.mxu0 %v5892_v17  ;;  %5486 = vmatpush3.bf16.msra.mxu1 %v5893_v23  ;;  %v3419_v2 = vpack.c.bf16 %v7407_v19, %v7404_v13  ;;  %v5917_v17 = vld [vmem:[#allocation8 + $0x388] sm:$0xff]   ;;  %v5926_v13 = vld [vmem:[#allocation8 + $0x360] sm:$0xff]  }
 0x44b   : > { %5459 = vmatprep.subr.bf16.mxu0 %v5894_v27  ;;  %5487 = vmatprep.subr.bf16.mxu1 %v5895_v29  ;;  %v3420_v31 = vpack.c.bf16 %v3132_v47, %v3116_v1  ;;  %v5920_v27 = vld [vmem:[#allocation8 + $0x310] sm:$0xff]   ;;  %v5924_v47 = vld [vmem:[#allocation8 + $0x318] sm:$0xff]   ;;  %v5927_v19 = vld [vmem:[#allocation8 + $0x3e0] sm:$0xff]  }
 0x44c   : > { %v5921_v29 = vld [vmem:[#allocation8 + $0x390] sm:$0xff]  }
 0x44e   : > { %5460 = vmatpush3.bf16.msra.mxu0 %v5896_v63  ;;  %5488 = vmatpush3.bf16.msra.mxu1 %v5897_v56  ;;  %v5925_v63 = vld [vmem:[#allocation8 + $0x398] sm:$0xff]  }
 0x44f   : > { %5461 = vmatprep.subr.bf16.mxu0 %v5898_v51  ;;  %5489 = vmatprep.subr.bf16.mxu1 %v5899_v16  ;;  %v5928_v16 = vld [vmem:[#allocation8 + $0x320] sm:$0xff]  }
 0x452   : > { %5462 = vmatpush3.bf16.msra.mxu0 %v5900_v49  ;;  %5490 = vmatpush3.bf16.msra.mxu1 %v5901_v59  ;;  %v5930_v59 = vld [vmem:[#allocation8 + $0x368] sm:$0xff]  }
 0x453   : > { %5463 = vmatprep.subr.bf16.mxu0 %v5902_v21  ;;  %5491 = vmatprep.subr.bf16.mxu1 %v5903_v60  ;;  %v5931_v21 = vld [vmem:[#allocation8 + $0x3e8] sm:$0xff]  }
 0x454   : > { %v5933_v60 = vld [vmem:[#allocation8 + $0x3a8] sm:$0xff]  }
 0x456   : > { %5464 = vmatpush3.bf16.msra.mxu0 %v5904_v11  ;;  %5492 = vmatpush3.bf16.msra.mxu1 %v5905_v36  ;;  %v5937_v11 = vld [vmem:[#allocation8 + $0x3b0] sm:$0xff]   ;;  %v5938_v36 = vld [vmem:[#allocation8 + $0x378] sm:$0xff]  }
 0x457   : > { %5465 = vmatprep.subr.bf16.mxu0 %v5906_v3  ;;  %5493 = vmatprep.subr.bf16.mxu1 %v5907_v46  ;;  %v5939_v3 = vld [vmem:[#allocation8 + $0x3f8] sm:$0xff]  }
 0x458   : > { %v5940_v46 = vld [vmem:[#allocation8 + $0x338] sm:$0xff]  }
 0x45a   : > { %5466 = vmatpush3.bf16.msra.mxu0 %v5908_v24  ;;  %5494 = vmatpush3.bf16.msra.mxu1 %v5909_v42  ;;  %v5941_v24 = vld [vmem:[#allocation8 + $0x3b8] sm:$0xff]   ;;  %v7710_v42 = vld [vmem:[#allocation28_spill] sm:$0xff] }
 0x45b   : > { %5507 = vmatprep.subr.bf16.mxu0 %v5910_v5  ;;  %5535 = vmatprep.subr.bf16.mxu1 %v5911_v61  ;;  %v7711_v5 = vpack.c.bf16 %v7295_v50, %v7710_v42  ;;  %v5942_v61 = vld [vmem:[%s7712_s30] sm:$0xff]  }
 0x45d   : > { %4424 = vmatmul.mubr.bf16.vlgmr.msra.gmra.mrb[56].mxu0 %v3403_v45  ;;  %4473 = vmatmul.mubr.bf16.vlgmr.msra.gmra.mrb[72].mxu1 %v7706_v58  ;;  %v3003_v0 = vpop.f32.mrb[32].mxu0 }
 0x45e   : > { %4431 = vmatprep.mubr.bf16.mxu0 %v3420_v31  ;;  %4480 = vmatprep.mubr.bf16.mxu1 %v7707_v10  ;;  %v3005_v26 = vpop.f32.mrb[33].mxu0  ;;  %v7423_v45 = vmul.f32 %v3003_v0, %v7110_v20  ;;  %v5922_v20 = vld [vmem:[#allocation8 + $0x358] sm:$0xff]   ;;  %v5929_v31 = vld [vmem:[#allocation8 + $0x3a0] sm:$0xff]  }
 0x45f   : > { %5508 = vmatpush3.bf16.msra.mxu0 %v5912_v38  ;;  %5536 = vmatpush3.bf16.msra.mxu1 %v5913_v33  ;;  %v3007_v23 = vpop.f32.mrb[34].mxu0  ;;  %v3088_v39 = vmul.f32 %v3005_v26, %v7117_v44  ;;  %v7708_v44 = vpack.c.bf16 %v7269_v12, %v7260_v25 }
 0x460   : > { %5509 = vmatprep.subr.bf16.mxu0 %v5914_v4  ;;  %5537 = vmatprep.subr.bf16.mxu1 %v5915_v28  ;;  %v7426_v53 = vmul.f32 %v3007_v23, %v7123_v8  ;;  %v3009_v35 = vpop.f32.mrb[35].mxu0  ;;  %v7709_v8 = vpack.c.bf16 %v7282_v41, %v7273_v7 }
 0x461   : > { %v3104_v43 = vmul.f32 %v3009_v35, %v7131_v37 }
 0x462   : > { %v3407_v18 = vpack.c.bf16 %v7426_v53, %v7423_v45 }
 0x463   : > { %5510 = vmatpush3.bf16.msra.mxu0 %v5916_v9  ;;  %5538 = vmatpush3.bf16.msra.mxu1 %v5917_v17  ;;  %v3408_v62 = vpack.c.bf16 %v3104_v43, %v3088_v39 }
 0x464   : > { %5511 = vmatprep.subr.bf16.mxu0 %v5918_v15  ;;  %5539 = vmatprep.subr.bf16.mxu1 %v5919_v32 }
 0x465   : > { %4432 = vmatmul.mubr.bf16.gmra.mrb[60].mxu0 %v3419_v2  ;;  %4481 = vmatmul.mubr.bf16.gmra.mrb[76].mxu1 %v7708_v44  ;;  %v3013_v37 = vpop.f32.mrb[36].mxu0 }
 0x466   : > { %4570 = vmatprep.mubr.bf16.mxu1 %v7709_v8  ;;  %4521 = vmatprep.mubr.bf16.mxu0 %v3408_v62  ;;  %v3015_v1 = vpop.f32.mrb[37].mxu0  ;;  %v3119_v2 = vmul.f32 %v3013_v37, %v7181_v52  ;;  %v5932_v52 = vld [vmem:[#allocation8 + $0x328] sm:$0xff]  }
 0x467   : > { %5512 = vmatpush3.bf16.msra.mxu0 %v5920_v27  ;;  %5540 = vmatpush3.bf16.msra.mxu1 %v5921_v29  ;;  %v3017_v56 = vpop.f32.mrb[38].mxu0  ;;  %v3120_v7 = vmul.f32 %v3015_v1, %v7143_v40  ;;  %v5935_v40 = vld [vmem:[#allocation8 + $0x3f0] sm:$0xff]  }
 0x468   : > { %5513 = vmatprep.subr.bf16.mxu0 %v5922_v20  ;;  %5541 = vmatprep.subr.bf16.mxu1 %v5923_v22  ;;  %v3135_v12 = vmul.f32 %v3017_v56, %v7198_v54  ;;  %v3019_v25 = vpop.f32.mrb[39].mxu0  ;;  %v5934_v54 = vld [vmem:[#allocation8 + $0x370] sm:$0xff]  }
 0x469   : > { %v3136_v41 = vmul.f32 %v3019_v25, %v7152_v34  ;;  %v5936_v34 = vld [vmem:[#allocation8 + $0x330] sm:$0xff]  }
 0x46a   : > { %v3423_v51 = vpack.c.bf16 %v3135_v12, %v3119_v2 }
 0x46b   : > { %5514 = vmatpush3.bf16.msra.mxu0 %v5924_v47  ;;  %5542 = vmatpush3.bf16.msra.mxu1 %v5925_v63  ;;  %v3424_v49 = vpack.c.bf16 %v3136_v41, %v3120_v7 }
 0x46c   : > { %5515 = vmatprep.subr.bf16.mxu0 %v5926_v13  ;;  %5543 = vmatprep.subr.bf16.mxu1 %v5927_v19 }
 0x46f   : > { %5516 = vmatpush3.bf16.msra.mxu0 %v5928_v16  ;;  %5544 = vmatpush3.bf16.msra.mxu1 %v5929_v31 }
 0x470   : > { %5517 = vmatprep.subr.bf16.mxu0 %v5930_v59  ;;  %5545 = vmatprep.subr.bf16.mxu1 %v5931_v21 }
 0x473   : > { %5518 = vmatpush3.bf16.msra.mxu0 %v5932_v52  ;;  %5546 = vmatpush3.bf16.msra.mxu1 %v5933_v60 }
 0x474   : > { %5519 = vmatprep.subr.bf16.mxu0 %v5934_v54  ;;  %5547 = vmatprep.subr.bf16.mxu1 %v5935_v40 }
 0x477   : > { %5520 = vmatpush3.bf16.msra.mxu0 %v5936_v34  ;;  %5548 = vmatpush3.bf16.msra.mxu1 %v5937_v11 }
 0x478   : > { %5521 = vmatprep.subr.bf16.mxu0 %v5938_v36  ;;  %5549 = vmatprep.subr.bf16.mxu1 %v5939_v3 }
 0x47b   : > { %5522 = vmatpush3.bf16.msra.mxu0 %v5940_v46  ;;  %5550 = vmatpush3.bf16.msra.mxu1 %v5941_v24 }
 0x47e   : > { %4522 = vmatmul.mubr.bf16.vlgmr.msra.gmra.mrb[64].mxu0 %v3407_v18  ;;  %4571 = vmatmul.mubr.bf16.vlgmr.msra.gmra.mrb[80].mxu1 %v7711_v5 }
 0x47f   : > { %4529 = vmatprep.mubr.bf16.mxu0 %v3424_v49  ;;  %4578 = vmatprep.mubr.bf16.mxu1 %v3426_v48 }
 0x486   : > { %4530 = vmatmul.mubr.bf16.gmra.mrb[68].mxu0 %v3423_v51  ;;  %4579 = vmatmul.mubr.bf16.gmra.mrb[84].mxu1 %v3425_v6 }
 0x487   : > { %5592 = vmatprep.mubr.msk.bf16.mxu0 %vm4627_vm5, %v5942_v61 }
 0x4ee   : > { %v5355_v38 = vpop.f32.mrb[40].mxu0  ;;  %v5383_v50 = vpop.f32.mrb[56].mxu1 }
 0x4ef   : > { %v5356_v33 = vpop.f32.mrb[41].mxu0  ;;  %v5384_v4 = vpop.f32.mrb[57].mxu1 }
 0x4f0   : > { %v5357_v28 = vadd.f32 %v5356_v33, %v5355_v38  ;;  %v5385_v58 = vadd.f32 %v5384_v4, %v5383_v50  ;;  %v5358_v30 = vpop.f32.mrb[42].mxu0  ;;  %v5386_v57 = vpop.f32.mrb[58].mxu1 }
 0x4f1   : > { %v5359_v48 = vpop.f32.mrb[43].mxu0  ;;  %v5387_v10 = vpop.f32.mrb[59].mxu1 }
 0x4f2   : > { %v4279_v0 = vadd.f32 %v5385_v58, %v5357_v28  ;;  %v5360_v55 = vadd.f32 %v5359_v48, %v5358_v30  ;;  %v5388_v14 = vadd.f32 %v5387_v10, %v5386_v57 }
 0x4f4   : > { %v4282_v6 = vadd.f32 %v5388_v14, %v5360_v55 }
 0x4f7   : > { %v5361_v26 = vpop.f32.mrb[44].mxu0  ;;  %v5389_v9 = vpop.f32.mrb[60].mxu1 }
 0x4f8   : > { %v5362_v17 = vpop.f32.mrb[45].mxu0  ;;  %v5390_v23 = vpop.f32.mrb[61].mxu1 }
 0x4f9   : > { %v5363_v15 = vadd.f32 %v5362_v17, %v5361_v26  ;;  %v5391_v32 = vadd.f32 %v5390_v23, %v5389_v9  ;;  %v5364_v45 = vpop.f32.mrb[46].mxu0  ;;  %v5392_v53 = vpop.f32.mrb[62].mxu1 }
 0x4fa   : > { %v5365_v35 = vpop.f32.mrb[47].mxu0  ;;  %v5393_v39 = vpop.f32.mrb[63].mxu1 }
 0x4fb   : > { %v4287_v43 = vadd.f32 %v5391_v32, %v5363_v15  ;;  %v5366_v18 = vadd.f32 %v5365_v35, %v5364_v45  ;;  %v5394_v27 = vadd.f32 %v5393_v39, %v5392_v53 }
 0x4fd   : > { %v4290_v29 = vadd.f32 %v5394_v27, %v5366_v18 }
 0x50f   : > { %v5411_v62 = vpop.f32.mrb[48].mxu0  ;;  %v5439_v20 = vpop.f32.mrb[64].mxu1 }
 0x510   : > { %v5412_v22 = vpop.f32.mrb[49].mxu0  ;;  %v5440_v44 = vpop.f32.mrb[65].mxu1 }
 0x511   : > { %v5413_v8 = vadd.f32 %v5412_v22, %v5411_v62  ;;  %v5441_v37 = vadd.f32 %v5440_v44, %v5439_v20  ;;  %v5414_v1 = vpop.f32.mrb[50].mxu0  ;;  %v5442_v47 = vpop.f32.mrb[66].mxu1 }
 0x512   : > { %v5415_v63 = vpop.f32.mrb[51].mxu0  ;;  %v5443_v56 = vpop.f32.mrb[67].mxu1 }
 0x513   : > { %v4328_v13 = vadd.f32 %v5413_v8, %v4279_v0  ;;  %v5416_v19 = vadd.f32 %v5415_v63, %v5414_v1  ;;  %v5444_v2 = vadd.f32 %v5443_v56, %v5442_v47 }
 0x515   : > { %v4377_v12 = vadd.f32 %v5441_v37, %v4328_v13  ;;  %v4331_v25 = vadd.f32 %v5416_v19, %v4282_v6 }
 0x517   : > { %v4380_v7 = vadd.f32 %v5444_v2, %v4331_v25  ;;  %v5417_v41 = vpop.f32.mrb[52].mxu0  ;;  %v5445_v51 = vpop.f32.mrb[68].mxu1 }
 0x518   : > { %v5418_v16 = vpop.f32.mrb[53].mxu0  ;;  %v5446_v31 = vpop.f32.mrb[69].mxu1 }
 0x519   : > { %v5419_v49 = vadd.f32 %v5418_v16, %v5417_v41  ;;  %v5447_v59 = vadd.f32 %v5446_v31, %v5445_v51  ;;  %v5420_v21 = vpop.f32.mrb[54].mxu0  ;;  %v5448_v52 = vpop.f32.mrb[70].mxu1 }
 0x51a   : > { %v5421_v60 = vpop.f32.mrb[55].mxu0  ;;  %v5449_v54 = vpop.f32.mrb[71].mxu1 }
 0x51b   : > { %v4336_v40 = vadd.f32 %v5419_v49, %v4287_v43  ;;  %v5422_v34 = vadd.f32 %v5421_v60, %v5420_v21  ;;  %v5450_v11 = vadd.f32 %v5449_v54, %v5448_v52 }
 0x51d   : > { %v4385_v36 = vadd.f32 %v5447_v59, %v4336_v40  ;;  %v4339_v3 = vadd.f32 %v5422_v34, %v4290_v29 }
 0x51f   : > { %v4388_v46 = vadd.f32 %v5450_v11, %v4339_v3 }
 0x530   : > { %v5467_v24 = vpop.f32.mrb[56].mxu0  ;;  %v5495_v42 = vpop.f32.mrb[72].mxu1 }
 0x531   : > { %v5468_v5 = vpop.f32.mrb[57].mxu0  ;;  %v5496_v61 = vpop.f32.mrb[73].mxu1 }
 0x532   : > { %v5469_v38 = vadd.f32 %v5468_v5, %v5467_v24  ;;  %v5497_v50 = vadd.f32 %v5496_v61, %v5495_v42  ;;  %v5470_v33 = vpop.f32.mrb[58].mxu0  ;;  %v5498_v4 = vpop.f32.mrb[74].mxu1  ;;  %v5943_v5 = vld [vmem:[%s7712_s30 + $0x8] sm:$0xff]   ;;  %v5944_v61 = vld [vmem:[%s7713_s0] sm:$0xff]  }
 0x533   : > { %v5471_v28 = vpop.f32.mrb[59].mxu0  ;;  %v5499_v58 = vpop.f32.mrb[75].mxu1 }
 0x534   : > { %v4426_v30 = vadd.f32 %v5469_v38, %v4377_v12  ;;  %v5472_v57 = vadd.f32 %v5471_v28, %v5470_v33  ;;  %v5500_v48 = vadd.f32 %v5499_v58, %v5498_v4  ;;  %v5982_v38 = vld [vmem:[%s6501_s15] sm:$0xf]  ;;  %v5945_v33 = vld [vmem:[%s7713_s0 + $0x8] sm:$0xff]   ;;  %s5329_s15 = sshll.u32 %s6345_s2, 10 }
 0x535   : > { %s7483_s25 = scalar_lea.hbm %s7716_s19, %s5329_s15 }
 0x536   : > { %v4475_v10 = vadd.f32 %v5497_v50, %v4426_v30  ;;  %v4429_v0 = vadd.f32 %v5472_v57, %v4380_v7  ;;  %v7715_v50 = vld [vmem:[#allocation26_spill] sm:$0xff] }
 0x538   : > { %v4478_v55 = vadd.f32 %v5500_v48, %v4429_v0  ;;  %v5473_v14 = vpop.f32.mrb[60].mxu0  ;;  %v5501_v6 = vpop.f32.mrb[76].mxu1 }
 0x539   : > { %v5474_v26 = vpop.f32.mrb[61].mxu0  ;;  %v5502_v9 = vpop.f32.mrb[77].mxu1 }
 0x53a   : > { %v5475_v17 = vadd.f32 %v5474_v26, %v5473_v14  ;;  %v5503_v23 = vadd.f32 %v5502_v9, %v5501_v6  ;;  %v5476_v15 = vpop.f32.mrb[62].mxu0  ;;  %v5504_v32 = vpop.f32.mrb[78].mxu1 }
 0x53b   : > { %v5477_v45 = vpop.f32.mrb[63].mxu0  ;;  %v5505_v53 = vpop.f32.mrb[79].mxu1 }
 0x53c   : > { %v4434_v35 = vadd.f32 %v5475_v17, %v4385_v36  ;;  %v5478_v39 = vadd.f32 %v5477_v45, %v5476_v15  ;;  %v5506_v43 = vadd.f32 %v5505_v53, %v5504_v32 }
 0x53e   : > { %v4483_v18 = vadd.f32 %v5503_v23, %v4434_v35  ;;  %v4437_v27 = vadd.f32 %v5478_v39, %v4388_v46 }
 0x540   : > { %v4486_v29 = vadd.f32 %v5506_v43, %v4437_v27 }
 0x551   : > { %v5523_v62 = vpop.f32.mrb[64].mxu0  ;;  %v5551_v20 = vpop.f32.mrb[80].mxu1 }
 0x552   : > { %v5524_v22 = vpop.f32.mrb[65].mxu0  ;;  %v5552_v44 = vpop.f32.mrb[81].mxu1 }
 0x553   : > { %v5525_v8 = vadd.f32 %v5524_v22, %v5523_v62  ;;  %v5553_v37 = vadd.f32 %v5552_v44, %v5551_v20  ;;  %v5526_v1 = vpop.f32.mrb[66].mxu0  ;;  %v5554_v47 = vpop.f32.mrb[82].mxu1 }
 0x554   : > { %v5527_v63 = vpop.f32.mrb[67].mxu0  ;;  %v5555_v56 = vpop.f32.mrb[83].mxu1 }
 0x555   : > { %v4524_v13 = vadd.f32 %v5525_v8, %v4475_v10  ;;  %v5528_v19 = vadd.f32 %v5527_v63, %v5526_v1  ;;  %v5556_v2 = vadd.f32 %v5555_v56, %v5554_v47 }
 0x557   : > { %v4573_v12 = vadd.f32 %v5553_v37, %v4524_v13  ;;  %v4527_v25 = vadd.f32 %v5528_v19, %v4478_v55 }
 0x559   : > { %v4576_v7 = vadd.f32 %v5556_v2, %v4527_v25  ;;  %v5529_v41 = vpop.f32.mrb[68].mxu0  ;;  %v5557_v51 = vpop.f32.mrb[84].mxu1 }
 0x55a   : > { %v5530_v16 = vpop.f32.mrb[69].mxu0  ;;  %v5558_v31 = vpop.f32.mrb[85].mxu1 }
 0x55b   : > { %v5531_v49 = vadd.f32 %v5530_v16, %v5529_v41  ;;  %v5559_v59 = vadd.f32 %v5558_v31, %v5557_v51  ;;  %v5532_v21 = vpop.f32.mrb[70].mxu0  ;;  %v5560_v52 = vpop.f32.mrb[86].mxu1  ;;  %v4591_v60 = vpack.c.bf16 %v4576_v7, %v4573_v12 }
 0x55c   : > { %v5533_v54 = vpop.f32.mrb[71].mxu0  ;;  %v5561_v40 = vpop.f32.mrb[87].mxu1 }
 0x55d   : > { %v4532_v34 = vadd.f32 %v5531_v49, %v4483_v18  ;;  %v5534_v11 = vadd.f32 %v5533_v54, %v5532_v21  ;;  %v5562_v36 = vadd.f32 %v5561_v40, %v5560_v52  ;;  %5588 = vmatprep.subr.bf16.mxu0 %v4591_v60 }
 0x55e   : > { %5589 = vmatpush3.bf16.msra.mxu0 %v4591_v60 }
 0x55f   : > { %v4581_v3 = vadd.f32 %v5559_v59, %v4532_v34  ;;  %v4535_v46 = vadd.f32 %v5534_v11, %v4486_v29 }
 0x561   : > { %v4584_v24 = vadd.f32 %v5562_v36, %v4535_v46 }
 0x563   : > { %v4592_v42 = vpack.c.bf16 %v4584_v24, %v4581_v3 }
 0x565   : > { %5590 = vmatprep.subr.bf16.mxu0 %v4592_v42 }
 0x566   : > { %5591 = vmatpush3.bf16.msra.mxu0 %v4592_v42 }
 0x567   : > { %5613 = vmatprep.subr.msk.bf16.mxu0 %vm744_vm0, %v5982_v38 }
 0x569   : > { %5593 = vmatmul.mubr.msk.bf16.vlgmr.msra.gmra.mrb[72].mxu0 %vm4627_vm5, %v5943_v5 }
 0x56a   : > { %5597 = vmatpush3.bf16.msra.mxu0 %v7715_v50  ;;  %5598 = vmatprep.mubr.msk.bf16.mxu0 %vm737_vm1, %v5944_v61 }
 0x575   : > { %5599 = vmatmul.mubr.msk.bf16.vlgmr.msra.gmra.mrb[72].mxu0 %vm737_vm1, %v5945_v33 }
 0x576   : > { %6108 = shalt.err (!%p6105_p10)
}
 0x577   : > { %s6109_s21 = scalar_lea.hbm %s7483_s25, 1024  ;;  %s6113_s13 = scalar_lea.hbm %s7716_s19, 2048 }
 0x578   : > { %p6110_p0 = scmp.ne.s32.totalorder %s7483_s25, %s6109_s21  ;;  %p6114_p4 = scmp.lt.u32.totalorder %s7483_s25, %s7716_s19 }
 0x579   : > { %p6115_p12 = scmp.lt.u32.totalorder %s6113_s13, %s6109_s21  ;;  %p6117_p8 = scmp.lt.u32.totalorder %s6109_s21, %s7483_s25 }
 0x57a   : > { %p6111_p2 = pnand %p6110_p0, %p7717_p11 }
 0x57b   : > { %p6116_p7 = por %p6115_p12, %p6114_p4 }
 0x57c   : > { %p6112_p3 = pneg %p6111_p2 }
 0x57d   : > { %p6118_p13 = por %p6117_p8, %p6116_p7 }
 0x57f   : > { %p6119_p1 = pnand %p6118_p13, %p6112_p3 }
 0x581   : > { %6122 = shalt.err (!%p6119_p1)
}
 0x582   : > { %s6214_s22 = smov 256   ;;  %s6215_s24 = smov 16   ;;  %v4600_v4 = vpop.permute.xlu1 %4599  ;;  %v4773_v14 = vpop.permute.xlu0 %4772 }
 0x583   : > { %5631 = dma.vmem_to_hbm [thread:$0]  (%p7717_p11), %s7477_s6, 1024, %s7483_s25, %s4798_s1, %s6214_s22, %s6214_s22, %s6215_s24  }
 0x584   : > { %s4975_s21 = sshll.u32 %s7263_s23, 5  ;;  %s5327_s25 = sshll.u32 %s6345_s2, 9 }
 0x585   : > { %s683_s15 = scalar_lea.vmem [#allocation10], %s4975_s21  ;;  %s7718_s13 = sld [smem:[#allocation56_spill]] }
 0x586   : > { %v4605_v28 = vpop.permute.xlu1 %4604  ;;  %s4811_s6 = sshll.u32 %s683_s15, 4  ;;  %s4793_s20 = scalar_lea.sflag [#allocation4], %s7263_s23  ;;  %s7511_s6 = int_to_ptr.vmem [resolvable:$true] %s4811_s6 }
 0x587   : > { %s6123_s2 = scalar_lea.vmem %s7511_s6, 512  ;;  %s6216_s22 = smov [#allocation10]  }
 0x588   : > { %p6124_p6 = scmp.ne.s32.totalorder %s7511_s6, %s6123_s2  ;;  %s6127_s24 = sshll.u32 %s6216_s22, 4  ;;  %s6128_s24 = int_to_ptr.vmem [resolvable:$false] %s6127_s24 }
 0x589   : > { %s6129_s21 = scalar_lea.vmem %s6128_s24, 1024  ;;  %p6130_p10 = scmp.lt.s32.totalorder %s7511_s6, %s6128_s24 }
 0x58a   : > { %v4610_v58 = vpop.permute.xlu1 %4609  ;;  %p6125_p9 = pnand %p6124_p6, %p7717_p11  ;;  %p6131_p0 = scmp.lt.s32.totalorder %s6129_s21, %s6123_s2 }
 0x58b   : > { %s7516_s29 = scalar_lea.hbm %s7718_s13, %s5327_s25 }
 0x58c   : > { %p6126_p5 = pneg %p6125_p9  ;;  %p6132_p2 = por %p6131_p0, %p6130_p10 }
 0x58e   : > { %v4615_v30 = vpop.permute.xlu1 %4614  ;;  %p6133_p3 = pnand %p6132_p2, %p6126_p5 }
 0x592   : > { %v4763_v57 = vpop.permute.xlu1 %4762 }
 0x596   : > { %v4768_v48 = vpop.permute.xlu1 %4767 }
 0x59a   : > { %v4778_v15 = vpop.permute.xlu1 %4777 }
 0x648   : > { %v5600_v10 = vpop.f32.mrb[72].mxu0 }
 0x649   : > { %v5602_v0 = vadd.f32 %v5600_v10, %v4610_v58  ;;  %v4737_v55 = vpop.f32.mrb[73].mxu0 }
 0x64a   : > { %v5603_v6 = vadd.f32 %v4737_v55, %v4600_v4  ;;  %v5601_v26 = vpop.f32.mrb[74].mxu0 }
 0x64b   : > { %v4782_v9 = vadd.f32 %v5602_v0, %v4773_v14  ;;  %v5604_v17 = vadd.f32 %v5601_v26, %v4615_v30  ;;  %v4740_v23 = vpop.f32.mrb[75].mxu0 }
 0x64c   : > { %v4780_v32 = vadd.f32 %v5603_v6, %v4763_v57  ;;  %v5605_v45 = vadd.f32 %v4740_v23, %v4605_v28 }
 0x64d   : > { %v4786_v53 = vmax.f32 %v4782_v9, 0.0  ;;  %v4783_v35 = vadd.f32 %v5604_v17, %v4778_v15 }
 0x64e   : > { %v4784_v39 = vmax.f32 %v4780_v32, 0.0  ;;  %v4781_v43 = vadd.f32 %v5605_v45, %v4768_v48 }
 0x64f   : > { %4790 = vst [vmem:[%s683_s15 + $0x10] sm:$0xff] %v4786_v53  ;;  %v4787_v18 = vmax.f32 %v4783_v35, 0.0 }
 0x650   : > { %4788 = vst [vmem:[%s683_s15] sm:$0xff] %v4784_v39  ;;  %v4785_v27 = vmax.f32 %v4781_v43, 0.0 }
 0x651   : > { %4791 = vst [vmem:[%s683_s15 + $0x18] sm:$0xff] %v4787_v18 }
 0x652   : > { %4789 = vst [vmem:[%s683_s15 + $0x8] sm:$0xff] %v4785_v27 }
 0x653   : > { %6136 = shalt.err (!%p6133_p3)
}
 0x654   : > { %s6137_s15 = scalar_lea.hbm %s7516_s29, 512  ;;  %s6141_s27 = scalar_lea.hbm %s7718_s13, 1024 }
 0x655   : > { %p6138_p4 = scmp.ne.s32.totalorder %s7516_s29, %s6137_s15  ;;  %p6142_p8 = scmp.lt.u32.totalorder %s7516_s29, %s7718_s13 }
 0x656   : > { %p6143_p13 = scmp.lt.u32.totalorder %s6141_s27, %s6137_s15  ;;  %p6145_p6 = scmp.lt.u32.totalorder %s6137_s15, %s7516_s29 }
 0x657   : > { %p6139_p12 = pnand %p6138_p4, %p7717_p11 }
 0x658   : > { %p6144_p1 = por %p6143_p13, %p6142_p8 }
 0x659   : > { %p6140_p7 = pneg %p6139_p12 }
 0x65a   : > { %p6146_p9 = por %p6145_p6, %p6144_p1 }
 0x65c   : > { %p6147_p5 = pnand %p6146_p9, %p6140_p7 }
 0x65e   : > { %6150 = shalt.err (!%p6147_p5)
}
 0x65f   : > { %s6217_s2 = smov 128   ;;  %s6218_s21 = smov 8  }
 0x660   : > { %5630 = dma.vmem_to_hbm [thread:$0]  (%p7717_p11), %s7511_s6, 512, %s7516_s29, %s4793_s20, %s6217_s2, %s6217_s2, %s6218_s21  }
 0x661 PF: > { %s7719_s25 = sld [smem:[#allocation21_spill]]  ;;  %s7720_s1 = sld [smem:[#allocation18_spill]] }
 0x662   : > { %s7721_s22 = sld [smem:[#allocation25_spill]] }
 0x667   : > { %p5662_p10 = scmp.ge.s32.totalorder %s7719_s25, 2  ;;  %s4843_s27 = sand.u32 1, %s7720_s1  }
 0x668   : > { %p7722_p0 = scmp.ne.s32.totalorder %s7721_s22, 0  ;;  %s4844_s15 = scalar_lea.sflag [#allocation4], %s4843_s27 }
 0x66a   : > { %p5648_p2 = pnand %p5662_p10, %p7722_p0 }
 0x66c   : > { %6180 = dma.done.wait (!%p5648_p2), %s4844_s15, 512  }
 0x66d   : > { %6182 = vsyncadd (!%p5648_p2), %s4844_s15, 4294966784  ;;  %s4853_s24 = scalar_lea.sflag [#allocation12], %s4843_s27 }
 0x66e   : > { %6184 = dma.done.wait (!%p5648_p2), %s4853_s24, 1024  }
 0x66f   : > { %6186 = vsyncadd (!%p5648_p2), %s4853_s24, 4294966272  ;;  %s7723_s24 = sld [smem:[#allocation22_spill]]  ;;  %s7724_s1 = sld [smem:[#allocation19_spill]] }
 0x670   : > { %s7725_s22 = sld [smem:[#allocation20_spill]]  ;;  %s7726_s23 = sld [smem:[#allocation23_spill]] }
 0x675   : > { %p37_p11 = scmp.ge.s32.totalorder %s7723_s24, 4  }
 0x677   :  { %39 = sbr.rel (!%p37_p11) target bundleno = 19 (0x13), region = 165 }
 0x67e   :  { %4858 = vsyncpa [#allocation3], 1 }
 0x67f   :  { %4860 = vsyncpa [#allocation3 + $0x1], 1 }
 0x680   :  { %4861 = vsyncpa [#allocation6], 1 }
 0x681   :  { %4862 = vsyncpa [#allocation9], 1 }
 0x682   :  { %4863 = vsyncpa [#allocation4], 1 }
 0x683   :  { %4865 = vsyncpa [#allocation4 + $0x1], 1 }
 0x684   :  { %4866 = vsyncpa [#allocation12], 1 }
 0x685   :  { %4868 = vsyncpa [#allocation12 + $0x1], 1 }

</bundles_post_ra>
